<compile_context>
chip_gen: v7x
topology: tpu7x:2x2x1
jax: 0.10.0
libtpu: 0.0.40
codegen_flags: <defaults>
</compile_context>

<pallas_src>
import math
import numpy as np
import jax
import jax.numpy as jnp
from jax import lax
from jax.experimental import pallas as pl
from jax.experimental.pallas import tpu as pltpu

# ---------------- configuration (small shapes consistent with the module) ---------
NUM_CLASSES = 2
NUM_CHAN = 8                 # input_size[1] : EEG channels
T_LEN = 64                   # input_size[2] : time samples
SAMPLING_RATE = 32
NUM_T = 4                    # temporal conv filters
OUT_GRAPH = 8
POOL = 4
POOL_STEP_RATE = 0.5
WINDOWS = (0.5, 0.25, 0.125)
IDX_GRAPH = [2, 3, 3]        # channels per brain area (sums to NUM_CHAN)
BRAIN_AREA = len(IDX_GRAPH)
BN_EPS = 1e-5
LEAKY_SLOPE = 0.01

KERNEL_WIDTHS = [int(w * SAMPLING_RATE) for w in WINDOWS]         # [16, 8, 4]
T_CONV = [T_LEN - kw + 1 for kw in KERNEL_WIDTHS]                 # [49, 57, 61]
POOL_STEP = int(POOL_STEP_RATE * POOL)                            # 2
T_POOL = [(tc - POOL) // POOL_STEP + 1 for tc in T_CONV]          # [23, 27, 29]
T_TOT = sum(T_POOL)                                               # 79
T2 = (T_TOT - 2) // 2 + 1                                         # 39
FEAT = NUM_T * T2                                                 # 156
CONV_PER_FILTER = sum(T_CONV)                                     # 167
CONV_COLS = NUM_T * CONV_PER_FILTER                               # 668

# lane-padded sizes (multiples of 128)
LANE = 128
T_TOT_PAD = 128
POOL1_PAD = NUM_T * T_TOT_PAD                                     # 512
CONV_PAD = ((CONV_COLS + LANE - 1) // LANE) * LANE                # 768
FEAT_PAD = ((FEAT + LANE - 1) // LANE) * LANE                     # 256

# batching / tiling
SAMPLES_PER_BLOCK = 16                        # 16 samples * 8 chans = 128 MXU rows
ROW_BLOCK = SAMPLES_PER_BLOCK * NUM_CHAN      # 128
A_ROWS = SAMPLES_PER_BLOCK * BRAIN_AREA       # 48
TOTAL_SAMPLES = 32                            # -> grid of 2 row blocks

MIXW_IDX = 4                                  # index of the SMEM mix-weight const


# ------------------------------- host-side helpers --------------------------------
def xavier_uniform(key, shape, gain=1.0):
    fan_out, fan_in = shape[0], shape[-1]
    limit = gain * math.sqrt(6.0 / (fan_in + fan_out))
    return np.asarray(jax.random.uniform(key, shape, jnp.float32, -limit, limit))


def aggregate_matrix(idx_graph, num_chan):
    """Dense (area, chan) matrix implementing the Aggregator group-mean."""
    a = len(idx_graph)
    m = np.zeros((a, num_chan), np.float32)
    start = 0
    for i, n in enumerate(idx_graph):
        end = start + n if i < a - 1 else num_chan
        m[i, start:end] = 1.0 / (end - start)
        start += n
    return m


def build_conv_constants(branch_w, branch_b):
    """Toeplitz conv matrix, bias row, pool-of-squares matrix and pad-bias row.

    Column layout (conv and pooled): filter-major; inside each filter the three
    branches concatenated in time order -> reproduces torch.cat((T1,T2,T3), -1)
    with zero data movement.  Pooled columns live in 128-wide per-filter blocks
    (first T_TOT real, rest padding).
    """
    conv_mat = np.zeros((T_LEN, CONV_PAD), np.float32)
    conv_bias = np.zeros((1, CONV_PAD), np.float32)
    pool_sq = np.zeros((CONV_PAD, POOL1_PAD), np.float32)
    pad_one = np.zeros((1, POOL1_PAD), np.float32)
    conv_off = [0, T_CONV[0], T_CONV[0] + T_CONV[1]]
    pool_off = [0, T_POOL[0], T_POOL[0] + T_POOL[1]]
    for t in range(NUM_T):
        for br in range(len(WINDOWS)):
            w = np.asarray(branch_w[br])[t]
            b = float(np.asarray(branch_b[br])[t])
            kw, tc, tp = KERNEL_WIDTHS[br], T_CONV[br], T_POOL[br]
            c0 = t * CONV_PER_FILTER + conv_off[br]
            p0 = t * T_TOT_PAD + pool_off[br]
            for j in range(tc):                       # conv_mat[j+k, c0+j] = w[k]
                conv_mat[j:j + kw, c0 + j] = w
            conv_bias[0, c0:c0 + tc] = b
            for j in range(tp):                       # avg-pool(4, stride 2) of squares
                pool_sq[c0 + 2 * j:c0 + 2 * j + POOL, p0 + j] = 1.0 / POOL
        # padded pooled columns get +1.0 -> log(1)=0 (keeps padding finite)
        pad_one[0, t * T_TOT_PAD + T_TOT:(t + 1) * T_TOT_PAD] = 1.0
    return conv_mat, conv_bias, pool_sq, pad_one


def build_pool2_matrix():
    """(1,2) average pool as a (POOL1_PAD, FEAT_PAD) matrix; exact 0.5 entries."""
    pool2 = np.zeros((POOL1_PAD, FEAT_PAD), np.float32)
    for t in range(NUM_T):
        for j in range(T2):
            pool2[t * T_TOT_PAD + 2 * j:t * T_TOT_PAD + 2 * j + 2, t * T2 + j] = 0.5
    return pool2


# ------------------------------- the fused Pallas kernel --------------------------
def lggnet_kernel(x_ref, convm_ref, convb_ref, poolsq_ref, padone_ref,
                  mixw_ref, mixb_ref, pool2_ref, bnt2s_ref, bnt2sh_ref,
                  lfw_ref, lfb_ref, agg_ref, gsym_ref, eye_ref,
                  bn1s_ref, bn1b_ref, gw_ref, gb_ref, bn2s_ref, bn2b_ref,
                  fcw_ref, fcmask_ref, rsum_ref, fold_ref, fcb_ref, o_ref):
    f32 = jnp.float32
    bf16 = jnp.bfloat16

    # ---- Tception: Toeplitz conv (bf16 MXU, f32 acc) + bias ----------------------
    x = x_ref[...].astype(bf16)                                          # (128, 64)
    c = jnp.dot(x, convm_ref[...], preferred_element_type=f32) + convb_ref[...]

    # ---- PowerLayer: square (f32) -> avg-pool of squares (bf16 MXU) -> log -------
    sq = (c * c).astype(bf16)
    pooled = jnp.dot(sq, poolsq_ref[...], preferred_element_type=f32) + padone_ref[...]
    p = jnp.log(pooled)                                                  # (128, 512)

    # ---- BN_t (folded) + 1x1 channel-mix conv: 16 scalar FMAs on the VPU ---------
    p_blk = [p[:, it * T_TOT_PAD:(it + 1) * T_TOT_PAD] for it in range(NUM_T)]
    m_cols = []
    for ot in range(NUM_T):
        acc = p_blk[0] * mixw_ref[ot, 0]
        for it in range(1, NUM_T):
            acc = acc + p_blk[it] * mixw_ref[ot, it]
        m_cols.append(acc)
    m = jnp.concatenate(m_cols, axis=-1) + mixb_ref[...]                 # (128, 512)
    m = jnp.where(m >= 0.0, m, LEAKY_SLOPE * m)                          # LeakyReLU

    # ---- AvgPool(1,2) (bf16 MXU) + BN_t_ affine (f32 rows) ------------------------
    y = jnp.dot(m.astype(bf16), pool2_ref[...], preferred_element_type=f32)
    y = y * bnt2s_ref[...] + bnt2sh_ref[...]                             # (128, 256)
    # permute(0,2,1,3)+reshape are identities in this (row=(b,chan), col=(filter,t))
    # layout: nothing to do.

    # ---- local_filter_fun: relu(x * w - b) ----------------------------------------
    z = jnp.maximum(y * lfw_ref[...] - lfb_ref[...], 0.0)                # (128, 256)

    # ---- Aggregator: block-diagonal group mean over channels, all samples at once -
    xa = jnp.dot(agg_ref[...], z, preferred_element_type=f32)            # (48, 256)

    # ---- adjacency for all samples at once (block-diagonal trick) ------------------
    s = lax.dot_general(xa, xa, (((1,), (1,)), ((), ())),
                        preferred_element_type=f32)                      # (48, 48)
    adj = jnp.maximum(s * gsym_ref[...], 0.0) + eye_ref[...]             # relu + I
    rowsum = jnp.sum(adj, axis=-1, keepdims=True)
    rowsum = jnp.where(rowsum == 0.0, 1.0, rowsum)
    d_row = lax.rsqrt(rowsum)                                            # (48, 1)
    # adj is symmetric, so the column sums equal rowsum^T; computed along axis 0 to
    # stay in-layout (avoids an explicit transpose relayout).
    colsum = jnp.sum(adj, axis=0, keepdims=True)
    colsum = jnp.where(colsum == 0.0, 1.0, colsum)
    d_col = lax.rsqrt(colsum)                                            # (1, 48)
    adj = adj * d_row * d_col                                            # D^-1/2 A D^-1/2

    # ---- bn -> GCN -> bn_ (single matmuls over all (sample, area) rows) ------------
    xbn = xa * bn1s_ref[...] + bn1b_ref[...]
    h = jnp.dot(xbn, gw_ref[...], preferred_element_type=f32) - gb_ref[...]
    h = jnp.maximum(jnp.dot(adj, h, preferred_element_type=f32), 0.0)    # (48, 8)
    h = h * bn2s_ref[...] + bn2b_ref[...]

    # ---- FC over flattened (area, out_graph): masked matmul + block-diag reduction -
    q = jnp.dot(h, fcw_ref[...], preferred_element_type=f32) * fcmask_ref[...]  # (48, 6)
    zsum = jnp.dot(rsum_ref[...], q, preferred_element_type=f32)                # (16, 6)
    logits = jnp.dot(zsum, fold_ref[...], preferred_element_type=f32) + fcb_ref[...]
    o_ref[...] = logits                                                  # (16, 2)


# ------------------------------ parameter construction ----------------------------
def make_constants(key):
    keys = jax.random.split(key, 24)
    ki = iter(keys)
    nxt = lambda: next(ki)

    # --- raw module parameters (torch-equivalent init, eval-mode BN) ---
    branch_w = [xavier_uniform(nxt(), (NUM_T, kw)) for kw in KERNEL_WIDTHS]
    branch_b = [np.asarray(jax.random.uniform(nxt(), (NUM_T,), jnp.float32, -0.1, 0.1))
                for _ in KERNEL_WIDTHS]

    def bn_affine(k, n):               # running_mean = 0, running_var = 1 (eval mode)
        k1, k2 = jax.random.split(k)
        gamma = np.asarray(jax.random.uniform(k1, (n,), jnp.float32, 0.5, 1.5))
        beta = np.asarray(jax.random.uniform(k2, (n,), jnp.float32, -0.1, 0.1))
        scale = (gamma / np.sqrt(1.0 + BN_EPS)).astype(np.float32)
        return scale, beta.astype(np.float32)

    bn_t_s, bn_t_sh = bn_affine(nxt(), NUM_T)
    w1x1 = xavier_uniform(nxt(), (NUM_T, NUM_T))
    b1x1 = np.asarray(jax.random.uniform(nxt(), (NUM_T,), jnp.float32, -0.1, 0.1))
    bn_t2_s, bn_t2_sh = bn_affine(nxt(), NUM_T)

    lf_w = xavier_uniform(nxt(), (NUM_CHAN, FEAT))
    lf_b = np.zeros((NUM_CHAN, 1), np.float32)            # torch init: zeros

    global_adj = xavier_uniform(nxt(), (BRAIN_AREA, BRAIN_AREA))
    gsym = (global_adj + global_adj.T).astype(np.float32)

    bn1_s, bn1_sh = bn_affine(nxt(), BRAIN_AREA)
    bn2_s, bn2_sh = bn_affine(nxt(), BRAIN_AREA)

    gcn_w = xavier_uniform(nxt(), (FEAT, OUT_GRAPH), gain=1.414)
    gcn_b = np.zeros((1, OUT_GRAPH), np.float32)           # torch init: zeros
    fc_w = xavier_uniform(nxt(), (NUM_CLASSES, BRAIN_AREA * OUT_GRAPH))
    fc_b = np.asarray(jax.random.uniform(nxt(), (1, NUM_CLASSES), jnp.float32, -0.1, 0.1))

    # --- fused / padded host-side constants ---
    conv_mat, conv_bias, pool_sq, pad_one = build_conv_constants(branch_w, branch_b)
    pool2 = build_pool2_matrix()

    # BN_t folded into the 1x1-conv scalars (16 FMA weights) and its bias row.
    mixw = (w1x1 * bn_t_s[None, :]).astype(np.float32)                    # (4, 4)
    beff = (w1x1 @ bn_t_sh + b1x1).astype(np.float32)                     # (4,)
    mixb = np.zeros((1, POOL1_PAD), np.float32)
    for ot in range(NUM_T):
        mixb[0, ot * T_TOT_PAD:(ot + 1) * T_TOT_PAD] = beff[ot]

    # BN_t_ applied after the (1,2) pool as f32 scale/shift rows (zeros in padding).
    bnt2_scale = np.zeros((1, FEAT_PAD), np.float32)
    bnt2_shift = np.zeros((1, FEAT_PAD), np.float32)
    for t in range(NUM_T):
        bnt2_scale[0, t * T2:(t + 1) * T2] = bn_t2_s[t]
        bnt2_shift[0, t * T2:(t + 1) * T2] = bn_t2_sh[t]

    lfw_pad = np.zeros((NUM_CHAN, FEAT_PAD), np.float32)
    lfw_pad[:, :FEAT] = lf_w
    lfw_tiled = np.tile(lfw_pad, (SAMPLES_PER_BLOCK, 1))                  # (128, 256)
    lfb_tiled = np.tile(lf_b, (SAMPLES_PER_BLOCK, 1))                     # (128, 1)

    agg_bd = np.kron(np.eye(SAMPLES_PER_BLOCK, dtype=np.float32),
                     aggregate_matrix(IDX_GRAPH, NUM_CHAN))               # (48, 128)
    gsym_bd = np.kron(np.eye(SAMPLES_PER_BLOCK, dtype=np.float32), gsym)  # (48, 48)
    eye_bd = np.eye(A_ROWS, dtype=np.float32)

    bn1s_t = np.tile(bn1_s.reshape(BRAIN_AREA, 1), (SAMPLES_PER_BLOCK, 1))
    bn1b_t = np.tile(bn1_sh.reshape(BRAIN_AREA, 1), (SAMPLES_PER_BLOCK, 1))
    bn2s_t = np.tile(bn2_s.reshape(BRAIN_AREA, 1), (SAMPLES_PER_BLOCK, 1))
    bn2b_t = np.tile(bn2_sh.reshape(BRAIN_AREA, 1), (SAMPLES_PER_BLOCK, 1))

    gcn_w_pad = np.zeros((FEAT_PAD, OUT_GRAPH), np.float32)
    gcn_w_pad[:FEAT, :] = gcn_w

    # FC: per-area weight blocks stacked along lanes + selection mask + reductions.
    fcw_cat = np.zeros((OUT_GRAPH, BRAIN_AREA * NUM_CLASSES), np.float32)
    for a in range(BRAIN_AREA):
        fcw_cat[:, a * NUM_CLASSES:(a + 1) * NUM_CLASSES] = \
            fc_w[:, a * OUT_GRAPH:(a + 1) * OUT_GRAPH].T
    fc_mask = np.zeros((A_ROWS, BRAIN_AREA * NUM_CLASSES), np.float32)
    for r in range(A_ROWS):
        a = r % BRAIN_AREA
        fc_mask[r, a * NUM_CLASSES:(a + 1) * NUM_CLASSES] = 1.0
    rsum = np.kron(np.eye(SAMPLES_PER_BLOCK, dtype=np.float32),
                   np.ones((1, BRAIN_AREA), np.float32))                  # (16, 48)
    fold6 = np.kron(np.ones((BRAIN_AREA, 1), np.float32),
                    np.eye(NUM_CLASSES, dtype=np.float32))                # (6, 2)

    consts = [
        (conv_mat, jnp.bfloat16),     # 0
        (conv_bias, jnp.float32),     # 1
        (pool_sq, jnp.bfloat16),      # 2
        (pad_one, jnp.float32),       # 3
        (mixw, jnp.float32),          # 4  (SMEM)
        (mixb, jnp.float32),          # 5
        (pool2, jnp.bfloat16),        # 6
        (bnt2_scale, jnp.float32),    # 7
        (bnt2_shift, jnp.float32),    # 8
        (lfw_tiled, jnp.float32),     # 9
        (lfb_tiled, jnp.float32),     # 10
        (agg_bd, jnp.float32),        # 11
        (gsym_bd, jnp.float32),       # 12
        (eye_bd, jnp.float32),        # 13
        (bn1s_t, jnp.float32),        # 14
        (bn1b_t, jnp.float32),        # 15
        (gcn_w_pad, jnp.float32),     # 16
        (gcn_b, jnp.float32),         # 17
        (bn2s_t, jnp.float32),        # 18
        (bn2b_t, jnp.float32),        # 19
        (fcw_cat, jnp.float32),       # 20
        (fc_mask, jnp.float32),       # 21
        (rsum, jnp.float32),          # 22
        (fold6, jnp.float32),         # 23
        (fc_b, jnp.float32),          # 24
    ]
    return tuple(jnp.asarray(a, d) for a, d in consts)


# ----------------------------------- forward --------------------------------------
def lggnet_forward(x, consts):
    # x: (N, NUM_CHAN, T_LEN) float32.  The channel reorder x[:, :, self.i, :] is
    # the identity here (i == range(NUM_CHAN)); a non-identity ordering would be
    # folded into the lfw/agg constants rather than done as a runtime gather.
    n = x.shape[0]
    assert n % SAMPLES_PER_BLOCK == 0
    grid = (n // SAMPLES_PER_BLOCK,)
    x2 = x.reshape(n * NUM_CHAN, T_LEN)

    in_specs = [pl.BlockSpec((ROW_BLOCK, T_LEN), lambda i: (i, 0))]
    for idx, c in enumerate(consts):
        if idx == MIXW_IDX:
            # 16 mix scalars live in SMEM (scalar reads in the kernel).
            in_specs.append(pl.BlockSpec(memory_space=pltpu.MemorySpace.SMEM))
        else:
            # Fixed block index across the grid -> constant stays resident in VMEM.
            in_specs.append(pl.BlockSpec(c.shape, lambda i: (0, 0)))
    out_specs = pl.BlockSpec((SAMPLES_PER_BLOCK, NUM_CLASSES), lambda i: (i, 0))

    return pl.pallas_call(
        lggnet_kernel,
        out_shape=jax.ShapeDtypeStruct((n, NUM_CLASSES), jnp.float32),
        grid=grid,
        in_specs=in_specs,
        out_specs=out_specs,
        compiler_params=pltpu.CompilerParams(
            dimension_semantics=("parallel",),      # v7x: split row blocks over 2 TCs
            vmem_limit_bytes=32 * 1024 * 1024),
    )(x2, *consts)


# ------------------------------------- main ----------------------------------------
if __name__ == "__main__":
    key = jax.random.PRNGKey(0)
    pkey, xkey = jax.random.split(key)
    consts = make_constants(pkey)
    x = jax.random.normal(xkey, (TOTAL_SAMPLES, NUM_CHAN, T_LEN), jnp.float32)

    fwd = jax.jit(lambda inp: lggnet_forward(inp, consts))
    logits = fwd(x)
    jax.block_until_ready(logits)

    assert logits.shape == (TOTAL_SAMPLES, NUM_CLASSES), logits.shape
    assert bool(jnp.all(jnp.isfinite(logits)))
    print("KERNEL_OK")
</pallas_src>

<mosaic_0001>
module attributes {stable_mosaic.version = 11 : i64} {
  func.func @lggnet_kernel(%arg0: i32, %arg1: memref<128x64xf32, #tpu.memory_space<vmem>>, %arg2: memref<64x768xbf16, #tpu.memory_space<vmem>>, %arg3: memref<1x768xf32, #tpu.memory_space<vmem>>, %arg4: memref<768x512xbf16, #tpu.memory_space<vmem>>, %arg5: memref<1x512xf32, #tpu.memory_space<vmem>>, %arg6: memref<4x4xf32, #tpu.memory_space<smem>>, %arg7: memref<1x512xf32, #tpu.memory_space<vmem>>, %arg8: memref<512x256xbf16, #tpu.memory_space<vmem>>, %arg9: memref<1x256xf32, #tpu.memory_space<vmem>>, %arg10: memref<1x256xf32, #tpu.memory_space<vmem>>, %arg11: memref<128x256xf32, #tpu.memory_space<vmem>>, %arg12: memref<128x1xf32, #tpu.memory_space<vmem>>, %arg13: memref<48x128xf32, #tpu.memory_space<vmem>>, %arg14: memref<48x48xf32, #tpu.memory_space<vmem>>, %arg15: memref<48x48xf32, #tpu.memory_space<vmem>>, %arg16: memref<48x1xf32, #tpu.memory_space<vmem>>, %arg17: memref<48x1xf32, #tpu.memory_space<vmem>>, %arg18: memref<256x8xf32, #tpu.memory_space<vmem>>, %arg19: memref<1x8xf32, #tpu.memory_space<vmem>>, %arg20: memref<48x1xf32, #tpu.memory_space<vmem>>, %arg21: memref<48x1xf32, #tpu.memory_space<vmem>>, %arg22: memref<8x6xf32, #tpu.memory_space<vmem>>, %arg23: memref<48x6xf32, #tpu.memory_space<vmem>>, %arg24: memref<16x48xf32, #tpu.memory_space<vmem>>, %arg25: memref<6x2xf32, #tpu.memory_space<vmem>>, %arg26: memref<1x2xf32, #tpu.memory_space<vmem>>, %arg27: memref<16x2xf32, #tpu.memory_space<vmem>>) attributes {dimension_semantics = [#tpu.dimension_semantics<parallel>], iteration_bounds = array<i64: 2>, scalar_prefetch = 0 : i64, scratch_operands = 0 : i64, tpu.core_type = #tpu.core_type<tc>, window_params = [{transform_indices = @transform_0, window_bounds = array<i64: 128, 64>}, {pipeline_mode = #tpu.pipeline_mode<synchronous>, transform_indices = @transform_1, window_bounds = array<i64: 64, 768>}, {pipeline_mode = #tpu.pipeline_mode<synchronous>, transform_indices = @transform_2, window_bounds = array<i64: 1, 768>}, {pipeline_mode = #tpu.pipeline_mode<synchronous>, transform_indices = @transform_3, window_bounds = array<i64: 768, 512>}, {pipeline_mode = #tpu.pipeline_mode<synchronous>, transform_indices = @transform_4, window_bounds = array<i64: 1, 512>}, {transform_indices = @transform_5, window_bounds = array<i64: 4, 4>}, {pipeline_mode = #tpu.pipeline_mode<synchronous>, transform_indices = @transform_6, window_bounds = array<i64: 1, 512>}, {pipeline_mode = #tpu.pipeline_mode<synchronous>, transform_indices = @transform_7, window_bounds = array<i64: 512, 256>}, {pipeline_mode = #tpu.pipeline_mode<synchronous>, transform_indices = @transform_8, window_bounds = array<i64: 1, 256>}, {pipeline_mode = #tpu.pipeline_mode<synchronous>, transform_indices = @transform_9, window_bounds = array<i64: 1, 256>}, {pipeline_mode = #tpu.pipeline_mode<synchronous>, transform_indices = @transform_10, window_bounds = array<i64: 128, 256>}, {pipeline_mode = #tpu.pipeline_mode<synchronous>, transform_indices = @transform_11, window_bounds = array<i64: 128, 1>}, {pipeline_mode = #tpu.pipeline_mode<synchronous>, transform_indices = @transform_12, window_bounds = array<i64: 48, 128>}, {pipeline_mode = #tpu.pipeline_mode<synchronous>, transform_indices = @transform_13, window_bounds = array<i64: 48, 48>}, {pipeline_mode = #tpu.pipeline_mode<synchronous>, transform_indices = @transform_14, window_bounds = array<i64: 48, 48>}, {pipeline_mode = #tpu.pipeline_mode<synchronous>, transform_indices = @transform_15, window_bounds = array<i64: 48, 1>}, {pipeline_mode = #tpu.pipeline_mode<synchronous>, transform_indices = @transform_16, window_bounds = array<i64: 48, 1>}, {pipeline_mode = #tpu.pipeline_mode<synchronous>, transform_indices = @transform_17, window_bounds = array<i64: 256, 8>}, {pipeline_mode = #tpu.pipeline_mode<synchronous>, transform_indices = @transform_18, window_bounds = array<i64: 1, 8>}, {pipeline_mode = #tpu.pipeline_mode<synchronous>, transform_indices = @transform_19, window_bounds = array<i64: 48, 1>}, {pipeline_mode = #tpu.pipeline_mode<synchronous>, transform_indices = @transform_20, window_bounds = array<i64: 48, 1>}, {pipeline_mode = #tpu.pipeline_mode<synchronous>, transform_indices = @transform_21, window_bounds = array<i64: 8, 6>}, {pipeline_mode = #tpu.pipeline_mode<synchronous>, transform_indices = @transform_22, window_bounds = array<i64: 48, 6>}, {pipeline_mode = #tpu.pipeline_mode<synchronous>, transform_indices = @transform_23, window_bounds = array<i64: 16, 48>}, {pipeline_mode = #tpu.pipeline_mode<synchronous>, transform_indices = @transform_24, window_bounds = array<i64: 6, 2>}, {pipeline_mode = #tpu.pipeline_mode<synchronous>, transform_indices = @transform_25, window_bounds = array<i64: 1, 2>}, {transform_indices = @transform_26, window_bounds = array<i64: 16, 2>}]} {
    %c0 = arith.constant 0 : index
    %c0_0 = arith.constant 0 : index
    %0 = vector.load %arg1[%c0, %c0_0] : memref<128x64xf32, #tpu.memory_space<vmem>>, vector<128x64xf32>
    %1 = arith.truncf %0 : vector<128x64xf32> to vector<128x64xbf16>
    %c0_1 = arith.constant 0 : index
    %c0_2 = arith.constant 0 : index
    %2 = vector.load %arg2[%c0_1, %c0_2] : memref<64x768xbf16, #tpu.memory_space<vmem>>, vector<64x768xbf16>
    %cst = arith.constant dense<0.000000e+00> : vector<128x768xf32>
    %3 = tpu.matmul %1, %2, %cst {dimension_numbers = #tpu.dot_dimension_numbers<[1], [0], [0], [1], [0, 0, 1, 1], [], []>} : vector<128x64xbf16>, vector<64x768xbf16>, vector<128x768xf32> -> vector<128x768xf32>
    %c0_3 = arith.constant 0 : index
    %c0_4 = arith.constant 0 : index
    %4 = vector.load %arg3[%c0_3, %c0_4] : memref<1x768xf32, #tpu.memory_space<vmem>>, vector<1x768xf32>
    %5 = vector.broadcast %4 : vector<1x768xf32> to vector<128x768xf32>
    %6 = arith.addf %3, %5 : vector<128x768xf32>
    %7 = arith.mulf %6, %6 : vector<128x768xf32>
    %8 = arith.truncf %7 : vector<128x768xf32> to vector<128x768xbf16>
    %c0_5 = arith.constant 0 : index
    %c0_6 = arith.constant 0 : index
    %9 = vector.load %arg4[%c0_5, %c0_6] : memref<768x512xbf16, #tpu.memory_space<vmem>>, vector<768x512xbf16>
    %cst_7 = arith.constant dense<0.000000e+00> : vector<128x512xf32>
    %10 = tpu.matmul %8, %9, %cst_7 {dimension_numbers = #tpu.dot_dimension_numbers<[1], [0], [0], [1], [0, 0, 1, 1], [], []>} : vector<128x768xbf16>, vector<768x512xbf16>, vector<128x512xf32> -> vector<128x512xf32>
    %c0_8 = arith.constant 0 : index
    %c0_9 = arith.constant 0 : index
    %11 = vector.load %arg5[%c0_8, %c0_9] : memref<1x512xf32, #tpu.memory_space<vmem>>, vector<1x512xf32>
    %12 = vector.broadcast %11 : vector<1x512xf32> to vector<128x512xf32>
    %13 = arith.addf %10, %12 : vector<128x512xf32>
    %14 = math.log %13 : vector<128x512xf32>
    %15 = vector.extract_strided_slice %14 {offsets = [0, 0], sizes = [128, 128], strides = [1, 1]} : vector<128x512xf32> to vector<128x128xf32>
    %16 = vector.extract_strided_slice %14 {offsets = [0, 128], sizes = [128, 128], strides = [1, 1]} : vector<128x512xf32> to vector<128x128xf32>
    %17 = vector.extract_strided_slice %14 {offsets = [0, 256], sizes = [128, 128], strides = [1, 1]} : vector<128x512xf32> to vector<128x128xf32>
    %18 = vector.extract_strided_slice %14 {offsets = [0, 384], sizes = [128, 128], strides = [1, 1]} : vector<128x512xf32> to vector<128x128xf32>
    %c0_10 = arith.constant 0 : index
    %c0_11 = arith.constant 0 : index
    %19 = memref.load %arg6[%c0_10, %c0_11] : memref<4x4xf32, #tpu.memory_space<smem>>
    %20 = vector.broadcast %19 : f32 to vector<128x128xf32>
    %21 = arith.mulf %15, %20 : vector<128x128xf32>
    %c0_12 = arith.constant 0 : index
    %c1 = arith.constant 1 : index
    %22 = memref.load %arg6[%c0_12, %c1] : memref<4x4xf32, #tpu.memory_space<smem>>
    %23 = vector.broadcast %22 : f32 to vector<128x128xf32>
    %24 = arith.mulf %16, %23 : vector<128x128xf32>
    %25 = arith.addf %21, %24 : vector<128x128xf32>
    %c0_13 = arith.constant 0 : index
    %c2 = arith.constant 2 : index
    %26 = memref.load %arg6[%c0_13, %c2] : memref<4x4xf32, #tpu.memory_space<smem>>
    %27 = vector.broadcast %26 : f32 to vector<128x128xf32>
    %28 = arith.mulf %17, %27 : vector<128x128xf32>
    %29 = arith.addf %25, %28 : vector<128x128xf32>
    %c0_14 = arith.constant 0 : index
    %c3 = arith.constant 3 : index
    %30 = memref.load %arg6[%c0_14, %c3] : memref<4x4xf32, #tpu.memory_space<smem>>
    %31 = vector.broadcast %30 : f32 to vector<128x128xf32>
    %32 = arith.mulf %18, %31 : vector<128x128xf32>
    %33 = arith.addf %29, %32 : vector<128x128xf32>
    %c1_15 = arith.constant 1 : index
    %c0_16 = arith.constant 0 : index
    %34 = memref.load %arg6[%c1_15, %c0_16] : memref<4x4xf32, #tpu.memory_space<smem>>
    %35 = vector.broadcast %34 : f32 to vector<128x128xf32>
    %36 = arith.mulf %15, %35 : vector<128x128xf32>
    %c1_17 = arith.constant 1 : index
    %c1_18 = arith.constant 1 : index
    %37 = memref.load %arg6[%c1_17, %c1_18] : memref<4x4xf32, #tpu.memory_space<smem>>
    %38 = vector.broadcast %37 : f32 to vector<128x128xf32>
    %39 = arith.mulf %16, %38 : vector<128x128xf32>
    %40 = arith.addf %36, %39 : vector<128x128xf32>
    %c1_19 = arith.constant 1 : index
    %c2_20 = arith.constant 2 : index
    %41 = memref.load %arg6[%c1_19, %c2_20] : memref<4x4xf32, #tpu.memory_space<smem>>
    %42 = vector.broadcast %41 : f32 to vector<128x128xf32>
    %43 = arith.mulf %17, %42 : vector<128x128xf32>
    %44 = arith.addf %40, %43 : vector<128x128xf32>
    %c1_21 = arith.constant 1 : index
    %c3_22 = arith.constant 3 : index
    %45 = memref.load %arg6[%c1_21, %c3_22] : memref<4x4xf32, #tpu.memory_space<smem>>
    %46 = vector.broadcast %45 : f32 to vector<128x128xf32>
    %47 = arith.mulf %18, %46 : vector<128x128xf32>
    %48 = arith.addf %44, %47 : vector<128x128xf32>
    %c2_23 = arith.constant 2 : index
    %c0_24 = arith.constant 0 : index
    %49 = memref.load %arg6[%c2_23, %c0_24] : memref<4x4xf32, #tpu.memory_space<smem>>
    %50 = vector.broadcast %49 : f32 to vector<128x128xf32>
    %51 = arith.mulf %15, %50 : vector<128x128xf32>
    %c2_25 = arith.constant 2 : index
    %c1_26 = arith.constant 1 : index
    %52 = memref.load %arg6[%c2_25, %c1_26] : memref<4x4xf32, #tpu.memory_space<smem>>
    %53 = vector.broadcast %52 : f32 to vector<128x128xf32>
    %54 = arith.mulf %16, %53 : vector<128x128xf32>
    %55 = arith.addf %51, %54 : vector<128x128xf32>
    %c2_27 = arith.constant 2 : index
    %c2_28 = arith.constant 2 : index
    %56 = memref.load %arg6[%c2_27, %c2_28] : memref<4x4xf32, #tpu.memory_space<smem>>
    %57 = vector.broadcast %56 : f32 to vector<128x128xf32>
    %58 = arith.mulf %17, %57 : vector<128x128xf32>
    %59 = arith.addf %55, %58 : vector<128x128xf32>
    %c2_29 = arith.constant 2 : index
    %c3_30 = arith.constant 3 : index
    %60 = memref.load %arg6[%c2_29, %c3_30] : memref<4x4xf32, #tpu.memory_space<smem>>
    %61 = vector.broadcast %60 : f32 to vector<128x128xf32>
    %62 = arith.mulf %18, %61 : vector<128x128xf32>
    %63 = arith.addf %59, %62 : vector<128x128xf32>
    %c3_31 = arith.constant 3 : index
    %c0_32 = arith.constant 0 : index
    %64 = memref.load %arg6[%c3_31, %c0_32] : memref<4x4xf32, #tpu.memory_space<smem>>
    %65 = vector.broadcast %64 : f32 to vector<128x128xf32>
    %66 = arith.mulf %15, %65 : vector<128x128xf32>
    %c3_33 = arith.constant 3 : index
    %c1_34 = arith.constant 1 : index
    %67 = memref.load %arg6[%c3_33, %c1_34] : memref<4x4xf32, #tpu.memory_space<smem>>
    %68 = vector.broadcast %67 : f32 to vector<128x128xf32>
    %69 = arith.mulf %16, %68 : vector<128x128xf32>
    %70 = arith.addf %66, %69 : vector<128x128xf32>
    %c3_35 = arith.constant 3 : index
    %c2_36 = arith.constant 2 : index
    %71 = memref.load %arg6[%c3_35, %c2_36] : memref<4x4xf32, #tpu.memory_space<smem>>
    %72 = vector.broadcast %71 : f32 to vector<128x128xf32>
    %73 = arith.mulf %17, %72 : vector<128x128xf32>
    %74 = arith.addf %70, %73 : vector<128x128xf32>
    %c3_37 = arith.constant 3 : index
    %c3_38 = arith.constant 3 : index
    %75 = memref.load %arg6[%c3_37, %c3_38] : memref<4x4xf32, #tpu.memory_space<smem>>
    %76 = vector.broadcast %75 : f32 to vector<128x128xf32>
    %77 = arith.mulf %18, %76 : vector<128x128xf32>
    %78 = arith.addf %74, %77 : vector<128x128xf32>
    %79 = tpu.concatenate %33, %48, %63, %78 in 1 : vector<128x128xf32>, vector<128x128xf32>, vector<128x128xf32>, vector<128x128xf32> -> vector<128x512xf32>
    %c0_39 = arith.constant 0 : index
    %c0_40 = arith.constant 0 : index
    %80 = vector.load %arg7[%c0_39, %c0_40] : memref<1x512xf32, #tpu.memory_space<vmem>>, vector<1x512xf32>
    %81 = vector.broadcast %80 : vector<1x512xf32> to vector<128x512xf32>
    %82 = arith.addf %79, %81 : vector<128x512xf32>
    %cst_41 = arith.constant 0.000000e+00 : f32
    %83 = vector.broadcast %cst_41 : f32 to vector<128x512xf32>
    %84 = arith.cmpf oge, %82, %83 : vector<128x512xf32>
    %cst_42 = arith.constant 0.00999999977 : f32
    %85 = vector.broadcast %cst_42 : f32 to vector<128x512xf32>
    %86 = arith.mulf %85, %82 : vector<128x512xf32>
    %87 = arith.select %84, %82, %86 : vector<128x512xi1>, vector<128x512xf32>
    %88 = arith.truncf %87 : vector<128x512xf32> to vector<128x512xbf16>
    %c0_43 = arith.constant 0 : index
    %c0_44 = arith.constant 0 : index
    %89 = vector.load %arg8[%c0_43, %c0_44] : memref<512x256xbf16, #tpu.memory_space<vmem>>, vector<512x256xbf16>
    %cst_45 = arith.constant dense<0.000000e+00> : vector<128x256xf32>
    %90 = tpu.matmul %88, %89, %cst_45 {dimension_numbers = #tpu.dot_dimension_numbers<[1], [0], [0], [1], [0, 0, 1, 1], [], []>} : vector<128x512xbf16>, vector<512x256xbf16>, vector<128x256xf32> -> vector<128x256xf32>
    %c0_46 = arith.constant 0 : index
    %c0_47 = arith.constant 0 : index
    %91 = vector.load %arg9[%c0_46, %c0_47] : memref<1x256xf32, #tpu.memory_space<vmem>>, vector<1x256xf32>
    %92 = vector.broadcast %91 : vector<1x256xf32> to vector<128x256xf32>
    %93 = arith.mulf %90, %92 : vector<128x256xf32>
    %c0_48 = arith.constant 0 : index
    %c0_49 = arith.constant 0 : index
    %94 = vector.load %arg10[%c0_48, %c0_49] : memref<1x256xf32, #tpu.memory_space<vmem>>, vector<1x256xf32>
    %95 = vector.broadcast %94 : vector<1x256xf32> to vector<128x256xf32>
    %96 = arith.addf %93, %95 : vector<128x256xf32>
    %c0_50 = arith.constant 0 : index
    %c0_51 = arith.constant 0 : index
    %97 = vector.load %arg11[%c0_50, %c0_51] : memref<128x256xf32, #tpu.memory_space<vmem>>, vector<128x256xf32>
    %98 = arith.mulf %96, %97 : vector<128x256xf32>
    %c0_52 = arith.constant 0 : index
    %c0_53 = arith.constant 0 : index
    %99 = vector.load %arg12[%c0_52, %c0_53] : memref<128x1xf32, #tpu.memory_space<vmem>>, vector<128x1xf32>
    %100 = vector.broadcast %99 : vector<128x1xf32> to vector<128x256xf32>
    %101 = arith.subf %98, %100 : vector<128x256xf32>
    %cst_54 = arith.constant 0.000000e+00 : f32
    %102 = vector.broadcast %cst_54 : f32 to vector<128x256xf32>
    %103 = arith.maximumf %101, %102 : vector<128x256xf32>
    %c0_55 = arith.constant 0 : index
    %c0_56 = arith.constant 0 : index
    %104 = vector.load %arg13[%c0_55, %c0_56] : memref<48x128xf32, #tpu.memory_space<vmem>>, vector<48x128xf32>
    %cst_57 = arith.constant dense<0.000000e+00> : vector<48x256xf32>
    %105 = tpu.matmul %104, %103, %cst_57 {dimension_numbers = #tpu.dot_dimension_numbers<[1], [0], [0], [1], [0, 0, 1, 1], [], []>} : vector<48x128xf32>, vector<128x256xf32>, vector<48x256xf32> -> vector<48x256xf32>
    %cst_58 = arith.constant dense<0.000000e+00> : vector<48x48xf32>
    %106 = tpu.matmul %105, %105, %cst_58 {dimension_numbers = #tpu.dot_dimension_numbers<[1], [1], [0], [0], [0, 0, 1, 0], [], []>} : vector<48x256xf32>, vector<48x256xf32>, vector<48x48xf32> -> vector<48x48xf32>
    %c0_59 = arith.constant 0 : index
    %c0_60 = arith.constant 0 : index
    %107 = vector.load %arg14[%c0_59, %c0_60] : memref<48x48xf32, #tpu.memory_space<vmem>>, vector<48x48xf32>
    %108 = arith.mulf %106, %107 : vector<48x48xf32>
    %cst_61 = arith.constant 0.000000e+00 : f32
    %109 = vector.broadcast %cst_61 : f32 to vector<48x48xf32>
    %110 = arith.maximumf %108, %109 : vector<48x48xf32>
    %c0_62 = arith.constant 0 : index
    %c0_63 = arith.constant 0 : index
    %111 = vector.load %arg15[%c0_62, %c0_63] : memref<48x48xf32, #tpu.memory_space<vmem>>, vector<48x48xf32>
    %112 = arith.addf %110, %111 : vector<48x48xf32>
    %cst_64 = arith.constant dense<0.000000e+00> : vector<48xf32>
    %113 = vector.multi_reduction <add>, %112, %cst_64 [1] : vector<48x48xf32> to vector<48xf32>
    %114 = vector.shape_cast %113 : vector<48xf32> to vector<48x1xf32>
    %cst_65 = arith.constant 0.000000e+00 : f32
    %115 = vector.broadcast %cst_65 : f32 to vector<48x1xf32>
    %116 = arith.cmpf oeq, %114, %115 : vector<48x1xf32>
    %cst_66 = arith.constant 1.000000e+00 : f32
    %117 = vector.broadcast %cst_66 : f32 to vector<48x1xf32>
    %118 = arith.select %116, %117, %114 : vector<48x1xi1>, vector<48x1xf32>
    %119 = math.rsqrt %118 : vector<48x1xf32>
    %cst_67 = arith.constant dense<0.000000e+00> : vector<48xf32>
    %120 = vector.multi_reduction <add>, %112, %cst_67 [0] : vector<48x48xf32> to vector<48xf32>
    %121 = vector.shape_cast %120 : vector<48xf32> to vector<1x48xf32>
    %cst_68 = arith.constant 0.000000e+00 : f32
    %122 = vector.broadcast %cst_68 : f32 to vector<1x48xf32>
    %123 = arith.cmpf oeq, %121, %122 : vector<1x48xf32>
    %cst_69 = arith.constant 1.000000e+00 : f32
    %124 = vector.broadcast %cst_69 : f32 to vector<1x48xf32>
    %125 = arith.select %123, %124, %121 : vector<1x48xi1>, vector<1x48xf32>
    %126 = math.rsqrt %125 : vector<1x48xf32>
    %127 = vector.broadcast %119 : vector<48x1xf32> to vector<48x48xf32>
    %128 = arith.mulf %112, %127 : vector<48x48xf32>
    %129 = vector.broadcast %126 : vector<1x48xf32> to vector<48x48xf32>
    %130 = arith.mulf %128, %129 : vector<48x48xf32>
    %c0_70 = arith.constant 0 : index
    %c0_71 = arith.constant 0 : index
    %131 = vector.load %arg16[%c0_70, %c0_71] : memref<48x1xf32, #tpu.memory_space<vmem>>, vector<48x1xf32>
    %132 = vector.broadcast %131 : vector<48x1xf32> to vector<48x256xf32>
    %133 = arith.mulf %105, %132 : vector<48x256xf32>
    %c0_72 = arith.constant 0 : index
    %c0_73 = arith.constant 0 : index
    %134 = vector.load %arg17[%c0_72, %c0_73] : memref<48x1xf32, #tpu.memory_space<vmem>>, vector<48x1xf32>
    %135 = vector.broadcast %134 : vector<48x1xf32> to vector<48x256xf32>
    %136 = arith.addf %133, %135 : vector<48x256xf32>
    %c0_74 = arith.constant 0 : index
    %c0_75 = arith.constant 0 : index
    %137 = vector.load %arg18[%c0_74, %c0_75] : memref<256x8xf32, #tpu.memory_space<vmem>>, vector<256x8xf32>
    %cst_76 = arith.constant dense<0.000000e+00> : vector<48x8xf32>
    %138 = tpu.matmul %136, %137, %cst_76 {dimension_numbers = #tpu.dot_dimension_numbers<[1], [0], [0], [1], [0, 0, 1, 1], [], []>} : vector<48x256xf32>, vector<256x8xf32>, vector<48x8xf32> -> vector<48x8xf32>
    %c0_77 = arith.constant 0 : index
    %c0_78 = arith.constant 0 : index
    %139 = vector.load %arg19[%c0_77, %c0_78] : memref<1x8xf32, #tpu.memory_space<vmem>>, vector<1x8xf32>
    %140 = vector.broadcast %139 : vector<1x8xf32> to vector<48x8xf32>
    %141 = arith.subf %138, %140 : vector<48x8xf32>
    %cst_79 = arith.constant dense<0.000000e+00> : vector<48x8xf32>
    %142 = tpu.matmul %130, %141, %cst_79 {dimension_numbers = #tpu.dot_dimension_numbers<[1], [0], [0], [1], [0, 0, 1, 1], [], []>} : vector<48x48xf32>, vector<48x8xf32>, vector<48x8xf32> -> vector<48x8xf32>
    %cst_80 = arith.constant 0.000000e+00 : f32
    %143 = vector.broadcast %cst_80 : f32 to vector<48x8xf32>
    %144 = arith.maximumf %142, %143 : vector<48x8xf32>
    %c0_81 = arith.constant 0 : index
    %c0_82 = arith.constant 0 : index
    %145 = vector.load %arg20[%c0_81, %c0_82] : memref<48x1xf32, #tpu.memory_space<vmem>>, vector<48x1xf32>
    %146 = vector.broadcast %145 : vector<48x1xf32> to vector<48x8xf32>
    %147 = arith.mulf %144, %146 : vector<48x8xf32>
    %c0_83 = arith.constant 0 : index
    %c0_84 = arith.constant 0 : index
    %148 = vector.load %arg21[%c0_83, %c0_84] : memref<48x1xf32, #tpu.memory_space<vmem>>, vector<48x1xf32>
    %149 = vector.broadcast %148 : vector<48x1xf32> to vector<48x8xf32>
    %150 = arith.addf %147, %149 : vector<48x8xf32>
    %c0_85 = arith.constant 0 : index
    %c0_86 = arith.constant 0 : index
    %151 = vector.load %arg22[%c0_85, %c0_86] : memref<8x6xf32, #tpu.memory_space<vmem>>, vector<8x6xf32>
    %cst_87 = arith.constant dense<0.000000e+00> : vector<48x6xf32>
    %152 = tpu.matmul %150, %151, %cst_87 {dimension_numbers = #tpu.dot_dimension_numbers<[1], [0], [0], [1], [0, 0, 1, 1], [], []>} : vector<48x8xf32>, vector<8x6xf32>, vector<48x6xf32> -> vector<48x6xf32>
    %c0_88 = arith.constant 0 : index
    %c0_89 = arith.constant 0 : index
    %153 = vector.load %arg23[%c0_88, %c0_89] : memref<48x6xf32, #tpu.memory_space<vmem>>, vector<48x6xf32>
    %154 = arith.mulf %152, %153 : vector<48x6xf32>
    %c0_90 = arith.constant 0 : index
    %c0_91 = arith.constant 0 : index
    %155 = vector.load %arg24[%c0_90, %c0_91] : memref<16x48xf32, #tpu.memory_space<vmem>>, vector<16x48xf32>
    %cst_92 = arith.constant dense<0.000000e+00> : vector<16x6xf32>
    %156 = tpu.matmul %155, %154, %cst_92 {dimension_numbers = #tpu.dot_dimension_numbers<[1], [0], [0], [1], [0, 0, 1, 1], [], []>} : vector<16x48xf32>, vector<48x6xf32>, vector<16x6xf32> -> vector<16x6xf32>
    %c0_93 = arith.constant 0 : index
    %c0_94 = arith.constant 0 : index
    %157 = vector.load %arg25[%c0_93, %c0_94] : memref<6x2xf32, #tpu.memory_space<vmem>>, vector<6x2xf32>
    %cst_95 = arith.constant dense<0.000000e+00> : vector<16x2xf32>
    %158 = tpu.matmul %156, %157, %cst_95 {dimension_numbers = #tpu.dot_dimension_numbers<[1], [0], [0], [1], [0, 0, 1, 1], [], []>} : vector<16x6xf32>, vector<6x2xf32>, vector<16x2xf32> -> vector<16x2xf32>
    %c0_96 = arith.constant 0 : index
    %c0_97 = arith.constant 0 : index
    %159 = vector.load %arg26[%c0_96, %c0_97] : memref<1x2xf32, #tpu.memory_space<vmem>>, vector<1x2xf32>
    %160 = vector.broadcast %159 : vector<1x2xf32> to vector<16x2xf32>
    %161 = arith.addf %158, %160 : vector<16x2xf32>
    %c0_98 = arith.constant 0 : index
    %c0_99 = arith.constant 0 : index
    %162 = vector.load %arg27[%c0_98, %c0_99] : memref<16x2xf32, #tpu.memory_space<vmem>>, vector<16x2xf32>
    tpu.vector_store %arg27[%c0_98, %c0_99], %161 {strides = array<i32>} : memref<16x2xf32, #tpu.memory_space<vmem>>, vector<16x2xf32>,
    return
  }
  func.func @transform_0(%arg0: i32) -> (i32, i32) {
    %c0_i32 = arith.constant 0 : i32
    %c0_i32_0 = arith.constant 0 : i32
    return %arg0, %c0_i32 : i32, i32
  }
  func.func @transform_1(%arg0: i32) -> (i32, i32) {
    %c0_i32 = arith.constant 0 : i32
    %c0_i32_0 = arith.constant 0 : i32
    %c0_i32_1 = arith.constant 0 : i32
    return %c0_i32, %c0_i32_0 : i32, i32
  }
  func.func @transform_2(%arg0: i32) -> (i32, i32) {
    %c0_i32 = arith.constant 0 : i32
    %c0_i32_0 = arith.constant 0 : i32
    %c0_i32_1 = arith.constant 0 : i32
    return %c0_i32, %c0_i32_0 : i32, i32
  }
  func.func @transform_3(%arg0: i32) -> (i32, i32) {
    %c0_i32 = arith.constant 0 : i32
    %c0_i32_0 = arith.constant 0 : i32
    %c0_i32_1 = arith.constant 0 : i32
    return %c0_i32, %c0_i32_0 : i32, i32
  }
  func.func @transform_4(%arg0: i32) -> (i32, i32) {
    %c0_i32 = arith.constant 0 : i32
    %c0_i32_0 = arith.constant 0 : i32
    %c0_i32_1 = arith.constant 0 : i32
    return %c0_i32, %c0_i32_0 : i32, i32
  }
  func.func @transform_5(%arg0: i32) -> (i32, i32) {
    %c0_i32 = arith.constant 0 : i32
    %c0_i32_0 = arith.constant 0 : i32
    %c0_i32_1 = arith.constant 0 : i32
    return %c0_i32, %c0_i32_0 : i32, i32
  }
  func.func @transform_6(%arg0: i32) -> (i32, i32) {
    %c0_i32 = arith.constant 0 : i32
    %c0_i32_0 = arith.constant 0 : i32
    %c0_i32_1 = arith.constant 0 : i32
    return %c0_i32, %c0_i32_0 : i32, i32
  }
  func.func @transform_7(%arg0: i32) -> (i32, i32) {
    %c0_i32 = arith.constant 0 : i32
    %c0_i32_0 = arith.constant 0 : i32
    %c0_i32_1 = arith.constant 0 : i32
    return %c0_i32, %c0_i32_0 : i32, i32
  }
  func.func @transform_8(%arg0: i32) -> (i32, i32) {
    %c0_i32 = arith.constant 0 : i32
    %c0_i32_0 = arith.constant 0 : i32
    %c0_i32_1 = arith.constant 0 : i32
    return %c0_i32, %c0_i32_0 : i32, i32
  }
  func.func @transform_9(%arg0: i32) -> (i32, i32) {
    %c0_i32 = arith.constant 0 : i32
    %c0_i32_0 = arith.constant 0 : i32
    %c0_i32_1 = arith.constant 0 : i32
    return %c0_i32, %c0_i32_0 : i32, i32
  }
  func.func @transform_10(%arg0: i32) -> (i32, i32) {
    %c0_i32 = arith.constant 0 : i32
    %c0_i32_0 = arith.constant 0 : i32
    %c0_i32_1 = arith.constant 0 : i32
    return %c0_i32, %c0_i32_0 : i32, i32
  }
  func.func @transform_11(%arg0: i32) -> (i32, i32) {
    %c0_i32 = arith.constant 0 : i32
    %c0_i32_0 = arith.constant 0 : i32
    %c0_i32_1 = arith.constant 0 : i32
    return %c0_i32, %c0_i32_0 : i32, i32
  }
  func.func @transform_12(%arg0: i32) -> (i32, i32) {
    %c0_i32 = arith.constant 0 : i32
    %c0_i32_0 = arith.constant 0 : i32
    %c0_i32_1 = arith.constant 0 : i32
    return %c0_i32, %c0_i32_0 : i32, i32
  }
  func.func @transform_13(%arg0: i32) -> (i32, i32) {
    %c0_i32 = arith.constant 0 : i32
    %c0_i32_0 = arith.constant 0 : i32
    %c0_i32_1 = arith.constant 0 : i32
    return %c0_i32, %c0_i32_0 : i32, i32
  }
  func.func @transform_14(%arg0: i32) -> (i32, i32) {
    %c0_i32 = arith.constant 0 : i32
    %c0_i32_0 = arith.constant 0 : i32
    %c0_i32_1 = arith.constant 0 : i32
    return %c0_i32, %c0_i32_0 : i32, i32
  }
  func.func @transform_15(%arg0: i32) -> (i32, i32) {
    %c0_i32 = arith.constant 0 : i32
    %c0_i32_0 = arith.constant 0 : i32
    %c0_i32_1 = arith.constant 0 : i32
    return %c0_i32, %c0_i32_0 : i32, i32
  }
  func.func @transform_16(%arg0: i32) -> (i32, i32) {
    %c0_i32 = arith.constant 0 : i32
    %c0_i32_0 = arith.constant 0 : i32
    %c0_i32_1 = arith.constant 0 : i32
    return %c0_i32, %c0_i32_0 : i32, i32
  }
  func.func @transform_17(%arg0: i32) -> (i32, i32) {
    %c0_i32 = arith.constant 0 : i32
    %c0_i32_0 = arith.constant 0 : i32
    %c0_i32_1 = arith.constant 0 : i32
    return %c0_i32, %c0_i32_0 : i32, i32
  }
  func.func @transform_18(%arg0: i32) -> (i32, i32) {
    %c0_i32 = arith.constant 0 : i32
    %c0_i32_0 = arith.constant 0 : i32
    %c0_i32_1 = arith.constant 0 : i32
    return %c0_i32, %c0_i32_0 : i32, i32
  }
  func.func @transform_19(%arg0: i32) -> (i32, i32) {
    %c0_i32 = arith.constant 0 : i32
    %c0_i32_0 = arith.constant 0 : i32
    %c0_i32_1 = arith.constant 0 : i32
    return %c0_i32, %c0_i32_0 : i32, i32
  }
  func.func @transform_20(%arg0: i32) -> (i32, i32) {
    %c0_i32 = arith.constant 0 : i32
    %c0_i32_0 = arith.constant 0 : i32
    %c0_i32_1 = arith.constant 0 : i32
    return %c0_i32, %c0_i32_0 : i32, i32
  }
  func.func @transform_21(%arg0: i32) -> (i32, i32) {
    %c0_i32 = arith.constant 0 : i32
    %c0_i32_0 = arith.constant 0 : i32
    %c0_i32_1 = arith.constant 0 : i32
    return %c0_i32, %c0_i32_0 : i32, i32
  }
  func.func @transform_22(%arg0: i32) -> (i32, i32) {
    %c0_i32 = arith.constant 0 : i32
    %c0_i32_0 = arith.constant 0 : i32
    %c0_i32_1 = arith.constant 0 : i32
    return %c0_i32, %c0_i32_0 : i32, i32
  }
  func.func @transform_23(%arg0: i32) -> (i32, i32) {
    %c0_i32 = arith.constant 0 : i32
    %c0_i32_0 = arith.constant 0 : i32
    %c0_i32_1 = arith.constant 0 : i32
    return %c0_i32, %c0_i32_0 : i32, i32
  }
  func.func @transform_24(%arg0: i32) -> (i32, i32) {
    %c0_i32 = arith.constant 0 : i32
    %c0_i32_0 = arith.constant 0 : i32
    %c0_i32_1 = arith.constant 0 : i32
    return %c0_i32, %c0_i32_0 : i32, i32
  }
  func.func @transform_25(%arg0: i32) -> (i32, i32) {
    %c0_i32 = arith.constant 0 : i32
    %c0_i32_0 = arith.constant 0 : i32
    %c0_i32_1 = arith.constant 0 : i32
    return %c0_i32, %c0_i32_0 : i32, i32
  }
  func.func @transform_26(%arg0: i32) -> (i32, i32) {
    %c0_i32 = arith.constant 0 : i32
    %c0_i32_0 = arith.constant 0 : i32
    return %arg0, %c0_i32 : i32, i32
  }
}

</mosaic_0001>

<bundles_post_ra>
// kernel: _lambda_.1
= control target key start
LH: loop header
LB: loop body
LE: loop exit
PB: predicated region body
PF: predicated region fallthrough
CT: control target
= control target key end

     0   :  { %s11068_s0 = inlined_call_operand.vmem [shape: f32[256,64], index: 0, kind: input, shape index: {}]   ;;  %s11069_s1 = inlined_call_operand.vmem [shape: bf16[64,768], index: 1, kind: input, shape index: {}]   ;;  %s11070_s2 = inlined_call_operand.vmem [shape: f32[1,768], index: 2, kind: input, shape index: {}]   ;;  %s11071_s3 = inlined_call_operand.vmem [shape: bf16[768,512], index: 3, kind: input, shape index: {}]   ;;  %s11072_s4 = inlined_call_operand.vmem [shape: f32[1,512], index: 4, kind: input, shape index: {}]   ;;  %s11073_s5 = inlined_call_operand.vmem [shape: f32[4,4], index: 5, kind: input, shape index: {}]   ;;  %s11074_s6 = inlined_call_operand.vmem [shape: f32[1,512], index: 6, kind: input, shape index: {}]   ;;  %s11075_s7 = inlined_call_operand.vmem [shape: bf16[512,256], index: 7, kind: input, shape index: {}]   ;;  %s11076_s8 = inlined_call_operand.vmem [shape: f32[1,256], index: 8, kind: input, shape index: {}]   ;;  %s11077_s9 = inlined_call_operand.vmem [shape: f32[1,256], index: 9, kind: input, shape index: {}]   ;;  %s11078_s10 = inlined_call_operand.vmem [shape: f32[128,256], index: 10, kind: input, shape index: {}]   ;;  %s11079_s11 = inlined_call_operand.vmem [shape: f32[128,1], index: 11, kind: input, shape index: {}]   ;;  %s11080_s12 = inlined_call_operand.vmem [shape: f32[48,128], index: 12, kind: input, shape index: {}]   ;;  %s11081_s13 = inlined_call_operand.vmem [shape: f32[48,48], index: 13, kind: input, shape index: {}]   ;;  %s11082_s14 = inlined_call_operand.vmem [shape: f32[48,48], index: 14, kind: input, shape index: {}]   ;;  %s11083_s15 = inlined_call_operand.vmem [shape: f32[48,1], index: 15, kind: input, shape index: {}]   ;;  %s11084_s16 = inlined_call_operand.vmem [shape: f32[48,1], index: 16, kind: input, shape index: {}]   ;;  %s11085_s17 = inlined_call_operand.vmem [shape: f32[256,8], index: 17, kind: input, shape index: {}]   ;;  %s11086_s18 = inlined_call_operand.vmem [shape: f32[1,8], index: 18, kind: input, shape index: {}]   ;;  %s11087_s19 = inlined_call_operand.vmem [shape: f32[48,1], index: 19, kind: input, shape index: {}]   ;;  %s11088_s20 = inlined_call_operand.vmem [shape: f32[48,1], index: 20, kind: input, shape index: {}]   ;;  %s11089_s21 = inlined_call_operand.vmem [shape: f32[8,6], index: 21, kind: input, shape index: {}]   ;;  %s11090_s22 = inlined_call_operand.vmem [shape: f32[48,6], index: 22, kind: input, shape index: {}]   ;;  %s11091_s23 = inlined_call_operand.vmem [shape: f32[16,48], index: 23, kind: input, shape index: {}]   ;;  %s11092_s24 = inlined_call_operand.vmem [shape: f32[6,2], index: 24, kind: input, shape index: {}]   ;;  %s11093_s25 = inlined_call_operand.vmem [shape: f32[1,2], index: 25, kind: input, shape index: {}]   ;;  %s11094_s26 = inlined_call_operand.vmem [shape: f32[32,2], index: 26, kind: output, shape index: {}]  }
   0x1   :  { %11122 = sst [smem:[#allocation127_spill]] %s11068_s0 }
   0x2   :  { %11123 = sst [smem:[#allocation128_spill]] %s11069_s1 }
   0x3   :  { %11124 = sst [smem:[#allocation129_spill]] %s11070_s2 }
   0x4   :  { %11125 = sst [smem:[#allocation130_spill]] %s11071_s3 }
   0x5   :  { %11126 = sst [smem:[#allocation131_spill]] %s11072_s4 }
   0x6   :  { %11127 = sst [smem:[#allocation132_spill]] %s11073_s5 }
   0x7   :  { %11128 = sst [smem:[#allocation133_spill]] %s11074_s6 }
   0x8   :  { %11129 = sst [smem:[#allocation134_spill]] %s11075_s7 }
   0x9   :  { %11130 = sst [smem:[#allocation135_spill]] %s11076_s8 }
   0xa   :  { %11131 = sst [smem:[#allocation136_spill]] %s11077_s9 }
   0xb   :  { %11132 = sst [smem:[#allocation137_spill]] %s11078_s10 }
   0xc   :  { %11133 = sst [smem:[#allocation138_spill]] %s11090_s22 }
   0xd   :  { %11134 = sst [smem:[#allocation139_spill]] %s11092_s24 }
   0xe   :  { %11135 = sst [smem:[#allocation140_spill]] %s11093_s25 }
   0xf   :  { %11136 = sst [smem:[#allocation141_spill]] %s11094_s26 }
  0x10   :  { %31 = vsyncpa [#allocation3], 0  ;;  %s7877_s27 = smov 0  }
  0x11 LB: > { %11137 = sst [smem:[#allocation5_spill]] %s7737_s27  ;;  %s7883_s3 = sadd.s32 4294967295, %s7737_s27   ;;  %s7737_s27 = sphi %s7877_s27, %s37_s27  }
  0x12   : > { %11138 = sst [smem:[#allocation6_spill]] %s7883_s3  ;;  %p6321_p0 = scmp.ge.s32.totalorder %s7737_s27, 1 }
  0x13   : > { %p619_p1 = scmp.lt.s32.totalorder %s7737_s27, 3  ;;  %s11139_s8 = sld [smem:[#allocation132_spill]] }
  0x14   : > { %p7134_p3 = scmp.eq.s32.totalorder %s7883_s3, 0 }
  0x15   : > { %p7890_p2 = pnand %p6321_p0, %p619_p1 }
  0x17   : > { %p7130_p4 = pneg %p7890_p2 }
  0x19   : > { %s644_s4 = sshll.u32 %s11139_s8, 4  ;;  %p7131_p5 = pnand %p7134_p3, %p7130_p4  ;;  %s645_s4 = int_to_ptr.vmem [resolvable:$true] %s644_s4 }
  0x1a   : > { %s7712_s0 = scalar_lea.vmem %s645_s4, 64  ;;  %p7720_p10 = scmp.lt.s32.totalorder %s645_s4, %s645_s4 }
  0x1b   : > { %p7713_p6 = scmp.ne.s32.totalorder %s645_s4, %s7712_s0  ;;  %p7714_p7 = pneg %p7131_p5 }
  0x1c   : > { %p7721_p11 = scmp.lt.s32.totalorder %s7712_s0, %s7712_s0 }
  0x1d   : > { %p7715_p8 = pnand %p7714_p7, %p7713_p6 }
  0x1e   : > { %p7722_p12 = por %p7721_p11, %p7720_p10 }
  0x1f   : > { %p7716_p9 = pneg %p7715_p8 }
  0x21   : > { %p7723_p13 = pnand %p7722_p12, %p7716_p9 }
  0x23   : > { %7726 = shalt.err (!%p7723_p13)
}
  0x24   : > { %s7739_s9 = smov [#allocation2]   ;;  %726 = sbr.rel (%p7890_p2) target bundleno = 2643 (0xa53), region = 124 }
  0x25   : > { %7133 = dma.vmem_to_smem (!%p7131_p5), %s645_s4, 64, %s7739_s9, [#allocation3]  }
  0x2b   : > { %7732 = dma.done.wait (%p7134_p3), [#allocation3], 64  }
  0x2c   : > { %7734 = vsyncadd (%p7134_p3), [#allocation3], 4294967232 }
  0x2d   : > { %732 = sfence }
  0x2e   : > { %s11141_s5 = sld [smem:[#allocation128_spill]]  ;;  %s6326_s10 = sshll.u32 %s7883_s3, 4  ;;  %v7740_v2 = vmov 0   ;;  %vm1010_vm0 = vcmask 523264  }
  0x2f   : > { %1067 = vmatprep.mubr.bf16.mxu0 %v7740_v2  ;;  %p798_p0 = scmp.lt.s32.totalorder %s6326_s10, 31  ;;  %1180 = vmatprep.mubr.bf16.mxu1 %v7740_v2  ;;  %s11142_s0 = sld [smem:[#allocation127_spill]] }
  0x30   : > { %7147 = vset.pattern.permute.xlu0 %v7740_v2  ;;  %7148 = vset.pattern.permute.xlu1 %v7740_v2  ;;  %s11143_s30 = sld [smem:[#allocation130_spill]]  ;;  %s11145_s6 = sld [smem:[#allocation129_spill]] }
  0x31   : > { %s11482_s10 = smov (!%p798_p0, %s6326_s10), 31  ;;  %s11148_s7 = sld [smem:[#allocation134_spill]] }
  0x32   : > { %s6327_s9 = sshll.u32 %s11482_s10, 3  ;;  %s9040_s28 = sld [smem:[#allocation2]] }
  0x33   : > { %s9048_s8 = sld [smem:[#allocation2 + $0x80]]  ;;  %s9054_s10 = sld [smem:[#allocation2 + $0x2]] }
  0x34   : > { %v7149_v0 = vld [vmem:[%s11141_s5 + $0x4] ss:$24 sps:$4 sm:$0xff]   ;;  %v7151_v1 = vld [vmem:[%s11141_s5] ss:$24 sps:$4 sm:$0xff]   ;;  %v7152_v3 = vld [vmem:[%s11141_s5 + $0x34] ss:$24 sps:$4 sm:$0xff]  }
  0x35   : > { %1035 = vmatprep.subr.bf16.mxu0 %v7149_v0  ;;  %v7154_v4 = vld [vmem:[%s11141_s5 + $0x30] ss:$24 sps:$4 sm:$0xff]   ;;  %v7155_v5 = vld [vmem:[%s11141_s5 + $0x64] ss:$24 sps:$4 sm:$0xff]   ;;  %v7157_v8 = vld [vmem:[%s11141_s5 + $0x60] ss:$24 sps:$4 sm:$0xff]   ;;  %s7940_s27 = scalar_lea.vmem %s11142_s0, %s6327_s9 }
  0x36   : > { %1036 = vmatpush1.bf16.msra.mxu0 %v7151_v1  ;;  %v7161_v6 = vld [vmem:[%s11141_s5 + $0xc] ss:$24 sps:$4 sm:$0xff]   ;;  %v7163_v7 = vld [vmem:[%s11141_s5 + $0x8] ss:$24 sps:$4 sm:$0xff]   ;;  %v7164_v13 = vld [vmem:[%s11141_s5 + $0x3c] ss:$24 sps:$4 sm:$0xff]  }
  0x37   : > { %1037 = vmatprep.subr.bf16.mxu0 %v7152_v3  ;;  %v7158_v9 = vld [vmem:[%s11141_s5 + $0x94] ss:$24 sps:$4 sm:$0xff]   ;;  %1148 = vmatprep.subr.bf16.mxu1 %v7161_v6  ;;  %v7160_v10 = vld [vmem:[%s11141_s5 + $0x90] ss:$24 sps:$4 sm:$0xff]   ;;  %v810_v11 = vld [vmem:[%s7940_s27] sm:$0xff]  ;;  %s11149_s9 = sld [smem:[#allocation131_spill]] }
  0x38   : > { %1149 = vmatpush1.bf16.msra.mxu1 %v7163_v7  ;;  %v811_v12 = vld [vmem:[%s7940_s27 + $0x8] sm:$0xff]  ;;  %v7166_v14 = vld [vmem:[%s11141_s5 + $0x38] ss:$24 sps:$4 sm:$0xff]   ;;  %v7170_v18 = vld [vmem:[%s11141_s5 + $0x9c] ss:$24 sps:$4 sm:$0xff]   ;;  %s9050_s4 = sld [smem:[#allocation2 + $0x100]] }
  0x39   : > { %v7167_v15 = vld [vmem:[%s11141_s5 + $0x6c] ss:$24 sps:$4 sm:$0xff]   ;;  %v7956_v16 = vpack.c.bf16 %v811_v12, %v810_v11  ;;  %1150 = vmatprep.subr.bf16.mxu1 %v7164_v13  ;;  %v7169_v17 = vld [vmem:[%s11141_s5 + $0x68] ss:$24 sps:$4 sm:$0xff]   ;;  %v812_v21 = vld [vmem:[%s7940_s27 + $0x10] sm:$0xff]  ;;  %s9052_s29 = sld [smem:[#allocation2 + $0x180]] }
  0x3a   : > { %1038 = vmatpush1.bf16.msra.mxu0 %v7154_v4  ;;  %v7173_v19 = vld [vmem:[%s11141_s5 + $0x10] ss:$24 sps:$4 sm:$0xff]   ;;  %v7175_v20 = vld [vmem:[%s11141_s5 + $0x14] ss:$24 sps:$4 sm:$0xff]   ;;  %v7178_v22 = vld [vmem:[%s11141_s5 + $0x44] ss:$24 sps:$4 sm:$0xff]  }
  0x3b   : > { %1039 = vmatprep.subr.bf16.mxu0 %v7155_v5  ;;  %v813_v23 = vld [vmem:[%s7940_s27 + $0x18] sm:$0xff]  ;;  %v7187_v27 = vld [vmem:[%s11143_s30 + $0x4] ss:$16 sps:$4 sm:$0xff]   ;;  %v7179_v28 = vld [vmem:[%s11141_s5 + $0x70] ss:$24 sps:$4 sm:$0xff]   ;;  %s9058_s0 = sld [smem:[#allocation2 + $0x82]] }
  0x3c   : > { %1151 = vmatpush1.bf16.msra.mxu1 %v7166_v14  ;;  %v7172_v24 = vld [vmem:[%s11141_s5 + $0x98] ss:$24 sps:$4 sm:$0xff]   ;;  %v7984_v26 = vpack.c.bf16 %v813_v23, %v812_v21  ;;  %v7181_v29 = vld [vmem:[%s11141_s5 + $0x74] ss:$24 sps:$4 sm:$0xff]   ;;  %v814_v32 = vld [vmem:[%s7940_s27 + $0x20] sm:$0xff]  ;;  %s9060_s2 = sld [smem:[#allocation2 + $0x102]] }
  0x3d   : > { %1152 = vmatprep.subr.bf16.mxu1 %v7167_v15  ;;  %v7176_v25 = vld [vmem:[%s11141_s5 + $0x40] ss:$24 sps:$4 sm:$0xff]   ;;  %v7193_v31 = vld [vmem:[%s11143_s30 + $0x24] ss:$16 sps:$4 sm:$0xff]   ;;  %v815_v34 = vld [vmem:[%s7940_s27 + $0x28] sm:$0xff]  ;;  %s9065_s1 = sld [smem:[#allocation2 + $0x1]] }
  0x3e   : > { %1040 = vmatpush1.bf16.msra.mxu0 %v7157_v8  ;;  %v7185_v30 = vld [vmem:[%s11143_s30] ss:$16 sps:$4 sm:$0xff]   ;;  %v7184_v33 = vld [vmem:[%s11141_s5 + $0xa4] ss:$24 sps:$4 sm:$0xff]   ;;  %v8021_v38 = vpack.c.bf16 %v815_v34, %v814_v32  ;;  %v819_v50 = vld [vmem:[%s7940_s27 + $0x48] sm:$0xff]  ;;  %s11150_s26 = sld [smem:[#allocation133_spill]] }
  0x3f   : > { %1041 = vmatprep.subr.bf16.mxu0 %v7158_v9  ;;  %v7182_v35 = vld [vmem:[%s11141_s5 + $0xa0] ss:$24 sps:$4 sm:$0xff]   ;;  %v7199_v37 = vld [vmem:[%s11143_s30 + $0x44] ss:$16 sps:$4 sm:$0xff]   ;;  %v7190_v39 = vld [vmem:[%s11143_s30 + $0xc] ss:$16 sps:$4 sm:$0xff]  }
  0x40   : > { %1153 = vmatpush1.bf16.msra.mxu1 %v7169_v17  ;;  %v7191_v36 = vld [vmem:[%s11143_s30 + $0x20] ss:$16 sps:$4 sm:$0xff]   ;;  %v7205_v41 = vld [vmem:[%s11143_s30 + $0x64] ss:$16 sps:$4 sm:$0xff]   ;;  %v817_v43 = vld [vmem:[%s7940_s27 + $0x38] sm:$0xff]  ;;  %s9076_s25 = sld [smem:[#allocation2 + $0x181]] }
  0x41   : > { %1154 = vmatprep.subr.bf16.mxu1 %v7170_v18  ;;  %v7197_v40 = vld [vmem:[%s11143_s30 + $0x40] ss:$16 sps:$4 sm:$0xff]   ;;  %v7211_v45 = vld [vmem:[%s11143_s30 + $0x84] ss:$16 sps:$4 sm:$0xff]   ;;  %v821_v57 = vld [vmem:[%s7940_s27 + $0x58] sm:$0xff]  ;;  %s9078_s24 = sld [smem:[#allocation2 + $0x3]] }
  0x42   : > { %1042 = vmatpush1.bf16.msra.mxu0 %v7160_v10  ;;  %v816_v42 = vld [vmem:[%s7940_s27 + $0x30] sm:$0xff]  ;;  %v818_v49 = vld [vmem:[%s7940_s27 + $0x40] sm:$0xff]  ;;  %v823_v0 = vld [vmem:[%s7940_s27 + $0x68] sm:$0xff]  ;;  %s9081_s3 = sld [smem:[#allocation2 + $0x83]] }
  0x43   : > { %1261 = vmatprep.subr.bf16.mxu0 %v7175_v20  ;;  %v7203_v44 = vld [vmem:[%s11143_s30 + $0x60] ss:$16 sps:$4 sm:$0xff]   ;;  %v8046_v46 = vpack.c.bf16 %v817_v43, %v816_v42  ;;  %v7217_v48 = vld [vmem:[%s11143_s30 + $0xa4] ss:$16 sps:$4 sm:$0xff]   ;;  %v8068_v53 = vpack.c.bf16 %v819_v50, %v818_v49  ;;  %v825_v8 = vld [vmem:[%s7940_s27 + $0x78] sm:$0xff]  ;;  %s9083_s22 = sld [smem:[#allocation2 + $0x103]] }
  0x44   : > { %1155 = vmatpush1.bf16.msra.mxu1 %v7172_v24  ;;  %v7209_v47 = vld [vmem:[%s11143_s30 + $0x80] ss:$16 sps:$4 sm:$0xff]   ;;  %v7223_v52 = vld [vmem:[%s11143_s30 + $0xc4] ss:$16 sps:$4 sm:$0xff]   ;;  %v7188_v15 = vld [vmem:[%s11143_s30 + $0x8] ss:$16 sps:$4 sm:$0xff]  }
  0x45   : > { %6354 = vmatmul.mubr.msk.bf16.vlgmr.msra.gmra.mrb[0].mxu0 %vm1010_vm0, %v7956_v16  ;;  %2692 = vmatprep.subr.bf16.mxu1 %v7187_v27  ;;  %v7215_v51 = vld [vmem:[%s11143_s30 + $0xa0] ss:$16 sps:$4 sm:$0xff]   ;;  %v7229_v55 = vld [vmem:[%s11143_s30 + $0xe4] ss:$16 sps:$4 sm:$0xff]   ;;  %v7196_v17 = vld [vmem:[%s11143_s30 + $0x2c] ss:$16 sps:$4 sm:$0xff]  }
  0x46   : > { %1077 = vmatprep.mubr.bf16.mxu0 %v7740_v2  ;;  %1262 = vmatpush1.bf16.msra.mxu0 %v7173_v19  ;;  %v7221_v54 = vld [vmem:[%s11143_s30 + $0xc0] ss:$16 sps:$4 sm:$0xff]   ;;  %v7235_v59 = vld [vmem:[%s11143_s30 + $0x104] ss:$16 sps:$4 sm:$0xff]   ;;  %v7194_v18 = vld [vmem:[%s11143_s30 + $0x28] ss:$16 sps:$4 sm:$0xff]  }
  0x47   : > { %1263 = vmatprep.subr.bf16.mxu0 %v7178_v22  ;;  %6362 = vmatmul.mubr.msk.bf16.vlgmr.msra.gmra.mrb[0].mxu1 %vm1010_vm0, %v7956_v16  ;;  %v820_v56 = vld [vmem:[%s7940_s27 + $0x50] sm:$0xff]  ;;  %v822_v63 = vld [vmem:[%s7940_s27 + $0x60] sm:$0xff]  ;;  %v7202_v19 = vld [vmem:[%s11143_s30 + $0x4c] ss:$16 sps:$4 sm:$0xff]   ;;  %s9085_s5 = sld [smem:[#allocation2 + $0x183]] }
  0x48   : > { %1190 = vmatprep.mubr.bf16.mxu1 %v7740_v2  ;;  %2693 = vmatpush1.bf16.msra.mxu1 %v7185_v30  ;;  %v7227_v58 = vld [vmem:[%s11143_s30 + $0xe0] ss:$16 sps:$4 sm:$0xff]   ;;  %v8090_v60 = vpack.c.bf16 %v821_v57, %v820_v56  ;;  %v7241_v62 = vld [vmem:[%s11143_s30 + $0x124] ss:$16 sps:$4 sm:$0xff]   ;;  %v8112_v4 = vpack.c.bf16 %v823_v0, %v822_v63  ;;  %v7200_v20 = vld [vmem:[%s11143_s30 + $0x48] ss:$16 sps:$4 sm:$0xff]  }
  0x49   : > { %2694 = vmatprep.subr.bf16.mxu1 %v7193_v31  ;;  %v7233_v61 = vld [vmem:[%s11143_s30 + $0x100] ss:$16 sps:$4 sm:$0xff]   ;;  %v7247_v3 = vld [vmem:[%s11143_s30 + $0x144] ss:$16 sps:$4 sm:$0xff]   ;;  %v7208_v21 = vld [vmem:[%s11143_s30 + $0x6c] ss:$16 sps:$4 sm:$0xff]  }
  0x4a   : > { %1264 = vmatpush1.bf16.msra.mxu0 %v7176_v25  ;;  %v7239_v1 = vld [vmem:[%s11143_s30 + $0x120] ss:$16 sps:$4 sm:$0xff]   ;;  %v7253_v6 = vld [vmem:[%s11143_s30 + $0x164] ss:$16 sps:$4 sm:$0xff]   ;;  %v7214_v22 = vld [vmem:[%s11143_s30 + $0x8c] ss:$16 sps:$4 sm:$0xff]  }
  0x4b   : > { %1265 = vmatprep.subr.bf16.mxu0 %v7181_v29  ;;  %v7245_v5 = vld [vmem:[%s11143_s30 + $0x140] ss:$16 sps:$4 sm:$0xff]   ;;  %v7259_v10 = vld [vmem:[%s11143_s30 + $0x184] ss:$16 sps:$4 sm:$0xff]   ;;  %v7212_v23 = vld [vmem:[%s11143_s30 + $0x88] ss:$16 sps:$4 sm:$0xff]  }
  0x4c   : > { %2695 = vmatpush1.bf16.msra.mxu1 %v7191_v36  ;;  %v824_v7 = vld [vmem:[%s7940_s27 + $0x70] sm:$0xff]  ;;  %v7220_v24 = vld [vmem:[%s11143_s30 + $0xac] ss:$16 sps:$4 sm:$0xff]   ;;  %v7218_v25 = vld [vmem:[%s11143_s30 + $0xa8] ss:$16 sps:$4 sm:$0xff]   ;;  %s9068_s27 = sld [smem:[#allocation2 + $0x81]] }
  0x4d   : > { %6355 = vmatmul.mubr.msk.bf16.gmra.mrb[4].mxu0 %vm1010_vm0, %v7984_v26  ;;  %2696 = vmatprep.subr.bf16.mxu1 %v7199_v37  ;;  %v7251_v9 = vld [vmem:[%s11143_s30 + $0x160] ss:$16 sps:$4 sm:$0xff]   ;;  %v8134_v11 = vpack.c.bf16 %v825_v8, %v824_v7  ;;  %v7265_v13 = vld [vmem:[%s11143_s30 + $0x1a4] ss:$16 sps:$4 sm:$0xff]   ;;  %v7224_v27 = vld [vmem:[%s11143_s30 + $0xc8] ss:$16 sps:$4 sm:$0xff]  }
  0x4e   : > { %1087 = vmatprep.mubr.bf16.mxu0 %v7740_v2  ;;  %1266 = vmatpush1.bf16.msra.mxu0 %v7179_v28  ;;  %v7257_v12 = vld [vmem:[%s11143_s30 + $0x180] ss:$16 sps:$4 sm:$0xff]   ;;  %v7271_v28 = vld [vmem:[%s11143_s30 + $0x1c4] ss:$16 sps:$4 sm:$0xff]   ;;  %v7232_v29 = vld [vmem:[%s11143_s30 + $0xec] ss:$16 sps:$4 sm:$0xff]  }
  0x4f   : > { %1267 = vmatprep.subr.bf16.mxu0 %v7184_v33  ;;  %6363 = vmatmul.mubr.msk.bf16.gmra.mrb[4].mxu1 %vm1010_vm0, %v7984_v26  ;;  %v7263_v14 = vld [vmem:[%s11143_s30 + $0x1a0] ss:$16 sps:$4 sm:$0xff]   ;;  %v7230_v31 = vld [vmem:[%s11143_s30 + $0xe8] ss:$16 sps:$4 sm:$0xff]   ;;  %v7277_v32 = vld [vmem:[%s11143_s30 + $0x1e4] ss:$16 sps:$4 sm:$0xff]  }
  0x50   : > { %1200 = vmatprep.mubr.bf16.mxu1 %v7740_v2  ;;  %2697 = vmatpush1.bf16.msra.mxu1 %v7197_v40  ;;  %v7269_v30 = vld [vmem:[%s11143_s30 + $0x1c0] ss:$16 sps:$4 sm:$0xff]   ;;  %v7238_v33 = vld [vmem:[%s11143_s30 + $0x10c] ss:$16 sps:$4 sm:$0xff]   ;;  %v7236_v36 = vld [vmem:[%s11143_s30 + $0x108] ss:$16 sps:$4 sm:$0xff]  }
  0x51   : > { %2698 = vmatprep.subr.bf16.mxu1 %v7205_v41  ;;  %v7275_v34 = vld [vmem:[%s11143_s30 + $0x1e0] ss:$16 sps:$4 sm:$0xff]   ;;  %v7244_v37 = vld [vmem:[%s11143_s30 + $0x12c] ss:$16 sps:$4 sm:$0xff]   ;;  %v7248_v40 = vld [vmem:[%s11143_s30 + $0x148] ss:$16 sps:$4 sm:$0xff]  }
  0x52   : > { %1268 = vmatpush1.bf16.msra.mxu0 %v7182_v35  ;;  %v7283_v35 = vld [vmem:[%s11143_s30 + $0x204] ss:$16 sps:$4 sm:$0xff]   ;;  %v7256_v41 = vld [vmem:[%s11143_s30 + $0x16c] ss:$16 sps:$4 sm:$0xff]   ;;  %v7254_v42 = vld [vmem:[%s11143_s30 + $0x168] ss:$16 sps:$4 sm:$0xff]  }
  0x53   : > { %3031 = vmatprep.subr.bf16.mxu0 %v7190_v39  ;;  %v7250_v39 = vld [vmem:[%s11143_s30 + $0x14c] ss:$16 sps:$4 sm:$0xff]  }
  0x54   : > { %2699 = vmatpush1.bf16.msra.mxu1 %v7203_v44  ;;  %v7262_v43 = vld [vmem:[%s11143_s30 + $0x18c] ss:$16 sps:$4 sm:$0xff]   ;;  %v7260_v44 = vld [vmem:[%s11143_s30 + $0x188] ss:$16 sps:$4 sm:$0xff]  }
  0x55   : > { %6356 = vmatmul.mubr.msk.bf16.gmra.mrb[8].mxu0 %vm1010_vm0, %v8021_v38  ;;  %2700 = vmatprep.subr.bf16.mxu1 %v7211_v45  ;;  %v7268_v45 = vld [vmem:[%s11143_s30 + $0x1ac] ss:$16 sps:$4 sm:$0xff]  }
  0x56   : > { %1097 = vmatprep.mubr.bf16.mxu0 %v7740_v2  ;;  %v7280_v49 = vld [vmem:[%s11143_s30 + $0x1ec] ss:$16 sps:$4 sm:$0xff]  }
  0x57   : > { %6364 = vmatmul.mubr.msk.bf16.gmra.mrb[8].mxu1 %vm1010_vm0, %v8021_v38  ;;  %v7286_v50 = vld [vmem:[%s11143_s30 + $0x20c] ss:$16 sps:$4 sm:$0xff]  }
  0x58   : > { %1210 = vmatprep.mubr.bf16.mxu1 %v7740_v2  ;;  %2701 = vmatpush1.bf16.msra.mxu1 %v7209_v47  ;;  %v7274_v47 = vld [vmem:[%s11143_s30 + $0x1cc] ss:$16 sps:$4 sm:$0xff]  }
  0x59   : > { %2702 = vmatprep.subr.bf16.mxu1 %v7217_v48  ;;  %v7272_v48 = vld [vmem:[%s11143_s30 + $0x1c8] ss:$16 sps:$4 sm:$0xff]  }
  0x5c   : > { %2703 = vmatpush1.bf16.msra.mxu1 %v7215_v51  ;;  %v860_v51 = vlaneseq }
  0x5d   : > { %6357 = vmatmul.mubr.msk.bf16.gmra.mrb[12].mxu0 %vm1010_vm0, %v8046_v46  ;;  %2704 = vmatprep.subr.bf16.mxu1 %v7223_v52 }
  0x5e   : > { %1107 = vmatprep.mubr.bf16.mxu0 %v7740_v2  ;;  %v8287_v52 = vshrl.u32 %v860_v51, 7 }
  0x5f   : > { %6365 = vmatmul.mubr.msk.bf16.gmra.mrb[12].mxu1 %vm1010_vm0, %v8046_v46 }
  0x60   : > { %1220 = vmatprep.mubr.bf16.mxu1 %v7740_v2  ;;  %2705 = vmatpush1.bf16.msra.mxu1 %v7221_v54  ;;  %v8295_v54 = vld [vmem:[%s11145_s6] sm:$0x3f]  ;;  %v8314_v0 = vsub.s32 3, %v8287_v52  ;;  %s9062_s6 = sld [smem:[#allocation2 + $0x182]] }
  0x61   : > { %2706 = vmatprep.subr.bf16.mxu1 %v7229_v55  ;;  %v8298_v55 = vsub.s32 1, %v8287_v52 }
  0x62   : > { %11147 = vst [vmem:[#allocation9_spill] sm:$0xff] %v8314_v0 }
  0x63   : > { %11146 = vst [vmem:[#allocation8_spill] sm:$0xff] %v8298_v55  ;;  %v8306_v57 = vrot.slane %v8295_v54, %v8298_v55 }
  0x64   : > { %2707 = vmatpush1.bf16.msra.mxu1 %v7227_v58 }
  0x65   : > { %6358 = vmatmul.mubr.msk.bf16.gmra.mrb[16].mxu0 %vm1010_vm0, %v8068_v53  ;;  %2708 = vmatprep.subr.bf16.mxu1 %v7235_v59 }
  0x66   : > { %1117 = vmatprep.mubr.bf16.mxu0 %v7740_v2 }
  0x67   : > { %6366 = vmatmul.mubr.msk.bf16.gmra.mrb[16].mxu1 %vm1010_vm0, %v8068_v53 }
  0x68   : > { %1230 = vmatprep.mubr.bf16.mxu1 %v7740_v2  ;;  %2709 = vmatpush1.bf16.msra.mxu1 %v7233_v61  ;;  %v8310_v61 = vsub.s32 2, %v8287_v52 }
  0x69   : > { %2710 = vmatprep.subr.bf16.mxu1 %v7241_v62 }
  0x6a   : > { %v8320_v7 = vrot.slane %v8295_v54, %v8310_v61 }
  0x6c   : > { %2711 = vmatpush1.bf16.msra.mxu1 %v7239_v1 }
  0x6d   : > { %6359 = vmatmul.mubr.msk.bf16.gmra.mrb[20].mxu0 %vm1010_vm0, %v8090_v60  ;;  %2712 = vmatprep.subr.bf16.mxu1 %v7247_v3 }
  0x6e   : > { %1127 = vmatprep.mubr.bf16.mxu0 %v7740_v2 }
  0x6f   : > { %6367 = vmatmul.mubr.msk.bf16.gmra.mrb[20].mxu1 %vm1010_vm0, %v8090_v60 }
  0x70   : > { %1240 = vmatprep.mubr.bf16.mxu1 %v7740_v2  ;;  %2713 = vmatpush1.bf16.msra.mxu1 %v7245_v5 }
  0x71   : > { %2714 = vmatprep.subr.bf16.mxu1 %v7253_v6 }
  0x74   : > { %2715 = vmatpush1.bf16.msra.mxu1 %v7251_v9 }
  0x75   : > { %6360 = vmatmul.mubr.msk.bf16.gmra.mrb[24].mxu0 %vm1010_vm0, %v8112_v4  ;;  %2716 = vmatprep.subr.bf16.mxu1 %v7259_v10  ;;  %v8324_v10 = vrot.slane %v8295_v54, %v8314_v0 }
  0x76   : > { %1137 = vmatprep.mubr.bf16.mxu0 %v7740_v2 }
  0x77   : > { %6368 = vmatmul.mubr.msk.bf16.gmra.mrb[24].mxu1 %vm1010_vm0, %v8112_v4 }
  0x78   : > { %1250 = vmatprep.mubr.bf16.mxu1 %v7740_v2  ;;  %2717 = vmatpush1.bf16.msra.mxu1 %v7257_v12 }
  0x79   : > { %2718 = vmatprep.subr.bf16.mxu1 %v7265_v13 }
  0x7c   : > { %2719 = vmatpush1.bf16.msra.mxu1 %v7263_v14  ;;  %v7281_v14 = vld [vmem:[%s11143_s30 + $0x200] ss:$16 sps:$4 sm:$0xff]  }
  0x7d   : > { %6361 = vmatmul.mubr.msk.bf16.gmra.mrb[28].mxu0 %vm1010_vm0, %v8134_v11  ;;  %2720 = vmatprep.subr.bf16.mxu1 %v7271_v28 }
  0x7e   : > { %1293 = vmatprep.mubr.bf16.mxu0 %v7740_v2 }
  0x7f   : > { %6369 = vmatmul.mubr.msk.bf16.gmra.mrb[28].mxu1 %vm1010_vm0, %v8134_v11 }
  0x80   : > { %2721 = vmatpush1.bf16.msra.mxu1 %v7269_v30 }
  0x81   : > { %2722 = vmatprep.subr.bf16.mxu1 %v7277_v32  ;;  %v7287_v32 = vld [vmem:[%s11143_s30 + $0x220] ss:$16 sps:$4 sm:$0xff]  }
  0x84   : > { %2723 = vmatpush1.bf16.msra.mxu1 %v7275_v34 }
  0x85   : > { %6370 = vmatmul.mubr.msk.bf16.vlgmr.msra.gmra.mrb[32].mxu0 %vm1010_vm0, %v7956_v16  ;;  %v7206_v16 = vld [vmem:[%s11143_s30 + $0x68] ss:$16 sps:$4 sm:$0xff]   ;;  %2805 = vmatprep.subr.bf16.mxu1 %v7283_v35 }
  0x86   : > { %1303 = vmatprep.mubr.bf16.mxu0 %v7740_v2  ;;  %3032 = vmatpush1.bf16.msra.mxu0 %v7188_v15  ;;  %v7284_v15 = vld [vmem:[%s11143_s30 + $0x208] ss:$16 sps:$4 sm:$0xff]  }
  0x87   : > { %3033 = vmatprep.subr.bf16.mxu0 %v7196_v17 }
  0x8a   : > { %3034 = vmatpush1.bf16.msra.mxu0 %v7194_v18 }
  0x8b   : > { %3035 = vmatprep.subr.bf16.mxu0 %v7202_v19 }
  0x8d   : > { %6371 = vmatmul.mubr.msk.bf16.gmra.mrb[36].mxu0 %vm1010_vm0, %v7984_v26  ;;  %v7226_v26 = vld [vmem:[%s11143_s30 + $0xcc] ss:$16 sps:$4 sm:$0xff]  }
  0x8e   : > { %1313 = vmatprep.mubr.bf16.mxu0 %v7740_v2  ;;  %3036 = vmatpush1.bf16.msra.mxu0 %v7200_v20  ;;  %v7289_v20 = vld [vmem:[%s11143_s30 + $0x224] ss:$16 sps:$4 sm:$0xff]  }
  0x8f   : > { %3037 = vmatprep.subr.bf16.mxu0 %v7208_v21  ;;  %v7292_v21 = vld [vmem:[%s11143_s30 + $0x22c] ss:$16 sps:$4 sm:$0xff]  }
  0x92   : > { %3038 = vmatpush1.bf16.msra.mxu0 %v7206_v16 }
  0x93   : > { %3039 = vmatprep.subr.bf16.mxu0 %v7214_v22 }
  0x95   : > { %6372 = vmatmul.mubr.msk.bf16.gmra.mrb[40].mxu0 %vm1010_vm0, %v8021_v38  ;;  %v7242_v38 = vld [vmem:[%s11143_s30 + $0x128] ss:$16 sps:$4 sm:$0xff]  }
  0x96   : > { %1323 = vmatprep.mubr.bf16.mxu0 %v7740_v2  ;;  %3040 = vmatpush1.bf16.msra.mxu0 %v7212_v23 }
  0x97   : > { %3041 = vmatprep.subr.bf16.mxu0 %v7220_v24 }
  0x9a   : > { %3042 = vmatpush1.bf16.msra.mxu0 %v7218_v25 }
  0x9b   : > { %3043 = vmatprep.subr.bf16.mxu0 %v7226_v26 }
  0x9d   : > { %6373 = vmatmul.mubr.msk.bf16.gmra.mrb[44].mxu0 %vm1010_vm0, %v8046_v46  ;;  %v7266_v46 = vld [vmem:[%s11143_s30 + $0x1a8] ss:$16 sps:$4 sm:$0xff]  }
  0x9e   : > { %1333 = vmatprep.mubr.bf16.mxu0 %v7740_v2  ;;  %3044 = vmatpush1.bf16.msra.mxu0 %v7224_v27 }
  0x9f   : > { %3045 = vmatprep.subr.bf16.mxu0 %v7232_v29 }
  0xa2   : > { %3046 = vmatpush1.bf16.msra.mxu0 %v7230_v31 }
  0xa3   : > { %3047 = vmatprep.subr.bf16.mxu0 %v7238_v33  ;;  %v7290_v33 = vld [vmem:[%s11143_s30 + $0x228] ss:$16 sps:$4 sm:$0xff]  }
  0xa5   : > { %6374 = vmatmul.mubr.msk.bf16.gmra.mrb[48].mxu0 %vm1010_vm0, %v8068_v53  ;;  %v8290_v53 = vsub.s32 0, %v8287_v52 }
  0xa6   : > { %1343 = vmatprep.mubr.bf16.mxu0 %v7740_v2  ;;  %3048 = vmatpush1.bf16.msra.mxu0 %v7236_v36 }
  0xa7   : > { %3049 = vmatprep.subr.bf16.mxu0 %v7244_v37  ;;  %11144 = vst [vmem:[#allocation7_spill] sm:$0xff] %v8290_v53  ;;  %v8302_v56 = vrot.slane %v8295_v54, %v8290_v53  ;;  %v7295_v37 = vld [vmem:[%s11143_s30 + $0x244] ss:$16 sps:$4 sm:$0xff]  }
  0xaa   : > { %3050 = vmatpush1.bf16.msra.mxu0 %v7242_v38  ;;  %v7298_v38 = vld [vmem:[%s11143_s30 + $0x24c] ss:$16 sps:$4 sm:$0xff]  }
  0xab   : > { %3051 = vmatprep.subr.bf16.mxu0 %v7250_v39 }
  0xad   : > { %6375 = vmatmul.mubr.msk.bf16.gmra.mrb[52].mxu0 %vm1010_vm0, %v8090_v60 }
  0xae   : > { %1353 = vmatprep.mubr.bf16.mxu0 %v7740_v2  ;;  %3052 = vmatpush1.bf16.msra.mxu0 %v7248_v40 }
  0xaf   : > { %3053 = vmatprep.subr.bf16.mxu0 %v7256_v41 }
  0xb2   : > { %3054 = vmatpush1.bf16.msra.mxu0 %v7254_v42 }
  0xb3   : > { %3055 = vmatprep.subr.bf16.mxu0 %v7262_v43 }
  0xb5   : > { %6376 = vmatmul.mubr.msk.bf16.gmra.mrb[56].mxu0 %vm1010_vm0, %v8112_v4 }
  0xb6   : > { %1363 = vmatprep.mubr.bf16.mxu0 %v7740_v2  ;;  %3056 = vmatpush1.bf16.msra.mxu0 %v7260_v44  ;;  %v7278_v2 = vld [vmem:[%s11143_s30 + $0x1e8] ss:$16 sps:$4 sm:$0xff]  }
  0xb7   : > { %3057 = vmatprep.subr.bf16.mxu0 %v7268_v45 }
  0xba   : > { %3058 = vmatpush1.bf16.msra.mxu0 %v7266_v46 }
  0xbb   : > { %3059 = vmatprep.subr.bf16.mxu0 %v7274_v47 }
  0xbd   : > { %6377 = vmatmul.mubr.msk.bf16.gmra.mrb[60].mxu0 %vm1010_vm0, %v8134_v11 }
  0xbe   : > { %3060 = vmatpush1.bf16.msra.mxu0 %v7272_v48  ;;  %v7293_v48 = vld [vmem:[%s11143_s30 + $0x240] ss:$16 sps:$4 sm:$0xff]  }
  0xbf   : > { %3061 = vmatprep.subr.bf16.mxu0 %v7280_v49  ;;  %v7296_v49 = vld [vmem:[%s11143_s30 + $0x248] ss:$16 sps:$4 sm:$0xff]  }
  0xc2   : > { %3062 = vmatpush1.bf16.msra.mxu0 %v7278_v2 }
  0xc3   : > { %3144 = vmatprep.subr.bf16.mxu0 %v7286_v50 }
 0x118   : > { %v1069_v58 = vpop.f32.mrb[0].mxu0 }
 0x119   : > { %v1070_v59 = vadd.f32 %v1069_v58, %v8302_v56  ;;  %v1071_v60 = vpop.f32.mrb[1].mxu0  ;;  %v7301_v58 = vld [vmem:[%s11143_s30 + $0x264] ss:$16 sps:$4 sm:$0xff]  }
 0x11a   : > { %v1072_v62 = vadd.f32 %v1071_v60, %v8306_v57  ;;  %v1073_v63 = vpop.f32.mrb[2].mxu0  ;;  %v1182_v17 = vpop.f32.mrb[0].mxu1 }
 0x11b   : > { %v1074_v1 = vadd.f32 %v1073_v63, %v8302_v56  ;;  %v1075_v3 = vpop.f32.mrb[3].mxu0  ;;  %v1374_v5 = vmul.f32 %v1070_v59, %v1070_v59  ;;  %v1183_v16 = vadd.f32 %v1182_v17, %v8320_v7  ;;  %v1184_v22 = vpop.f32.mrb[1].mxu1  ;;  %v7304_v59 = vld [vmem:[%s11143_s30 + $0x26c] ss:$16 sps:$4 sm:$0xff]  }
 0x11c   : > { %v1076_v4 = vadd.f32 %v1075_v3, %v8306_v57  ;;  %v1375_v8 = vmul.f32 %v1072_v62, %v1072_v62  ;;  %v1185_v25 = vadd.f32 %v1184_v22, %v8324_v10  ;;  %v1186_v26 = vpop.f32.mrb[2].mxu1 }
 0x11d   : > { %v1380_v6 = vmul.f32 %v1074_v1, %v1074_v1  ;;  %v1188_v30 = vpop.f32.mrb[3].mxu1  ;;  %v1376_v34 = vmul.f32 %v1183_v16, %v1183_v16  ;;  %v1187_v39 = vadd.f32 %v1186_v26, %v8320_v7 }
 0x11e   : > { %v1381_v9 = vmul.f32 %v1076_v4, %v1076_v4  ;;  %v1377_v35 = vmul.f32 %v1185_v25, %v1185_v25  ;;  %v1189_v40 = vadd.f32 %v1188_v30, %v8324_v10  ;;  %v7305_v30 = vld [vmem:[%s11143_s30 + $0x280] ss:$16 sps:$4 sm:$0xff]  }
 0x11f   : > { %v1470_v11 = vpack.c.bf16 %v1380_v6, %v1374_v5  ;;  %v1382_v44 = vmul.f32 %v1187_v39, %v1187_v39 }
 0x120   : > { %v1471_v12 = vpack.c.bf16 %v1381_v9, %v1375_v8  ;;  %v1079_v13 = vpop.f32.mrb[4].mxu0  ;;  %v1383_v45 = vmul.f32 %v1189_v40, %v1189_v40 }
 0x121   : > { %v1080_v18 = vadd.f32 %v1079_v13, %v8302_v56  ;;  %v1081_v19 = vpop.f32.mrb[5].mxu0  ;;  %v8371_v60 = vpack.c.bf16 %v1382_v44, %v1376_v34 }
 0x122   : > { %v1082_v23 = vadd.f32 %v1081_v19, %v8306_v57  ;;  %v1083_v24 = vpop.f32.mrb[6].mxu0  ;;  %2724 = vmatprep.mubr.bf16.mxu1 %v1471_v12  ;;  %3063 = vmatprep.mubr.bf16.mxu0 %v1471_v12  ;;  %v1192_v2 = vpop.f32.mrb[4].mxu1  ;;  %v8373_v62 = vpack.c.bf16 %v1383_v45, %v1377_v35 }
 0x123   : > { %v1386_v27 = vmul.f32 %v1080_v18, %v1080_v18  ;;  %v1084_v28 = vadd.f32 %v1083_v24, %v8302_v56  ;;  %v1085_v29 = vpop.f32.mrb[7].mxu0  ;;  %2725 = vmatmul.mubr.bf16.vlgmr.msra.gmra.mrb[32].mxu1 %v1470_v11  ;;  %3064 = vmatmul.mubr.bf16.vlgmr.msra.gmra.mrb[64].mxu0 %v1470_v11  ;;  %v1194_v63 = vpop.f32.mrb[5].mxu1  ;;  %v1193_v4 = vadd.f32 %v1192_v2, %v8320_v7  ;;  %v7311_v2 = vld [vmem:[%s11143_s30 + $0x2a0] ss:$16 sps:$4 sm:$0xff]  }
 0x124   : > { %v1086_v31 = vadd.f32 %v1085_v29, %v8306_v57  ;;  %2806 = vmatpush1.bf16.msra.mxu1 %v7281_v14  ;;  %3145 = vmatpush1.bf16.msra.mxu0 %v7284_v15  ;;  %v1387_v41 = vmul.f32 %v1082_v23, %v1082_v23  ;;  %v1195_v5 = vadd.f32 %v1194_v63, %v8324_v10  ;;  %v1196_v6 = vpop.f32.mrb[6].mxu1  ;;  %v7299_v14 = vld [vmem:[%s11143_s30 + $0x260] ss:$16 sps:$4 sm:$0xff]   ;;  %v7302_v15 = vld [vmem:[%s11143_s30 + $0x268] ss:$16 sps:$4 sm:$0xff]  }
 0x125   : > { %v1392_v36 = vmul.f32 %v1084_v28, %v1084_v28  ;;  %2807 = vmatprep.subr.bf16.mxu1 %v7289_v20  ;;  %3146 = vmatprep.subr.bf16.mxu0 %v7292_v21  ;;  %v1197_v11 = vadd.f32 %v1196_v6, %v8320_v7  ;;  %v1198_v12 = vpop.f32.mrb[7].mxu1  ;;  %v1388_v17 = vmul.f32 %v1193_v4, %v1193_v4  ;;  %v7307_v20 = vld [vmem:[%s11143_s30 + $0x284] ss:$16 sps:$4 sm:$0xff]   ;;  %v7310_v21 = vld [vmem:[%s11143_s30 + $0x28c] ss:$16 sps:$4 sm:$0xff]  }
 0x126   : > { %v1393_v42 = vmul.f32 %v1086_v31, %v1086_v31  ;;  %v1389_v24 = vmul.f32 %v1195_v5, %v1195_v5  ;;  %v1199_v25 = vadd.f32 %v1198_v12, %v8324_v10  ;;  %v7308_v31 = vld [vmem:[%s11143_s30 + $0x288] ss:$16 sps:$4 sm:$0xff]   ;;  %v7319_v63 = vld [vmem:[%s11143_s30 + $0x2c4] ss:$16 sps:$4 sm:$0xff]  }
 0x127   : > { %v1476_v43 = vpack.c.bf16 %v1392_v36, %v1386_v27  ;;  %v1394_v16 = vmul.f32 %v1197_v11, %v1197_v11  ;;  %v7313_v36 = vld [vmem:[%s11143_s30 + $0x2a4] ss:$16 sps:$4 sm:$0xff]  }
 0x128   : > { %v1477_v46 = vpack.c.bf16 %v1393_v42, %v1387_v41  ;;  %v1089_v47 = vpop.f32.mrb[8].mxu0  ;;  %2808 = vmatpush1.bf16.msra.mxu1 %v7287_v32  ;;  %3147 = vmatpush1.bf16.msra.mxu0 %v7290_v33  ;;  %v1395_v32 = vmul.f32 %v1199_v25, %v1199_v25 }
 0x129   : > { %v1090_v50 = vadd.f32 %v1089_v47, %v8302_v56  ;;  %v1091_v51 = vpop.f32.mrb[9].mxu0  ;;  %2809 = vmatprep.subr.bf16.mxu1 %v7295_v37  ;;  %3148 = vmatprep.subr.bf16.mxu0 %v7298_v38  ;;  %v8394_v27 = vpack.c.bf16 %v1394_v16, %v1388_v17  ;;  %v7316_v37 = vld [vmem:[%s11143_s30 + $0x2ac] ss:$16 sps:$4 sm:$0xff]  }
 0x12a   : > { %v1092_v1 = vadd.f32 %v1091_v51, %v8306_v57  ;;  %v1093_v3 = vpop.f32.mrb[10].mxu0  ;;  %2734 = vmatprep.mubr.bf16.mxu1 %v1477_v46  ;;  %3073 = vmatprep.mubr.bf16.mxu0 %v1477_v46  ;;  %v1202_v33 = vpop.f32.mrb[8].mxu1  ;;  %v8411_v42 = vpack.c.bf16 %v1395_v32, %v1389_v24 }
 0x12b   : > { %v1094_v8 = vadd.f32 %v1093_v3, %v8302_v56  ;;  %v1095_v9 = vpop.f32.mrb[11].mxu0  ;;  %2735 = vmatmul.mubr.bf16.gmra.mrb[36].mxu1 %v1476_v43  ;;  %3074 = vmatmul.mubr.bf16.gmra.mrb[68].mxu0 %v1476_v43  ;;  %v1398_v18 = vmul.f32 %v1090_v50, %v1090_v50  ;;  %v1203_v38 = vadd.f32 %v1202_v33, %v8320_v7  ;;  %v1204_v39 = vpop.f32.mrb[9].mxu1  ;;  %v7314_v50 = vld [vmem:[%s11143_s30 + $0x2a8] ss:$16 sps:$4 sm:$0xff]  }
 0x12c   : > { %v1096_v13 = vadd.f32 %v1095_v9, %v8306_v57  ;;  %2810 = vmatpush1.bf16.msra.mxu1 %v7293_v48  ;;  %3149 = vmatpush1.bf16.msra.mxu0 %v7296_v49  ;;  %v1399_v22 = vmul.f32 %v1092_v1, %v1092_v1  ;;  %v1205_v43 = vadd.f32 %v1204_v39, %v8324_v10  ;;  %v1206_v44 = vpop.f32.mrb[10].mxu1  ;;  %v7322_v1 = vld [vmem:[%s11143_s30 + $0x2cc] ss:$16 sps:$4 sm:$0xff]  }
 0x12d   : > { %v1404_v19 = vmul.f32 %v1094_v8, %v1094_v8  ;;  %2811 = vmatprep.subr.bf16.mxu1 %v7301_v58  ;;  %3150 = vmatprep.subr.bf16.mxu0 %v7304_v59  ;;  %v1208_v48 = vpop.f32.mrb[11].mxu1  ;;  %v1400_v51 = vmul.f32 %v1203_v38, %v1203_v38  ;;  %v1207_v3 = vadd.f32 %v1206_v44, %v8320_v7 }
 0x12e   : > { %v1405_v23 = vmul.f32 %v1096_v13, %v1096_v13  ;;  %v1401_v58 = vmul.f32 %v1205_v43, %v1205_v43  ;;  %v1209_v4 = vadd.f32 %v1208_v48, %v8324_v10 }
 0x12f   : > { %v1482_v26 = vpack.c.bf16 %v1404_v19, %v1398_v18  ;;  %v1406_v9 = vmul.f32 %v1207_v3, %v1207_v3 }
 0x130   : > { %v1483_v28 = vpack.c.bf16 %v1405_v23, %v1399_v22  ;;  %v1099_v29 = vpop.f32.mrb[12].mxu0  ;;  %2812 = vmatpush1.bf16.msra.mxu1 %v7299_v14  ;;  %3151 = vmatpush1.bf16.msra.mxu0 %v7302_v15  ;;  %v1407_v11 = vmul.f32 %v1209_v4, %v1209_v4  ;;  %v7317_v14 = vld [vmem:[%s11143_s30 + $0x2c0] ss:$16 sps:$4 sm:$0xff]   ;;  %v7320_v15 = vld [vmem:[%s11143_s30 + $0x2c8] ss:$16 sps:$4 sm:$0xff]  }
 0x131   : > { %v1100_v34 = vadd.f32 %v1099_v29, %v8302_v56  ;;  %v1101_v35 = vpop.f32.mrb[13].mxu0  ;;  %2813 = vmatprep.subr.bf16.mxu1 %v7307_v20  ;;  %3152 = vmatprep.subr.bf16.mxu0 %v7310_v21  ;;  %v7325_v20 = vld [vmem:[%s11143_s30 + $0x2e4] ss:$16 sps:$4 sm:$0xff]   ;;  %v7328_v21 = vld [vmem:[%s11143_s30 + $0x2ec] ss:$16 sps:$4 sm:$0xff]   ;;  %v8443_v16 = vpack.c.bf16 %v1406_v9, %v1400_v51 }
 0x132   : > { %v1102_v40 = vadd.f32 %v1101_v35, %v8306_v57  ;;  %v1103_v41 = vpop.f32.mrb[14].mxu0  ;;  %2744 = vmatprep.mubr.bf16.mxu1 %v1483_v28  ;;  %3083 = vmatprep.mubr.bf16.mxu0 %v1483_v28  ;;  %v1212_v17 = vpop.f32.mrb[12].mxu1  ;;  %v8445_v22 = vpack.c.bf16 %v1407_v11, %v1401_v58  ;;  %v7323_v35 = vld [vmem:[%s11143_s30 + $0x2e0] ss:$16 sps:$4 sm:$0xff]   ;;  %v7332_v58 = vld [vmem:[%s11143_s30 + $0x308] ss:$16 sps:$4 sm:$0xff]  }
 0x133   : > { %v1410_v45 = vmul.f32 %v1100_v34, %v1100_v34  ;;  %v1104_v46 = vadd.f32 %v1103_v41, %v8302_v56  ;;  %v1105_v47 = vpop.f32.mrb[15].mxu0  ;;  %2745 = vmatmul.mubr.bf16.gmra.mrb[40].mxu1 %v1482_v26  ;;  %3084 = vmatmul.mubr.bf16.gmra.mrb[72].mxu0 %v1482_v26  ;;  %v1214_v23 = vpop.f32.mrb[13].mxu1  ;;  %v1213_v26 = vadd.f32 %v1212_v17, %v8320_v7  ;;  %v7334_v41 = vld [vmem:[%s11143_s30 + $0x30c] ss:$16 sps:$4 sm:$0xff]   ;;  %v7329_v51 = vld [vmem:[%s11143_s30 + $0x300] ss:$16 sps:$4 sm:$0xff]  }
 0x134   : > { %v1106_v49 = vadd.f32 %v1105_v47, %v8306_v57  ;;  %2814 = vmatpush1.bf16.msra.mxu1 %v7305_v30  ;;  %3153 = vmatpush1.bf16.msra.mxu0 %v7308_v31  ;;  %v1411_v5 = vmul.f32 %v1102_v40, %v1102_v40  ;;  %v1215_v28 = vadd.f32 %v1214_v23, %v8324_v10  ;;  %v1216_v29 = vpop.f32.mrb[14].mxu1  ;;  %v7331_v40 = vld [vmem:[%s11143_s30 + $0x304] ss:$16 sps:$4 sm:$0xff]   ;;  %v7338_v23 = vld [vmem:[%s11143_s30 + $0x328] ss:$16 sps:$4 sm:$0xff]  }
 0x135   : > { %v1416_v59 = vmul.f32 %v1104_v46, %v1104_v46  ;;  %2815 = vmatprep.subr.bf16.mxu1 %v7313_v36  ;;  %3154 = vmatprep.subr.bf16.mxu0 %v7316_v37  ;;  %v1217_v32 = vadd.f32 %v1216_v29, %v8320_v7  ;;  %v1218_v33 = vpop.f32.mrb[15].mxu1  ;;  %v7326_v36 = vld [vmem:[%s11143_s30 + $0x2e8] ss:$16 sps:$4 sm:$0xff]   ;;  %v1412_v37 = vmul.f32 %v1213_v26, %v1213_v26  ;;  %v7337_v4 = vld [vmem:[%s11143_s30 + $0x324] ss:$16 sps:$4 sm:$0xff]  }
 0x136   : > { %v1417_v6 = vmul.f32 %v1106_v49, %v1106_v49  ;;  %v1413_v46 = vmul.f32 %v1215_v28, %v1215_v28  ;;  %v1219_v47 = vadd.f32 %v1218_v33, %v8324_v10  ;;  %v7343_v28 = vld [vmem:[%s11143_s30 + $0x344] ss:$16 sps:$4 sm:$0xff]   ;;  %v7346_v29 = vld [vmem:[%s11143_s30 + $0x34c] ss:$16 sps:$4 sm:$0xff]  }
 0x137   : > { %v1488_v8 = vpack.c.bf16 %v1416_v59, %v1410_v45  ;;  %v1418_v43 = vmul.f32 %v1217_v32, %v1217_v32 }
 0x138   : > { %v1489_v12 = vpack.c.bf16 %v1417_v6, %v1411_v5  ;;  %v1109_v13 = vpop.f32.mrb[16].mxu0  ;;  %2816 = vmatpush1.bf16.msra.mxu1 %v7311_v2  ;;  %3155 = vmatpush1.bf16.msra.mxu0 %v7314_v50  ;;  %v1419_v59 = vmul.f32 %v1219_v47, %v1219_v47  ;;  %v7340_v5 = vld [vmem:[%s11143_s30 + $0x32c] ss:$16 sps:$4 sm:$0xff]  }
 0x139   : > { %v1110_v18 = vadd.f32 %v1109_v13, %v8302_v56  ;;  %v1111_v19 = vpop.f32.mrb[17].mxu0  ;;  %2817 = vmatprep.subr.bf16.mxu1 %v7319_v63  ;;  %3156 = vmatprep.subr.bf16.mxu0 %v7322_v1  ;;  %v8466_v49 = vpack.c.bf16 %v1418_v43, %v1412_v37 }
 0x13a   : > { %v1112_v24 = vadd.f32 %v1111_v19, %v8306_v57  ;;  %v1113_v25 = vpop.f32.mrb[18].mxu0  ;;  %2754 = vmatprep.mubr.bf16.mxu1 %v1489_v12  ;;  %3093 = vmatprep.mubr.bf16.mxu0 %v1489_v12  ;;  %v1222_v63 = vpop.f32.mrb[16].mxu1  ;;  %v8483_v12 = vpack.c.bf16 %v1419_v59, %v1413_v46  ;;  %v7352_v46 = vld [vmem:[%s11143_s30 + $0x36c] ss:$16 sps:$4 sm:$0xff]  }
 0x13b   : > { %v1114_v30 = vadd.f32 %v1113_v25, %v8302_v56  ;;  %v1115_v31 = vpop.f32.mrb[19].mxu0  ;;  %2755 = vmatmul.mubr.bf16.gmra.mrb[44].mxu1 %v1488_v8  ;;  %3094 = vmatmul.mubr.bf16.gmra.mrb[76].mxu0 %v1488_v8  ;;  %v1422_v38 = vmul.f32 %v1110_v18, %v1110_v18  ;;  %v1223_v6 = vadd.f32 %v1222_v63, %v8320_v7  ;;  %v1224_v8 = vpop.f32.mrb[17].mxu1 }
 0x13c   : > { %v1116_v34 = vadd.f32 %v1115_v31, %v8306_v57  ;;  %2818 = vmatpush1.bf16.msra.mxu1 %v7317_v14  ;;  %3157 = vmatpush1.bf16.msra.mxu0 %v7320_v15  ;;  %v1423_v44 = vmul.f32 %v1112_v24, %v1112_v24  ;;  %v1225_v13 = vadd.f32 %v1224_v8, %v8324_v10  ;;  %v1226_v14 = vpop.f32.mrb[18].mxu1  ;;  %v7347_v8 = vld [vmem:[%s11143_s30 + $0x360] ss:$16 sps:$4 sm:$0xff]  }
 0x13d   : > { %v1428_v39 = vmul.f32 %v1114_v30, %v1114_v30  ;;  %2819 = vmatprep.subr.bf16.mxu1 %v7325_v20  ;;  %3158 = vmatprep.subr.bf16.mxu0 %v7328_v21  ;;  %v1228_v19 = vpop.f32.mrb[19].mxu1  ;;  %v7335_v21 = vld [vmem:[%s11143_s30 + $0x320] ss:$16 sps:$4 sm:$0xff]   ;;  %v1424_v24 = vmul.f32 %v1223_v6, %v1223_v6  ;;  %v1227_v30 = vadd.f32 %v1226_v14, %v8320_v7 }
 0x13e   : > { %v1429_v45 = vmul.f32 %v1116_v34, %v1116_v34  ;;  %v1425_v25 = vmul.f32 %v1225_v13, %v1225_v13  ;;  %v1229_v31 = vadd.f32 %v1228_v19, %v8324_v10 }
 0x13f   : > { %v1494_v48 = vpack.c.bf16 %v1428_v39, %v1422_v38  ;;  %v7341_v39 = vld [vmem:[%s11143_s30 + $0x340] ss:$16 sps:$4 sm:$0xff]  }
 0x140   : > { %v1495_v2 = vpack.c.bf16 %v1429_v45, %v1423_v44  ;;  %v1119_v50 = vpop.f32.mrb[20].mxu0  ;;  %2820 = vmatpush1.bf16.msra.mxu1 %v7323_v35  ;;  %3159 = vmatpush1.bf16.msra.mxu0 %v7326_v36  ;;  %v1430_v35 = vmul.f32 %v1227_v30, %v1227_v30  ;;  %v1431_v36 = vmul.f32 %v1229_v31, %v1229_v31  ;;  %v7349_v45 = vld [vmem:[%s11143_s30 + $0x364] ss:$16 sps:$4 sm:$0xff]   ;;  %v7356_v30 = vld [vmem:[%s11143_s30 + $0x388] ss:$16 sps:$4 sm:$0xff]  }
 0x141   : > { %v1120_v1 = vadd.f32 %v1119_v50, %v8302_v56  ;;  %v1121_v3 = vpop.f32.mrb[21].mxu0  ;;  %2821 = vmatprep.subr.bf16.mxu1 %v7331_v40  ;;  %3160 = vmatprep.subr.bf16.mxu0 %v7334_v41  ;;  %v7344_v40 = vld [vmem:[%s11143_s30 + $0x348] ss:$16 sps:$4 sm:$0xff]   ;;  %v7361_v31 = vld [vmem:[%s11143_s30 + $0x3a4] ss:$16 sps:$4 sm:$0xff]  }
 0x142   : > { %v1122_v9 = vadd.f32 %v1121_v3, %v8306_v57  ;;  %v1123_v11 = vpop.f32.mrb[22].mxu0  ;;  %2764 = vmatprep.mubr.bf16.mxu1 %v1495_v2  ;;  %3103 = vmatprep.mubr.bf16.mxu0 %v1495_v2  ;;  %v1232_v41 = vpop.f32.mrb[20].mxu1  ;;  %v8515_v47 = vpack.c.bf16 %v1430_v35, %v1424_v24 }
 0x143   : > { %v1434_v15 = vmul.f32 %v1120_v1, %v1120_v1  ;;  %v1124_v17 = vadd.f32 %v1123_v11, %v8302_v56  ;;  %v1125_v18 = vpop.f32.mrb[23].mxu0  ;;  %2765 = vmatmul.mubr.bf16.gmra.mrb[48].mxu1 %v1494_v48  ;;  %3104 = vmatmul.mubr.bf16.gmra.mrb[80].mxu0 %v1494_v48  ;;  %v8517_v48 = vpack.c.bf16 %v1431_v36, %v1425_v25  ;;  %v1234_v2 = vpop.f32.mrb[21].mxu1  ;;  %v7353_v25 = vld [vmem:[%s11143_s30 + $0x380] ss:$16 sps:$4 sm:$0xff]   ;;  %v7364_v36 = vld [vmem:[%s11143_s30 + $0x3ac] ss:$16 sps:$4 sm:$0xff]  }
 0x144   : > { %v1126_v20 = vadd.f32 %v1125_v18, %v8306_v57  ;;  %2822 = vmatpush1.bf16.msra.mxu1 %v7329_v51  ;;  %3161 = vmatpush1.bf16.msra.mxu0 %v7332_v58  ;;  %v1435_v32 = vmul.f32 %v1122_v9, %v1122_v9  ;;  %v1233_v58 = vadd.f32 %v1232_v41, %v8320_v7  ;;  %v1236_v63 = vpop.f32.mrb[22].mxu1  ;;  %v7350_v9 = vld [vmem:[%s11143_s30 + $0x368] ss:$16 sps:$4 sm:$0xff]  }
 0x145   : > { %v1440_v26 = vmul.f32 %v1124_v17, %v1124_v17  ;;  %2823 = vmatprep.subr.bf16.mxu1 %v7337_v4  ;;  %3162 = vmatprep.subr.bf16.mxu0 %v7340_v5  ;;  %v1235_v59 = vadd.f32 %v1234_v2, %v8324_v10  ;;  %v1237_v4 = vadd.f32 %v1236_v63, %v8320_v7  ;;  %v1238_v5 = vpop.f32.mrb[23].mxu1  ;;  %v7358_v17 = vld [vmem:[%s11143_s30 + $0x38c] ss:$16 sps:$4 sm:$0xff]   ;;  %v7359_v63 = vld [vmem:[%s11143_s30 + $0x3a0] ss:$16 sps:$4 sm:$0xff]  }
 0x146   : > { %v1441_v33 = vmul.f32 %v1126_v20, %v1126_v20  ;;  %v1436_v11 = vmul.f32 %v1233_v58, %v1233_v58 }
 0x147   : > { %v1500_v34 = vpack.c.bf16 %v1440_v26, %v1434_v15  ;;  %v7355_v15 = vld [vmem:[%s11143_s30 + $0x384] ss:$16 sps:$4 sm:$0xff]   ;;  %v1442_v18 = vmul.f32 %v1237_v4, %v1237_v4 }
 0x148   : > { %v1501_v37 = vpack.c.bf16 %v1441_v33, %v1435_v32  ;;  %v1129_v38 = vpop.f32.mrb[24].mxu0  ;;  %2824 = vmatpush1.bf16.msra.mxu1 %v7335_v21  ;;  %3163 = vmatpush1.bf16.msra.mxu0 %v7338_v23  ;;  %v1437_v21 = vmul.f32 %v1235_v59, %v1235_v59  ;;  %v1239_v23 = vadd.f32 %v1238_v5, %v8324_v10 }
 0x149   : > { %v1130_v43 = vadd.f32 %v1129_v38, %v8302_v56  ;;  %v1131_v44 = vpop.f32.mrb[25].mxu0  ;;  %2825 = vmatprep.subr.bf16.mxu1 %v7343_v28  ;;  %3164 = vmatprep.subr.bf16.mxu0 %v7346_v29  ;;  %v8541_v26 = vpack.c.bf16 %v1442_v18, %v1436_v11 }
 0x14a   : > { %v1132_v50 = vadd.f32 %v1131_v44, %v8306_v57  ;;  %v1133_v51 = vpop.f32.mrb[26].mxu0  ;;  %2774 = vmatprep.mubr.bf16.mxu1 %v1501_v37  ;;  %3113 = vmatprep.mubr.bf16.mxu0 %v1501_v37  ;;  %v1443_v32 = vmul.f32 %v1239_v23, %v1239_v23  ;;  %v1242_v33 = vpop.f32.mrb[24].mxu1 }
 0x14b   : > { %v1134_v1 = vadd.f32 %v1133_v51, %v8302_v56  ;;  %v1135_v3 = vpop.f32.mrb[27].mxu0  ;;  %2775 = vmatmul.mubr.bf16.gmra.mrb[52].mxu1 %v1500_v34  ;;  %3114 = vmatmul.mubr.bf16.gmra.mrb[84].mxu0 %v1500_v34  ;;  %v1446_v13 = vmul.f32 %v1130_v43, %v1130_v43  ;;  %v1243_v37 = vadd.f32 %v1242_v33, %v8320_v7  ;;  %v1244_v38 = vpop.f32.mrb[25].mxu1 }
 0x14c   : > { %v1136_v6 = vadd.f32 %v1135_v3, %v8306_v57  ;;  %2826 = vmatpush1.bf16.msra.mxu1 %v7341_v39  ;;  %3165 = vmatpush1.bf16.msra.mxu0 %v7344_v40  ;;  %v1447_v19 = vmul.f32 %v1132_v50, %v1132_v50  ;;  %v878_v39 = vsub.s32 4, %v8287_v52  ;;  %v8556_v43 = vpack.c.bf16 %v1443_v32, %v1437_v21 }
 0x14d   : > { %v1452_v14 = vmul.f32 %v1134_v1, %v1134_v1  ;;  %2827 = vmatprep.subr.bf16.mxu1 %v7349_v45  ;;  %3166 = vmatprep.subr.bf16.mxu0 %v7352_v46  ;;  %v1245_v44 = vadd.f32 %v1244_v38, %v8324_v10  ;;  %v1246_v45 = vpop.f32.mrb[26].mxu1  ;;  %v882_v46 = vsub.s32 5, %v8287_v52  ;;  %v7362_v1 = vld [vmem:[%s11143_s30 + $0x3a8] ss:$16 sps:$4 sm:$0xff]   ;;  %v1448_v52 = vmul.f32 %v1243_v37, %v1243_v37 }
 0x14e   : > { %v1453_v20 = vmul.f32 %v1136_v6, %v1136_v6  ;;  %v1248_v58 = vpop.f32.mrb[27].mxu1  ;;  %v1247_v5 = vadd.f32 %v1246_v45, %v8320_v7  ;;  %v8577_v11 = vrot.slane %v8295_v54, %v878_v39  ;;  %v7374_v45 = vld [vmem:[%s11143_s30 + $0x3e8] ss:$16 sps:$4 sm:$0xff]  }
 0x14f   : > { %v1506_v24 = vpack.c.bf16 %v1452_v14, %v1446_v13  ;;  %v1449_v3 = vmul.f32 %v1245_v44, %v1245_v44  ;;  %v1249_v6 = vadd.f32 %v1248_v58, %v8324_v10  ;;  %v8580_v13 = vrot.slane %v8295_v54, %v882_v46  ;;  %v7373_v54 = vld [vmem:[%s11143_s30 + $0x3e4] ss:$16 sps:$4 sm:$0xff]   ;;  %v7371_v44 = vld [vmem:[%s11143_s30 + $0x3e0] ss:$16 sps:$4 sm:$0xff]  }
 0x150   : > { %v1507_v28 = vpack.c.bf16 %v1453_v20, %v1447_v19  ;;  %v1139_v29 = vpop.f32.mrb[28].mxu0  ;;  %2828 = vmatpush1.bf16.msra.mxu1 %v7347_v8  ;;  %3167 = vmatpush1.bf16.msra.mxu0 %v7350_v9  ;;  %v7365_v19 = vld [vmem:[%s11143_s30 + $0x3c0] ss:$16 sps:$4 sm:$0xff]   ;;  %v7368_v20 = vld [vmem:[%s11143_s30 + $0x3c8] ss:$16 sps:$4 sm:$0xff]  }
 0x151   : > { %v1140_v34 = vadd.f32 %v1139_v29, %v8302_v56  ;;  %v1141_v35 = vpop.f32.mrb[29].mxu0  ;;  %2829 = vmatprep.subr.bf16.mxu1 %v7355_v15  ;;  %3168 = vmatprep.subr.bf16.mxu0 %v7358_v17  ;;  %v1454_v15 = vmul.f32 %v1247_v5, %v1247_v5  ;;  %v1455_v17 = vmul.f32 %v1249_v6, %v1249_v6  ;;  %v7385_v6 = vld [vmem:[%s11143_s30 + $0x424] ss:$16 sps:$4 sm:$0xff]  }
 0x152   : > { %v1142_v40 = vadd.f32 %v1141_v35, %v8306_v57  ;;  %v1143_v41 = vpop.f32.mrb[30].mxu0  ;;  %2784 = vmatprep.mubr.bf16.mxu1 %v1507_v28  ;;  %3123 = vmatprep.mubr.bf16.mxu0 %v1507_v28  ;;  %v1252_v21 = vpop.f32.mrb[28].mxu1 }
 0x153   : > { %v1458_v2 = vmul.f32 %v1140_v34, %v1140_v34  ;;  %v1144_v50 = vadd.f32 %v1143_v41, %v8302_v56  ;;  %v1145_v51 = vpop.f32.mrb[31].mxu0  ;;  %2785 = vmatmul.mubr.bf16.gmra.mrb[56].mxu1 %v1506_v24  ;;  %3124 = vmatmul.mubr.bf16.gmra.mrb[88].mxu0 %v1506_v24  ;;  %v7367_v56 = vld [vmem:[%s11143_s30 + $0x3c4] ss:$16 sps:$4 sm:$0xff]   ;;  %v8591_v24 = vpack.c.bf16 %v1454_v15, %v1448_v52  ;;  %v1254_v29 = vpop.f32.mrb[29].mxu1 }
 0x154   : > { %v1146_v59 = vadd.f32 %v1145_v51, %v8306_v57  ;;  %2830 = vmatpush1.bf16.msra.mxu1 %v7353_v25  ;;  %3169 = vmatpush1.bf16.msra.mxu0 %v7356_v30  ;;  %v7370_v57 = vld [vmem:[%s11143_s30 + $0x3cc] ss:$16 sps:$4 sm:$0xff]   ;;  %v1459_v8 = vmul.f32 %v1142_v40, %v1142_v40  ;;  %v8593_v25 = vpack.c.bf16 %v1455_v17, %v1449_v3  ;;  %v1256_v33 = vpop.f32.mrb[30].mxu1 }
 0x155   : > { %v1464_v4 = vmul.f32 %v1144_v50, %v1144_v50  ;;  %2831 = vmatprep.subr.bf16.mxu1 %v7361_v31  ;;  %3170 = vmatprep.subr.bf16.mxu0 %v7364_v36  ;;  %v1253_v28 = vadd.f32 %v1252_v21, %v8320_v7  ;;  %v7376_v31 = vld [vmem:[%s11143_s30 + $0x3ec] ss:$16 sps:$4 sm:$0xff]   ;;  %v1255_v32 = vadd.f32 %v1254_v29, %v8324_v10  ;;  %v1258_v39 = vpop.f32.mrb[31].mxu1 }
 0x156   : > { %v1465_v9 = vmul.f32 %v1146_v59, %v1146_v59  ;;  %v1257_v38 = vadd.f32 %v1256_v33, %v8320_v7  ;;  %v7379_v7 = vld [vmem:[%s11143_s30 + $0x404] ss:$16 sps:$4 sm:$0xff]   ;;  %v7382_v51 = vld [vmem:[%s11143_s30 + $0x40c] ss:$16 sps:$4 sm:$0xff]  }
 0x157   : > { %v1512_v14 = vpack.c.bf16 %v1464_v4, %v1458_v2  ;;  %v1460_v37 = vmul.f32 %v1253_v28, %v1253_v28  ;;  %v1461_v46 = vmul.f32 %v1255_v32, %v1255_v32  ;;  %v1259_v2 = vadd.f32 %v1258_v39, %v8324_v10  ;;  %v7377_v4 = vld [vmem:[%s11143_s30 + $0x400] ss:$16 sps:$4 sm:$0xff]  }
 0x158   : > { %v1513_v18 = vpack.c.bf16 %v1465_v9, %v1459_v8  ;;  %2832 = vmatpush1.bf16.msra.mxu1 %v7359_v63  ;;  %3171 = vmatpush1.bf16.msra.mxu0 %v7362_v1  ;;  %v1295_v23 = vpop.f32.mrb[32].mxu0  ;;  %v1466_v58 = vmul.f32 %v1257_v38, %v1257_v38 }
 0x159   : > { %2833 = vmatprep.subr.bf16.mxu1 %v7367_v56  ;;  %3172 = vmatprep.subr.bf16.mxu0 %v7370_v57  ;;  %v1297_v30 = vpop.f32.mrb[33].mxu0  ;;  %v1296_v34 = vadd.f32 %v1295_v23, %v8577_v11  ;;  %v1467_v63 = vmul.f32 %v1259_v2, %v1259_v2  ;;  %v7380_v56 = vld [vmem:[%s11143_s30 + $0x408] ss:$16 sps:$4 sm:$0xff]   ;;  %v7383_v23 = vld [vmem:[%s11143_s30 + $0x420] ss:$16 sps:$4 sm:$0xff]  }
 0x15a   : > { %2794 = vmatprep.mubr.bf16.mxu1 %v1513_v18  ;;  %3133 = vmatprep.mubr.bf16.mxu0 %v1513_v18  ;;  %v1298_v35 = vadd.f32 %v1297_v30, %v8580_v13  ;;  %v1299_v36 = vpop.f32.mrb[34].mxu0  ;;  %v8620_v52 = vpack.c.bf16 %v1466_v58, %v1460_v37  ;;  %v7394_v30 = vld [vmem:[%s11143_s30 + $0x44c] ss:$16 sps:$4 sm:$0xff]  }
 0x15b   : > { %2795 = vmatmul.mubr.bf16.gmra.mrb[60].mxu1 %v1512_v14  ;;  %3134 = vmatmul.mubr.bf16.gmra.mrb[92].mxu0 %v1512_v14  ;;  %v1300_v40 = vadd.f32 %v1299_v36, %v8577_v11  ;;  %v1301_v41 = vpop.f32.mrb[35].mxu0  ;;  %v1378_v50 = vmul.f32 %v1296_v34, %v1296_v34  ;;  %v8630_v57 = vpack.c.bf16 %v1467_v63, %v1461_v46  ;;  %v7388_v14 = vld [vmem:[%s11143_s30 + $0x42c] ss:$16 sps:$4 sm:$0xff]   ;;  %v7389_v34 = vld [vmem:[%s11143_s30 + $0x440] ss:$16 sps:$4 sm:$0xff]  }
 0x15c   : > { %2834 = vmatpush1.bf16.msra.mxu1 %v7365_v19  ;;  %3173 = vmatpush1.bf16.msra.mxu0 %v7368_v20  ;;  %v1379_v1 = vmul.f32 %v1298_v35, %v1298_v35  ;;  %v1302_v10 = vadd.f32 %v1301_v41, %v8580_v13  ;;  %v7392_v35 = vld [vmem:[%s11143_s30 + $0x448] ss:$16 sps:$4 sm:$0xff]  }
 0x15d   : > { %2835 = vmatprep.subr.bf16.mxu1 %v7373_v54  ;;  %2837 = vmatprep.mubr.bf16.mxu1 %v8373_v62  ;;  %v1384_v59 = vmul.f32 %v1300_v40, %v1300_v40  ;;  %v7386_v54 = vld [vmem:[%s11143_s30 + $0x428] ss:$16 sps:$4 sm:$0xff]   ;;  %v7400_v40 = vld [vmem:[%s11143_s30 + $0x46c] ss:$16 sps:$4 sm:$0xff]  }
 0x15e   : > { %3174 = vmatprep.subr.bf16.mxu0 %v7376_v31  ;;  %3176 = vmatprep.mubr.bf16.mxu0 %v8373_v62  ;;  %v1385_v62 = vmul.f32 %v1302_v10, %v1302_v10 }
 0x15f   : > { %v8622_v3 = vpack.c.bf16 %v1384_v59, %v1378_v50  ;;  %v7395_v50 = vld [vmem:[%s11143_s30 + $0x460] ss:$16 sps:$4 sm:$0xff]   ;;  %v7406_v59 = vld [vmem:[%s11143_s30 + $0x48c] ss:$16 sps:$4 sm:$0xff]  }
 0x160   : > { %2836 = vmatpush1.bf16.msra.mxu1 %v7371_v44  ;;  %3175 = vmatpush1.bf16.msra.mxu0 %v7374_v45  ;;  %v1305_v5 = vpop.f32.mrb[36].mxu0  ;;  %v8639_v15 = vpack.c.bf16 %v1385_v62, %v1379_v1 }
 0x161   : > { %2918 = vmatprep.subr.bf16.mxu1 %v7379_v7  ;;  %3257 = vmatprep.subr.bf16.mxu0 %v7382_v51  ;;  %v1306_v8 = vadd.f32 %v1305_v5, %v8577_v11  ;;  %v1307_v9 = vpop.f32.mrb[37].mxu0  ;;  %v7398_v7 = vld [vmem:[%s11143_s30 + $0x468] ss:$16 sps:$4 sm:$0xff]  }
 0x162   : > { %v1308_v17 = vadd.f32 %v1307_v9, %v8580_v13  ;;  %v1309_v18 = vpop.f32.mrb[38].mxu0  ;;  %v7412_v9 = vld [vmem:[%s11143_s30 + $0x4ac] ss:$16 sps:$4 sm:$0xff]  }
 0x163   : > { %2838 = vmatmul.mubr.bf16.vlgmr.msra.gmra.mrb[32].mxu1 %v8371_v60  ;;  %3177 = vmatmul.mubr.bf16.vlgmr.msra.gmra.mrb[64].mxu0 %v8371_v60  ;;  %v1390_v19 = vmul.f32 %v1306_v8, %v1306_v8  ;;  %v1310_v20 = vadd.f32 %v1309_v18, %v8577_v11  ;;  %v1311_v21 = vpop.f32.mrb[39].mxu0  ;;  %v7391_v60 = vld [vmem:[%s11143_s30 + $0x444] ss:$16 sps:$4 sm:$0xff]  }
 0x164   : > { %2919 = vmatpush1.bf16.msra.mxu1 %v7377_v4  ;;  %3258 = vmatpush1.bf16.msra.mxu0 %v7380_v56  ;;  %v1391_v28 = vmul.f32 %v1308_v17, %v1308_v17  ;;  %v1312_v29 = vadd.f32 %v1311_v21, %v8580_v13  ;;  %v7401_v4 = vld [vmem:[%s11143_s30 + $0x480] ss:$16 sps:$4 sm:$0xff]   ;;  %v7404_v56 = vld [vmem:[%s11143_s30 + $0x488] ss:$16 sps:$4 sm:$0xff]  }
 0x165   : > { %2847 = vmatprep.mubr.bf16.mxu1 %v8411_v42  ;;  %2920 = vmatprep.subr.bf16.mxu1 %v7385_v6  ;;  %v1396_v31 = vmul.f32 %v1310_v20, %v1310_v20  ;;  %v7407_v21 = vld [vmem:[%s11143_s30 + $0x4a0] ss:$16 sps:$4 sm:$0xff]  }
 0x166   : > { %3186 = vmatprep.mubr.bf16.mxu0 %v8411_v42  ;;  %3259 = vmatprep.subr.bf16.mxu0 %v7388_v14  ;;  %v1397_v32 = vmul.f32 %v1312_v29, %v1312_v29  ;;  %v7397_v42 = vld [vmem:[%s11143_s30 + $0x464] ss:$16 sps:$4 sm:$0xff]   ;;  %v7418_v29 = vld [vmem:[%s11143_s30 + $0x4cc] ss:$16 sps:$4 sm:$0xff]  }
 0x167   : > { %v8660_v33 = vpack.c.bf16 %v1396_v31, %v1390_v19 }
 0x168   : > { %2921 = vmatpush1.bf16.msra.mxu1 %v7383_v23  ;;  %3260 = vmatpush1.bf16.msra.mxu0 %v7386_v54  ;;  %v8668_v36 = vpack.c.bf16 %v1397_v32, %v1391_v28  ;;  %v1315_v37 = vpop.f32.mrb[40].mxu0  ;;  %v7410_v23 = vld [vmem:[%s11143_s30 + $0x4a8] ss:$16 sps:$4 sm:$0xff]   ;;  %v7413_v32 = vld [vmem:[%s11143_s30 + $0x4c0] ss:$16 sps:$4 sm:$0xff]  }
 0x169   : > { %2922 = vmatprep.subr.bf16.mxu1 %v7391_v60  ;;  %3261 = vmatprep.subr.bf16.mxu0 %v7394_v30  ;;  %v1316_v38 = vadd.f32 %v1315_v37, %v8577_v11  ;;  %v1317_v39 = vpop.f32.mrb[41].mxu0 }
 0x16a   : > { %v1318_v41 = vadd.f32 %v1317_v39, %v8580_v13  ;;  %v1319_v44 = vpop.f32.mrb[42].mxu0  ;;  %v7424_v39 = vld [vmem:[%s11143_s30 + $0x4ec] ss:$16 sps:$4 sm:$0xff]  }
 0x16b   : > { %2848 = vmatmul.mubr.bf16.gmra.mrb[36].mxu1 %v8394_v27  ;;  %3187 = vmatmul.mubr.bf16.gmra.mrb[68].mxu0 %v8394_v27  ;;  %v1402_v45 = vmul.f32 %v1316_v38, %v1316_v38  ;;  %v1320_v46 = vadd.f32 %v1319_v44, %v8577_v11  ;;  %v1321_v2 = vpop.f32.mrb[43].mxu0  ;;  %v7403_v27 = vld [vmem:[%s11143_s30 + $0x484] ss:$16 sps:$4 sm:$0xff]  }
 0x16c   : > { %2923 = vmatpush1.bf16.msra.mxu1 %v7389_v34  ;;  %3262 = vmatpush1.bf16.msra.mxu0 %v7392_v35  ;;  %v1403_v51 = vmul.f32 %v1318_v41, %v1318_v41  ;;  %v1322_v58 = vadd.f32 %v1321_v2, %v8580_v13  ;;  %v7416_v34 = vld [vmem:[%s11143_s30 + $0x4c8] ss:$16 sps:$4 sm:$0xff]   ;;  %v7419_v2 = vld [vmem:[%s11143_s30 + $0x4e0] ss:$16 sps:$4 sm:$0xff]  }
 0x16d   : > { %2857 = vmatprep.mubr.bf16.mxu1 %v8445_v22  ;;  %2924 = vmatprep.subr.bf16.mxu1 %v7397_v42  ;;  %v1408_v63 = vmul.f32 %v1320_v46, %v1320_v46 }
 0x16e   : > { %3196 = vmatprep.mubr.bf16.mxu0 %v8445_v22  ;;  %3263 = vmatprep.subr.bf16.mxu0 %v7400_v40  ;;  %v1409_v1 = vmul.f32 %v1322_v58, %v1322_v58  ;;  %v7409_v22 = vld [vmem:[%s11143_s30 + $0x4a4] ss:$16 sps:$4 sm:$0xff]   ;;  %v7430_v58 = vld [vmem:[%s11143_s30 + $0x50c] ss:$16 sps:$4 sm:$0xff]  }
 0x16f   : > { %v8696_v10 = vpack.c.bf16 %v1408_v63, %v1402_v45 }
 0x170   : > { %2925 = vmatpush1.bf16.msra.mxu1 %v7395_v50  ;;  %3264 = vmatpush1.bf16.msra.mxu0 %v7398_v7  ;;  %v8704_v62 = vpack.c.bf16 %v1409_v1, %v1403_v51  ;;  %v1325_v5 = vpop.f32.mrb[44].mxu0  ;;  %v7422_v50 = vld [vmem:[%s11143_s30 + $0x4e8] ss:$16 sps:$4 sm:$0xff]   ;;  %v7425_v1 = vld [vmem:[%s11143_s30 + $0x500] ss:$16 sps:$4 sm:$0xff]  }
 0x171   : > { %2926 = vmatprep.subr.bf16.mxu1 %v7403_v27  ;;  %3265 = vmatprep.subr.bf16.mxu0 %v7406_v59  ;;  %v1326_v6 = vadd.f32 %v1325_v5, %v8577_v11  ;;  %v1327_v8 = vpop.f32.mrb[45].mxu0 }
 0x172   : > { %v1328_v14 = vadd.f32 %v1327_v8, %v8580_v13  ;;  %v1329_v17 = vpop.f32.mrb[46].mxu0  ;;  %v7436_v8 = vld [vmem:[%s11143_s30 + $0x52c] ss:$16 sps:$4 sm:$0xff]  }
 0x173   : > { %2858 = vmatmul.mubr.bf16.gmra.mrb[40].mxu1 %v8443_v16  ;;  %3197 = vmatmul.mubr.bf16.gmra.mrb[72].mxu0 %v8443_v16  ;;  %v1414_v18 = vmul.f32 %v1326_v6, %v1326_v6  ;;  %v1330_v19 = vadd.f32 %v1329_v17, %v8577_v11  ;;  %v1331_v20 = vpop.f32.mrb[47].mxu0  ;;  %v7415_v16 = vld [vmem:[%s11143_s30 + $0x4c4] ss:$16 sps:$4 sm:$0xff]  }
 0x174   : > { %2927 = vmatpush1.bf16.msra.mxu1 %v7401_v4  ;;  %3266 = vmatpush1.bf16.msra.mxu0 %v7404_v56  ;;  %v1415_v54 = vmul.f32 %v1328_v14, %v1328_v14  ;;  %v1332_v28 = vadd.f32 %v1331_v20, %v8580_v13  ;;  %v7428_v4 = vld [vmem:[%s11143_s30 + $0x508] ss:$16 sps:$4 sm:$0xff]   ;;  %v7431_v20 = vld [vmem:[%s11143_s30 + $0x520] ss:$16 sps:$4 sm:$0xff]  }
 0x175   : > { %2867 = vmatprep.mubr.bf16.mxu1 %v8483_v12  ;;  %2928 = vmatprep.subr.bf16.mxu1 %v7409_v22  ;;  %v1420_v60 = vmul.f32 %v1330_v19, %v1330_v19 }
 0x176   : > { %3206 = vmatprep.mubr.bf16.mxu0 %v8483_v12  ;;  %3267 = vmatprep.subr.bf16.mxu0 %v7412_v9  ;;  %v1421_v30 = vmul.f32 %v1332_v28, %v1332_v28  ;;  %v7421_v12 = vld [vmem:[%s11143_s30 + $0x4e4] ss:$16 sps:$4 sm:$0xff]   ;;  %v7442_v28 = vld [vmem:[%s11143_s30 + $0x54c] ss:$16 sps:$4 sm:$0xff]  }
 0x177   : > { %v8732_v31 = vpack.c.bf16 %v1420_v60, %v1414_v18 }
 0x178   : > { %2929 = vmatpush1.bf16.msra.mxu1 %v7407_v21  ;;  %3268 = vmatpush1.bf16.msra.mxu0 %v7410_v23  ;;  %v8740_v35 = vpack.c.bf16 %v1421_v30, %v1415_v54  ;;  %v1335_v37 = vpop.f32.mrb[48].mxu0  ;;  %v7434_v21 = vld [vmem:[%s11143_s30 + $0x528] ss:$16 sps:$4 sm:$0xff]   ;;  %v7437_v30 = vld [vmem:[%s11143_s30 + $0x540] ss:$16 sps:$4 sm:$0xff]  }
 0x179   : > { %2930 = vmatprep.subr.bf16.mxu1 %v7415_v16  ;;  %3269 = vmatprep.subr.bf16.mxu0 %v7418_v29  ;;  %v1336_v42 = vadd.f32 %v1335_v37, %v8577_v11  ;;  %v1337_v38 = vpop.f32.mrb[49].mxu0 }
 0x17a   : > { %v1338_v40 = vadd.f32 %v1337_v38, %v8580_v13  ;;  %v1339_v41 = vpop.f32.mrb[50].mxu0  ;;  %v7448_v38 = vld [vmem:[%s11143_s30 + $0x56c] ss:$16 sps:$4 sm:$0xff]  }
 0x17b   : > { %2868 = vmatmul.mubr.bf16.gmra.mrb[44].mxu1 %v8466_v49  ;;  %3207 = vmatmul.mubr.bf16.gmra.mrb[76].mxu0 %v8466_v49  ;;  %v1426_v44 = vmul.f32 %v1336_v42, %v1336_v42  ;;  %v1340_v45 = vadd.f32 %v1339_v41, %v8577_v11  ;;  %v1341_v46 = vpop.f32.mrb[51].mxu0  ;;  %v7427_v49 = vld [vmem:[%s11143_s30 + $0x504] ss:$16 sps:$4 sm:$0xff]  }
 0x17c   : > { %2931 = vmatpush1.bf16.msra.mxu1 %v7413_v32  ;;  %3270 = vmatpush1.bf16.msra.mxu0 %v7416_v34  ;;  %v1427_v7 = vmul.f32 %v1338_v40, %v1338_v40  ;;  %v1342_v51 = vadd.f32 %v1341_v46, %v8580_v13  ;;  %v7440_v32 = vld [vmem:[%s11143_s30 + $0x548] ss:$16 sps:$4 sm:$0xff]   ;;  %v7443_v46 = vld [vmem:[%s11143_s30 + $0x560] ss:$16 sps:$4 sm:$0xff]  }
 0x17d   : > { %2877 = vmatprep.mubr.bf16.mxu1 %v8517_v48  ;;  %2932 = vmatprep.subr.bf16.mxu1 %v7421_v12  ;;  %v1432_v27 = vmul.f32 %v1340_v45, %v1340_v45 }
 0x17e   : > { %3216 = vmatprep.mubr.bf16.mxu0 %v8517_v48  ;;  %3271 = vmatprep.subr.bf16.mxu0 %v7424_v39  ;;  %v1433_v59 = vmul.f32 %v1342_v51, %v1342_v51  ;;  %v7433_v48 = vld [vmem:[%s11143_s30 + $0x524] ss:$16 sps:$4 sm:$0xff]   ;;  %v7454_v51 = vld [vmem:[%s11143_s30 + $0x58c] ss:$16 sps:$4 sm:$0xff]  }
 0x17f   : > { %v8768_v63 = vpack.c.bf16 %v1432_v27, %v1426_v44 }
 0x180   : > { %2933 = vmatpush1.bf16.msra.mxu1 %v7419_v2  ;;  %3272 = vmatpush1.bf16.msra.mxu0 %v7422_v50  ;;  %v8776_v56 = vpack.c.bf16 %v1433_v59, %v1427_v7  ;;  %v1345_v5 = vpop.f32.mrb[52].mxu0  ;;  %v7446_v2 = vld [vmem:[%s11143_s30 + $0x568] ss:$16 sps:$4 sm:$0xff]   ;;  %v7449_v59 = vld [vmem:[%s11143_s30 + $0x580] ss:$16 sps:$4 sm:$0xff]  }
 0x181   : > { %2934 = vmatprep.subr.bf16.mxu1 %v7427_v49  ;;  %3273 = vmatprep.subr.bf16.mxu0 %v7430_v58  ;;  %v1346_v22 = vadd.f32 %v1345_v5, %v8577_v11  ;;  %v1347_v6 = vpop.f32.mrb[53].mxu0 }
 0x182   : > { %v1348_v9 = vadd.f32 %v1347_v6, %v8580_v13  ;;  %v1349_v14 = vpop.f32.mrb[54].mxu0  ;;  %v7460_v6 = vld [vmem:[%s11143_s30 + $0x5ac] ss:$16 sps:$4 sm:$0xff]  }
 0x183   : > { %2878 = vmatmul.mubr.bf16.gmra.mrb[48].mxu1 %v8515_v47  ;;  %3217 = vmatmul.mubr.bf16.gmra.mrb[80].mxu0 %v8515_v47  ;;  %v1438_v17 = vmul.f32 %v1346_v22, %v1346_v22  ;;  %v1350_v18 = vadd.f32 %v1349_v14, %v8577_v11  ;;  %v1351_v19 = vpop.f32.mrb[55].mxu0  ;;  %v7439_v47 = vld [vmem:[%s11143_s30 + $0x544] ss:$16 sps:$4 sm:$0xff]  }
 0x184   : > { %2935 = vmatpush1.bf16.msra.mxu1 %v7425_v1  ;;  %3274 = vmatpush1.bf16.msra.mxu0 %v7428_v4  ;;  %v1439_v23 = vmul.f32 %v1348_v9, %v1348_v9  ;;  %v1352_v54 = vadd.f32 %v1351_v19, %v8580_v13  ;;  %v7452_v1 = vld [vmem:[%s11143_s30 + $0x588] ss:$16 sps:$4 sm:$0xff]   ;;  %v7455_v19 = vld [vmem:[%s11143_s30 + $0x5a0] ss:$16 sps:$4 sm:$0xff]  }
 0x185   : > { %2887 = vmatprep.mubr.bf16.mxu1 %v8556_v43  ;;  %2936 = vmatprep.subr.bf16.mxu1 %v7433_v48  ;;  %v1444_v16 = vmul.f32 %v1350_v18, %v1350_v18 }
 0x186   : > { %3226 = vmatprep.mubr.bf16.mxu0 %v8556_v43  ;;  %3275 = vmatprep.subr.bf16.mxu0 %v7436_v8  ;;  %v1445_v29 = vmul.f32 %v1352_v54, %v1352_v54  ;;  %v7445_v43 = vld [vmem:[%s11143_s30 + $0x564] ss:$16 sps:$4 sm:$0xff]  }
 0x187   : > { %v8804_v60 = vpack.c.bf16 %v1444_v16, %v1438_v17  ;;  %v7464_v16 = vld [vmem:[%s11143_s30 + $0x5c8] ss:$16 sps:$4 sm:$0xff]  }
 0x188   : > { %2937 = vmatpush1.bf16.msra.mxu1 %v7431_v20  ;;  %3276 = vmatpush1.bf16.msra.mxu0 %v7434_v21  ;;  %v8812_v34 = vpack.c.bf16 %v1445_v29, %v1439_v23  ;;  %v1355_v37 = vpop.f32.mrb[56].mxu0  ;;  %v7458_v20 = vld [vmem:[%s11143_s30 + $0x5a8] ss:$16 sps:$4 sm:$0xff]  }
 0x189   : > { %2938 = vmatprep.subr.bf16.mxu1 %v7439_v47  ;;  %3277 = vmatprep.subr.bf16.mxu0 %v7442_v28  ;;  %v1356_v12 = vadd.f32 %v1355_v37, %v8577_v11  ;;  %v1357_v42 = vpop.f32.mrb[57].mxu0  ;;  %v7470_v37 = vld [vmem:[%s11143_s30 + $0x5e8] ss:$16 sps:$4 sm:$0xff]  }
 0x18a   : > { %v1358_v39 = vadd.f32 %v1357_v42, %v8580_v13  ;;  %v1359_v40 = vpop.f32.mrb[58].mxu0  ;;  %v7481_v42 = vld [vmem:[%s11148_s7 + $0x24] ss:$8 sps:$4 sm:$0xff]  }
 0x18b   : > { %2888 = vmatmul.mubr.bf16.gmra.mrb[52].mxu1 %v8541_v26  ;;  %3227 = vmatmul.mubr.bf16.gmra.mrb[84].mxu0 %v8541_v26  ;;  %v1450_v41 = vmul.f32 %v1356_v12, %v1356_v12  ;;  %v1360_v44 = vadd.f32 %v1359_v40, %v8577_v11  ;;  %v1361_v45 = vpop.f32.mrb[59].mxu0  ;;  %v7451_v26 = vld [vmem:[%s11143_s30 + $0x584] ss:$16 sps:$4 sm:$0xff]   ;;  %v7485_v40 = vld [vmem:[%s11148_s7 + $0x40] ss:$8 sps:$4 sm:$0xff]  }
 0x18c   : > { %2939 = vmatpush1.bf16.msra.mxu1 %v7437_v30  ;;  %3278 = vmatpush1.bf16.msra.mxu0 %v7440_v32  ;;  %v1451_v50 = vmul.f32 %v1358_v39, %v1358_v39  ;;  %v1362_v7 = vadd.f32 %v1361_v45, %v8580_v13  ;;  %v7472_v30 = vld [vmem:[%s11143_s30 + $0x5ec] ss:$16 sps:$4 sm:$0xff]   ;;  %v7467_v32 = vld [vmem:[%s11143_s30 + $0x5e0] ss:$16 sps:$4 sm:$0xff]  }
 0x18d   : > { %2897 = vmatprep.mubr.bf16.mxu1 %v8593_v25  ;;  %2940 = vmatprep.subr.bf16.mxu1 %v7445_v43  ;;  %v1456_v49 = vmul.f32 %v1360_v44, %v1360_v44  ;;  %v7475_v43 = vld [vmem:[%s11148_s7 + $0x4] ss:$8 sps:$4 sm:$0xff]   ;;  %v7478_v12 = vld [vmem:[%s11148_s7 + $0x14] ss:$8 sps:$4 sm:$0xff]   ;;  %v7491_v44 = vld [vmem:[%s11148_s7 + $0x60] ss:$8 sps:$4 sm:$0xff]  }
 0x18e   : > { %3236 = vmatprep.mubr.bf16.mxu0 %v8593_v25  ;;  %3279 = vmatprep.subr.bf16.mxu0 %v7448_v38  ;;  %v1457_v58 = vmul.f32 %v1362_v7, %v1362_v7  ;;  %v7457_v25 = vld [vmem:[%s11143_s30 + $0x5a4] ss:$16 sps:$4 sm:$0xff]   ;;  %v7479_v38 = vld [vmem:[%s11148_s7 + $0x20] ss:$8 sps:$4 sm:$0xff]  }
 0x18f   : > { %v8840_v27 = vpack.c.bf16 %v1456_v49, %v1450_v41  ;;  %v7487_v39 = vld [vmem:[%s11148_s7 + $0x44] ss:$8 sps:$4 sm:$0xff]   ;;  %v7503_v45 = vld [vmem:[%s11148_s7 + $0xa0] ss:$8 sps:$4 sm:$0xff]  }
 0x190   : > { %2941 = vmatpush1.bf16.msra.mxu1 %v7443_v46  ;;  %3280 = vmatpush1.bf16.msra.mxu0 %v7446_v2  ;;  %v8848_v4 = vpack.c.bf16 %v1457_v58, %v1451_v50  ;;  %v1365_v5 = vpop.f32.mrb[60].mxu0  ;;  %v7493_v41 = vld [vmem:[%s11148_s7 + $0x64] ss:$8 sps:$4 sm:$0xff]   ;;  %v7508_v46 = vld [vmem:[%s11148_s7 + $0xb4] ss:$8 sps:$4 sm:$0xff]  }
 0x191   : > { %2942 = vmatprep.subr.bf16.mxu1 %v7451_v26  ;;  %3281 = vmatprep.subr.bf16.mxu0 %v7454_v51  ;;  %v1366_v48 = vadd.f32 %v1365_v5, %v8577_v11  ;;  %v1367_v22 = vpop.f32.mrb[61].mxu0  ;;  %v7506_v2 = vld [vmem:[%s11148_s7 + $0xb0] ss:$8 sps:$4 sm:$0xff]   ;;  %v7511_v50 = vld [vmem:[%s11148_s7 + $0xc4] ss:$8 sps:$4 sm:$0xff]  }
 0x192   : > { %v1368_v8 = vadd.f32 %v1367_v22, %v8580_v13  ;;  %v1369_v9 = vpop.f32.mrb[62].mxu0  ;;  %v7509_v7 = vld [vmem:[%s11148_s7 + $0xc0] ss:$8 sps:$4 sm:$0xff]   ;;  %v7514_v26 = vld [vmem:[%s11148_s7 + $0xd4] ss:$8 sps:$4 sm:$0xff]  }
 0x193   : > { %2898 = vmatmul.mubr.bf16.gmra.mrb[56].mxu1 %v8591_v24  ;;  %3237 = vmatmul.mubr.bf16.gmra.mrb[88].mxu0 %v8591_v24  ;;  %v1462_v14 = vmul.f32 %v1366_v48, %v1366_v48  ;;  %v1370_v17 = vadd.f32 %v1369_v9, %v8577_v11  ;;  %v1371_v18 = vpop.f32.mrb[63].mxu0  ;;  %v7463_v11 = vld [vmem:[%s11143_s30 + $0x5c4] ss:$16 sps:$4 sm:$0xff]   ;;  %v7466_v24 = vld [vmem:[%s11143_s30 + $0x5cc] ss:$16 sps:$4 sm:$0xff]  }
 0x194   : > { %2943 = vmatpush1.bf16.msra.mxu1 %v7449_v59  ;;  %3282 = vmatpush1.bf16.msra.mxu0 %v7452_v1  ;;  %v1463_v21 = vmul.f32 %v1368_v8, %v1368_v8  ;;  %v1372_v23 = vadd.f32 %v1371_v18, %v8580_v13  ;;  %v7461_v13 = vld [vmem:[%s11143_s30 + $0x5c0] ss:$16 sps:$4 sm:$0xff]   ;;  %v7517_v49 = vld [vmem:[%s11148_s7 + $0xe4] ss:$8 sps:$4 sm:$0xff]  }
 0x195   : > { %2907 = vmatprep.mubr.bf16.mxu1 %v8630_v57  ;;  %2944 = vmatprep.subr.bf16.mxu1 %v7457_v25  ;;  %v1468_v54 = vmul.f32 %v1370_v17, %v1370_v17  ;;  %v7512_v51 = vld [vmem:[%s11148_s7 + $0xd0] ss:$8 sps:$4 sm:$0xff]   ;;  %v7515_v58 = vld [vmem:[%s11148_s7 + $0xe0] ss:$8 sps:$4 sm:$0xff]   ;;  %v7523_v1 = vld [vmem:[%s11148_s7 + $0x104] ss:$8 sps:$4 sm:$0xff]  }
 0x196   : > { %3246 = vmatprep.mubr.bf16.mxu0 %v8630_v57  ;;  %3283 = vmatprep.subr.bf16.mxu0 %v7460_v6  ;;  %v1469_v47 = vmul.f32 %v1372_v23, %v1372_v23  ;;  %v7469_v57 = vld [vmem:[%s11143_s30 + $0x5e4] ss:$16 sps:$4 sm:$0xff]   ;;  %v7518_v59 = vld [vmem:[%s11148_s7 + $0xf0] ss:$8 sps:$4 sm:$0xff]   ;;  %s11479_s30 = sld [smem:[#allocation141_spill]] }
 0x197   : > { %v8876_v28 = vpack.c.bf16 %v1468_v54, %v1462_v14 }
 0x198   : > { %2945 = vmatpush1.bf16.msra.mxu1 %v7455_v19  ;;  %3284 = vmatpush1.bf16.msra.mxu0 %v7458_v20  ;;  %v8884_v29 = vpack.c.bf16 %v1469_v47, %v1463_v21  ;;  %v3978_v47 = vld [vmem:[%s11150_s26] sm:$0xf] }
 0x199   : > { %2946 = vmatprep.subr.bf16.mxu1 %v7463_v11  ;;  %3285 = vmatprep.subr.bf16.mxu0 %v7466_v24 }
 0x19b   : > { %2908 = vmatmul.mubr.bf16.gmra.mrb[60].mxu1 %v8620_v52  ;;  %3247 = vmatmul.mubr.bf16.gmra.mrb[92].mxu0 %v8620_v52  ;;  %v7473_v52 = vld [vmem:[%s11148_s7] ss:$8 sps:$4 sm:$0xff]  }
 0x19c   : > { %2947 = vmatpush1.bf16.msra.mxu1 %v7461_v13  ;;  %3286 = vmatpush1.bf16.msra.mxu0 %v7464_v16  ;;  %v9089_v16 = vrot.slane %v3978_v47, %v8310_v61 }
 0x19d   : > { %2948 = vmatprep.subr.bf16.mxu1 %v7469_v57  ;;  %2950 = vmatprep.mubr.bf16.mxu1 %v8639_v15 }
 0x19e   : > { %3287 = vmatprep.subr.bf16.mxu0 %v7472_v30  ;;  %3289 = vmatprep.mubr.bf16.mxu0 %v8639_v15  ;;  %v7476_v15 = vld [vmem:[%s11148_s7 + $0x10] ss:$8 sps:$4 sm:$0xff]   ;;  %11151 = vst [vmem:[#allocation10_spill] sm:$0xff] %v9089_v16  ;;  %v9096_v30 = vstv %s9048_s8  ;;  %s11471_s8 = sld [smem:[#allocation136_spill]] }
 0x1a0   : > { %2949 = vmatpush1.bf16.msra.mxu1 %v7467_v32  ;;  %3288 = vmatpush1.bf16.msra.mxu0 %v7470_v37  ;;  %v9099_v32 = vstv %s9050_s4  ;;  %v9102_v37 = vstv %s9052_s29 }
 0x1a1   : > { %4672 = vmatprep.subr.bf16.mxu1 %v7475_v43 }
 0x1a3   : > { %2951 = vmatmul.mubr.bf16.vlgmr.msra.gmra.mrb[32].mxu1 %v8622_v3  ;;  %3290 = vmatmul.mubr.bf16.vlgmr.msra.gmra.mrb[64].mxu0 %v8622_v3  ;;  %v7484_v3 = vld [vmem:[%s11148_s7 + $0x34] ss:$8 sps:$4 sm:$0xff]  }
 0x1a4   : > { %2960 = vmatprep.mubr.bf16.mxu1 %v8668_v36  ;;  %3299 = vmatprep.mubr.bf16.mxu0 %v8668_v36  ;;  %v7482_v36 = vld [vmem:[%s11148_s7 + $0x30] ss:$8 sps:$4 sm:$0xff]  }
 0x1a5   : > { %4673 = vmatpush1.bf16.msra.mxu1 %v7473_v52 }
 0x1a6   : > { %4674 = vmatprep.subr.bf16.mxu1 %v7478_v12  ;;  %v9108_v12 = vstv %s9058_s0 }
 0x1a9   : > { %4675 = vmatpush1.bf16.msra.mxu1 %v7476_v15 }
 0x1aa   : > { %4676 = vmatprep.subr.bf16.mxu1 %v7481_v42 }
 0x1ab   : > { %2961 = vmatmul.mubr.bf16.gmra.mrb[36].mxu1 %v8660_v33  ;;  %3300 = vmatmul.mubr.bf16.gmra.mrb[68].mxu0 %v8660_v33  ;;  %v7490_v33 = vld [vmem:[%s11148_s7 + $0x54] ss:$8 sps:$4 sm:$0xff]  }
 0x1ac   : > { %2970 = vmatprep.mubr.bf16.mxu1 %v8704_v62  ;;  %3309 = vmatprep.mubr.bf16.mxu0 %v8704_v62  ;;  %v7488_v62 = vld [vmem:[%s11148_s7 + $0x50] ss:$8 sps:$4 sm:$0xff]  }
 0x1ad   : > { %4677 = vmatpush1.bf16.msra.mxu1 %v7479_v38 }
 0x1ae   : > { %4678 = vmatprep.subr.bf16.mxu1 %v7484_v3 }
 0x1b1   : > { %4679 = vmatpush1.bf16.msra.mxu1 %v7482_v36  ;;  %v9113_v36 = vstv %s9060_s2 }
 0x1b2   : > { %4680 = vmatprep.subr.bf16.mxu1 %v7487_v39  ;;  %v9116_v39 = vstv %s9062_s6  ;;  %s11475_s6 = sld [smem:[#allocation138_spill]] }
 0x1b3   : > { %2971 = vmatmul.mubr.bf16.gmra.mrb[40].mxu1 %v8696_v10  ;;  %3310 = vmatmul.mubr.bf16.gmra.mrb[72].mxu0 %v8696_v10  ;;  %v7496_v10 = vld [vmem:[%s11148_s7 + $0x74] ss:$8 sps:$4 sm:$0xff]  }
 0x1b4   : > { %2980 = vmatprep.mubr.bf16.mxu1 %v8740_v35  ;;  %3319 = vmatprep.mubr.bf16.mxu0 %v8740_v35  ;;  %v7494_v35 = vld [vmem:[%s11148_s7 + $0x70] ss:$8 sps:$4 sm:$0xff]  }
 0x1b5   : > { %4681 = vmatpush1.bf16.msra.mxu1 %v7485_v40 }
 0x1b6   : > { %4682 = vmatprep.subr.bf16.mxu1 %v7490_v33 }
 0x1b9   : > { %4683 = vmatpush1.bf16.msra.mxu1 %v7488_v62 }
 0x1ba   : > { %4684 = vmatprep.subr.bf16.mxu1 %v7493_v41  ;;  %v9120_v41 = vstv %s9065_s1  ;;  %s11477_s1 = sld [smem:[#allocation139_spill]] }
 0x1bb   : > { %2981 = vmatmul.mubr.bf16.gmra.mrb[44].mxu1 %v8732_v31  ;;  %3320 = vmatmul.mubr.bf16.gmra.mrb[76].mxu0 %v8732_v31  ;;  %v7499_v31 = vld [vmem:[%s11148_s7 + $0x84] ss:$8 sps:$4 sm:$0xff]  }
 0x1bc   : > { %2990 = vmatprep.mubr.bf16.mxu1 %v8776_v56  ;;  %3329 = vmatprep.mubr.bf16.mxu0 %v8776_v56  ;;  %v7502_v56 = vld [vmem:[%s11148_s7 + $0x94] ss:$8 sps:$4 sm:$0xff]  }
 0x1bd   : > { %4685 = vmatpush1.bf16.msra.mxu1 %v7491_v44  ;;  %v9123_v44 = vstv %s9068_s27 }
 0x1be   : > { %4686 = vmatprep.subr.bf16.mxu1 %v7496_v10 }
 0x1c1   : > { %4687 = vmatpush1.bf16.msra.mxu1 %v7494_v35 }
 0x1c2   : > { %4688 = vmatprep.subr.bf16.mxu1 %v7499_v31 }
 0x1c3   : > { %2991 = vmatmul.mubr.bf16.gmra.mrb[48].mxu1 %v8768_v63  ;;  %3330 = vmatmul.mubr.bf16.gmra.mrb[80].mxu0 %v8768_v63  ;;  %v7497_v63 = vld [vmem:[%s11148_s7 + $0x80] ss:$8 sps:$4 sm:$0xff]  }
 0x1c4   : > { %3000 = vmatprep.mubr.bf16.mxu1 %v8812_v34  ;;  %3339 = vmatprep.mubr.bf16.mxu0 %v8812_v34  ;;  %v7505_v34 = vld [vmem:[%s11148_s7 + $0xa4] ss:$8 sps:$4 sm:$0xff]  }
 0x1c5   : > { %4689 = vmatpush1.bf16.msra.mxu1 %v7497_v63 }
 0x1c6   : > { %4690 = vmatprep.subr.bf16.mxu1 %v7502_v56  ;;  %v9130_v56 = vstv %s9076_s25 }
 0x1cb   : > { %3001 = vmatmul.mubr.bf16.gmra.mrb[52].mxu1 %v8804_v60  ;;  %3340 = vmatmul.mubr.bf16.gmra.mrb[84].mxu0 %v8804_v60  ;;  %v7500_v60 = vld [vmem:[%s11148_s7 + $0x90] ss:$8 sps:$4 sm:$0xff]  }
 0x1cc   : > { %3010 = vmatprep.mubr.bf16.mxu1 %v8848_v4  ;;  %3349 = vmatprep.mubr.bf16.mxu0 %v8848_v4  ;;  %v1710_v4 = vld [vmem:[%s11149_s9] sm:$0xf]  ;;  %s9070_s9 = sld [smem:[#allocation2 + $0x101]] }
 0x1cd   : > { %4691 = vmatpush1.bf16.msra.mxu1 %v7500_v60  ;;  %v9035_v5 = vrot.slane %v1710_v4, %v8290_v53  ;;  %v9038_v25 = vrot.slane %v1710_v4, %v8310_v61  ;;  %v9043_v48 = vrot.slane %v1710_v4, %v8298_v55  ;;  %v9046_v22 = vrot.slane %v1710_v4, %v8314_v0 }
 0x1ce   : > { %4692 = vmatprep.subr.bf16.mxu1 %v7505_v34  ;;  %v9105_v61 = vstv %s9054_s10  ;;  %s11474_s10 = sld [smem:[#allocation137_spill]] }
 0x1d1   : > { %4693 = vmatpush1.bf16.msra.mxu1 %v7503_v45  ;;  %v9134_v45 = vstv %s9078_s24  ;;  %s11478_s24 = sld [smem:[#allocation140_spill]] }
 0x1d2   : > { %4694 = vmatprep.subr.bf16.mxu1 %v7508_v46  ;;  %v9127_v63 = vstv %s9070_s9  ;;  %v9137_v46 = vstv %s9081_s3  ;;  %s11470_s3 = sld [smem:[#allocation135_spill]] }
 0x1d3   : > { %3011 = vmatmul.mubr.bf16.gmra.mrb[56].mxu1 %v8840_v27  ;;  %3350 = vmatmul.mubr.bf16.gmra.mrb[88].mxu0 %v8840_v27  ;;  %v7520_v27 = vld [vmem:[%s11148_s7 + $0xf4] ss:$8 sps:$4 sm:$0xff]  }
 0x1d4   : > { %3020 = vmatprep.mubr.bf16.mxu1 %v8884_v29  ;;  %3359 = vmatprep.mubr.bf16.mxu0 %v8884_v29  ;;  %v9092_v29 = vstv %s9040_s28 }
 0x1d5   : > { %4695 = vmatpush1.bf16.msra.mxu1 %v7506_v2  ;;  %v9140_v2 = vstv %s9083_s22 }
 0x1d6   : > { %4696 = vmatprep.subr.bf16.mxu1 %v7511_v50  ;;  %11152 = vst [vmem:[#allocation11_spill] sm:$0xff] %v9140_v2 }
 0x1d9   : > { %4697 = vmatpush1.bf16.msra.mxu1 %v7509_v7 }
 0x1da   : > { %4698 = vmatprep.subr.bf16.mxu1 %v7514_v26  ;;  %v9143_v26 = vstv %s9085_s5 }
 0x1db   : > { %3021 = vmatmul.mubr.bf16.gmra.mrb[60].mxu1 %v8876_v28  ;;  %3360 = vmatmul.mubr.bf16.gmra.mrb[92].mxu0 %v8876_v28 }
 0x1dd   : > { %4699 = vmatpush1.bf16.msra.mxu1 %v7512_v51  ;;  %v9146_v51 = vrot.slane %v3978_v47, %v8290_v53 }
 0x1de   : > { %4700 = vmatprep.subr.bf16.mxu1 %v7517_v49 }
 0x1df   : > { %11153 = vst [vmem:[#allocation12_spill] sm:$0xff] %v9146_v51 }
 0x1e1   : > { %4701 = vmatpush1.bf16.msra.mxu1 %v7515_v58 }
 0x1e2   : > { %4702 = vmatprep.subr.bf16.mxu1 %v7520_v27 }
 0x1e5   : > { %4703 = vmatpush1.bf16.msra.mxu1 %v7518_v59  ;;  %v9150_v59 = vrot.slane %v3978_v47, %v8298_v55 }
 0x1e6   : > { %4785 = vmatprep.subr.bf16.mxu1 %v7523_v1 }
 0x1e7   : > { %11154 = vst [vmem:[#allocation13_spill] sm:$0xff] %v9150_v59 }
 0x276   : > { %v2952_v6 = vpop.f32.mrb[32].mxu1  ;;  %v3291_v8 = vpop.f32.mrb[64].mxu0 }
 0x277   : > { %v6902_v9 = vadd.f32 %v2952_v6, %v9035_v5  ;;  %v6934_v14 = vadd.f32 %v3291_v8, %v9038_v25  ;;  %v2954_v17 = vpop.f32.mrb[33].mxu1  ;;  %v3293_v18 = vpop.f32.mrb[65].mxu0 }
 0x278   : > { %v6903_v19 = vadd.f32 %v2954_v17, %v9043_v48  ;;  %v6935_v20 = vadd.f32 %v3293_v18, %v9046_v22  ;;  %v2956_v21 = vpop.f32.mrb[34].mxu1  ;;  %v3295_v23 = vpop.f32.mrb[66].mxu0 }
 0x279   : > { %7569 = vlog2.f32 %v6902_v9  ;;  %v6904_v11 = vadd.f32 %v2956_v21, %v9035_v5  ;;  %v2958_v24 = vpop.f32.mrb[35].mxu1  ;;  %v3297_v54 = vpop.f32.mrb[67].mxu0  ;;  %v6936_v28 = vadd.f32 %v3295_v23, %v9038_v25 }
 0x27a   : > { %7571 = vlog2.f32 %v6934_v14  ;;  %v6905_v13 = vadd.f32 %v2958_v24, %v9043_v48  ;;  %v6937_v57 = vadd.f32 %v3297_v54, %v9046_v22 }
 0x27b   : > { %7573 = vlog2.f32 %v6903_v19 }
 0x27c   : > { %7575 = vlog2.f32 %v6935_v20 }
 0x27d   : > { %7577 = vlog2.f32 %v6904_v11 }
 0x27e   : > { %7579 = vlog2.f32 %v6936_v28  ;;  %v2962_v43 = vpop.f32.mrb[36].mxu1  ;;  %v3301_v52 = vpop.f32.mrb[68].mxu0 }
 0x27f   : > { %v6906_v15 = vadd.f32 %v2962_v43, %v9035_v5  ;;  %v6938_v42 = vadd.f32 %v3301_v52, %v9038_v25  ;;  %v2964_v38 = vpop.f32.mrb[37].mxu1  ;;  %v3303_v3 = vpop.f32.mrb[69].mxu0  ;;  %7581 = vlog2.f32 %v6905_v13 }
 0x280   : > { %v6907_v40 = vadd.f32 %v2964_v38, %v9043_v48  ;;  %v2966_v33 = vpop.f32.mrb[38].mxu1  ;;  %v3305_v62 = vpop.f32.mrb[70].mxu0  ;;  %7583 = vlog2.f32 %v6937_v57  ;;  %v6939_v10 = vadd.f32 %v3303_v3, %v9046_v22 }
 0x281   : > { %v2968_v35 = vpop.f32.mrb[39].mxu1  ;;  %v3307_v31 = vpop.f32.mrb[71].mxu0  ;;  %7585 = vlog2.f32 %v6906_v15  ;;  %v6908_v60 = vadd.f32 %v2966_v33, %v9035_v5  ;;  %v6940_v27 = vadd.f32 %v3305_v62, %v9038_v25 }
 0x282   : > { %7587 = vlog2.f32 %v6938_v42  ;;  %v6909_v6 = vadd.f32 %v2968_v35, %v9043_v48  ;;  %v9155_v8 = vadd.f32 %v3307_v31, %v9046_v22 }
 0x283   : > { %v7570_v34 = vpop.eup %7569  ;;  %7589 = vlog2.f32 %v6907_v40 }
 0x284   : > { %v7572_v50 = vpop.eup %7571  ;;  %v3371_v7 = vmul.f32 0.6931472, %v7570_v34  ;;  %7591 = vlog2.f32 %v6939_v10 }
 0x285   : > { %v7574_v49 = vpop.eup %7573  ;;  %v3375_v58 = vmul.f32 0.6931472, %v7572_v50  ;;  %7593 = vlog2.f32 %v6908_v60 }
 0x286   : > { %v7576_v1 = vpop.eup %7575  ;;  %v3500_v4 = vmul.f32 %v9092_v29, %v3371_v7  ;;  %v2972_v9 = vpop.f32.mrb[40].mxu1  ;;  %v3620_v18 = vmul.f32 %v9096_v30, %v3371_v7  ;;  %v3740_v19 = vmul.f32 %v9099_v32, %v3371_v7  ;;  %v3860_v20 = vmul.f32 %v9102_v37, %v3371_v7 }
 0x287   : > { %v3311_v14 = vpop.f32.mrb[72].mxu0  ;;  %v7578_v17 = vpop.eup %7577  ;;  %v3552_v21 = vmul.f32 %v9105_v61, %v3375_v58  ;;  %v9166_v54 = vmul.f32 %v9108_v12, %v3375_v58  ;;  %v3792_v47 = vmul.f32 %v9113_v36, %v3375_v58  ;;  %v3373_v28 = vmul.f32 0.6931472, %v7574_v49 }
 0x288   : > { %v9161_v23 = vpop.f32.mrb[41].mxu1  ;;  %v9163_v11 = vpop.f32.mrb[73].mxu0  ;;  %v3377_v13 = vmul.f32 0.6931472, %v7576_v1  ;;  %v9170_v57 = vmul.f32 %v9116_v39, %v3375_v58  ;;  %v3379_v43 = vmul.f32 0.6931472, %v7578_v17  ;;  %7595 = vlog2.f32 %v6940_v27 }
 0x289   : > { %v7580_v24 = vpop.eup %7579  ;;  %11155 = vst [vmem:[#allocation14_spill] sm:$0xff] %v9166_v54  ;;  %v9172_v15 = vpop.f32.mrb[42].mxu1  ;;  %v3518_v3 = vmul.f32 %v9120_v41, %v3373_v28  ;;  %v3638_v40 = vmul.f32 %v9123_v44, %v3373_v28  ;;  %v3758_v33 = vmul.f32 %v9127_v63, %v3373_v28  ;;  %v3878_v62 = vmul.f32 %v9130_v56, %v3373_v28 }
 0x28a   : > { %11156 = vst [vmem:[#allocation15_spill] sm:$0xff] %v9170_v57  ;;  %v3383_v52 = vmul.f32 0.6931472, %v7580_v24  ;;  %v9174_v42 = vpop.f32.mrb[74].mxu0  ;;  %v7582_v38 = vpop.eup %7581  ;;  %v3586_v60 = vmul.f32 %v9134_v45, %v3377_v13  ;;  %7597 = vlog2.f32 %v6909_v6  ;;  %v9186_v34 = vadd.f32 %v2972_v9, %v9035_v5 }
 0x28b   : > { %v9180_v10 = vpop.f32.mrb[43].mxu1  ;;  %v9182_v35 = vpop.f32.mrb[75].mxu0  ;;  %v9189_v50 = vadd.f32 %v3311_v14, %v9038_v25  ;;  %v3534_v49 = vadd.f32 %v3518_v3, %v3500_v4  ;;  %v9191_v58 = vadd.f32 %v3638_v40, %v3620_v18  ;;  %v3774_v27 = vadd.f32 %v3758_v33, %v3740_v19 }
 0x28c   : > { %v7584_v31 = vpop.eup %7583  ;;  %v9193_v1 = vadd.f32 %v3878_v62, %v3860_v20  ;;  %v9196_v24 = vmul.f32 %v9137_v46, %v3377_v13  ;;  %v3826_v28 = vmul.f32 %v9140_v2, %v3377_v13  ;;  %v9200_v6 = vmul.f32 %v9143_v26, %v3377_v13 }
 0x28d   : > { %v7586_v7 = vpop.eup %7585  ;;  %11157 = vst [vmem:[#allocation16_spill] sm:$0xff] %v9191_v58  ;;  %v3501_v9 = vmul.f32 %v9092_v29, %v3379_v43  ;;  %v3568_v55 = vadd.f32 %v3552_v21, %v3534_v49  ;;  %v3808_v53 = vadd.f32 %v3792_v47, %v3774_v27  ;;  %v3621_v4 = vmul.f32 %v9096_v30, %v3379_v43 }
 0x28e   : > { %11158 = vst [vmem:[#allocation17_spill] sm:$0xff] %v9193_v1  ;;  %v7588_v17 = vpop.eup %7587  ;;  %11159 = vst [vmem:[#allocation18_spill] sm:$0xff] %v9196_v24  ;;  %v3741_v18 = vmul.f32 %v9099_v32, %v3379_v43  ;;  %v9205_v19 = vpop.f32.mrb[44].mxu1  ;;  %v3861_v40 = vmul.f32 %v9102_v37, %v3379_v43  ;;  %v3553_v33 = vmul.f32 %v9105_v61, %v3383_v52  ;;  %v3381_v62 = vmul.f32 0.6931472, %v7582_v38 }
 0x28f   : > { %11160 = vst [vmem:[#allocation19_spill] sm:$0xff] %v9200_v6  ;;  %v7590_v14 = vpop.eup %7589  ;;  %v9207_v20 = vpop.f32.mrb[76].mxu0  ;;  %v9212_v13 = vmul.f32 %v9108_v12, %v3383_v52  ;;  %v3602_v49 = vadd.f32 %v3586_v60, %v3568_v55  ;;  %v3842_v27 = vadd.f32 %v3826_v28, %v3808_v53  ;;  %v3385_v0 = vmul.f32 0.6931472, %v7584_v31 }
 0x290   : > { %v7592_v3 = vpop.eup %7591  ;;  %v9214_v6 = vpop.f32.mrb[45].mxu1  ;;  %v3387_v57 = vmul.f32 0.6931472, %v7586_v7  ;;  %v3519_v43 = vmul.f32 %v9120_v41, %v3381_v62  ;;  %v3639_v24 = vmul.f32 %v9123_v44, %v3381_v62  ;;  %v3879_v38 = vmul.f32 %v9130_v56, %v3381_v62 }
 0x291   : > { %11161 = vst [vmem:[#allocation20_spill] sm:$0xff] %v9212_v13  ;;  %v9216_v21 = vpop.f32.mrb[77].mxu0  ;;  %v7594_v47 = vpop.eup %7593  ;;  %v3759_v13 = vmul.f32 %v9127_v63, %v3381_v62  ;;  %v9231_v53 = vadd.f32 %v9146_v51, %v3602_v49  ;;  %v3793_v55 = vmul.f32 %v9113_v36, %v3383_v52  ;;  %v9235_v31 = vmul.f32 %v9116_v39, %v3383_v52 }
 0x292   : > { %11162 = vst [vmem:[#allocation21_spill] sm:$0xff] %v9216_v21  ;;  %v9218_v1 = vpop.f32.mrb[46].mxu1  ;;  %v9220_v59 = vpop.f32.mrb[78].mxu0  ;;  %v3391_v60 = vmul.f32 0.6931472, %v7588_v17  ;;  %v3535_v28 = vadd.f32 %v3519_v43, %v3501_v9  ;;  %v9239_v21 = vadd.f32 %v3879_v38, %v3861_v40  ;;  %v9242_v62 = vadd.f32 %v9089_v16, %v3842_v27 }
 0x293   : > { %11163 = vst [vmem:[#allocation22_spill] sm:$0xff] %v9218_v1  ;;  %11164 = vst [vmem:[#allocation23_spill] sm:$0xff] %v9220_v59  ;;  %v9226_v54 = vpop.f32.mrb[47].mxu1  ;;  %v9228_v58 = vpop.f32.mrb[79].mxu0  ;;  %v9237_v59 = vadd.f32 %v3639_v24, %v3621_v4  ;;  %v3775_v1 = vadd.f32 %v3759_v13, %v3741_v18  ;;  %v9246_v49 = vmul.f32 %v9137_v46, %v3385_v0  ;;  %v3389_v38 = vmul.f32 0.6931472, %v7590_v14 }
 0x294   : > { %11165 = vst [vmem:[#allocation24_spill] sm:$0xff] %v9228_v58  ;;  %11166 = vst [vmem:[#allocation25_spill] sm:$0xff] %v9231_v53  ;;  %v7596_v7 = vpop.eup %7595  ;;  %v3587_v58 = vmul.f32 %v9134_v45, %v3385_v0  ;;  %v3827_v53 = vmul.f32 %v9140_v2, %v3385_v0  ;;  %v9250_v9 = vmul.f32 %v9143_v26, %v3385_v0  ;;  %v3393_v0 = vmul.f32 0.6931472, %v7592_v3 }
 0x295   : > { %11167 = vst [vmem:[#allocation26_spill] sm:$0xff] %v9235_v31  ;;  %11168 = vst [vmem:[#allocation27_spill] sm:$0xff] %v9239_v21  ;;  %v7598_v52 = vpop.eup %7597  ;;  %v3569_v31 = vadd.f32 %v3553_v33, %v3535_v28  ;;  %v3809_v17 = vadd.f32 %v3793_v55, %v3775_v1  ;;  %v3502_v24 = vmul.f32 %v9092_v29, %v3387_v57  ;;  %7599 = vlog2.f32 %v9155_v8 }
 0x296   : > { %11169 = vst [vmem:[#allocation28_spill] sm:$0xff] %v9242_v62  ;;  %11170 = vst [vmem:[#allocation29_spill] sm:$0xff] %v9246_v49  ;;  %v3622_v4 = vmul.f32 %v9096_v30, %v3387_v57  ;;  %v3742_v18 = vmul.f32 %v9099_v32, %v3387_v57  ;;  %v3862_v40 = vmul.f32 %v9102_v37, %v3387_v57  ;;  %v9259_v27 = vpop.f32.mrb[48].mxu1  ;;  %v9261_v43 = vpop.f32.mrb[80].mxu0  ;;  %v3395_v62 = vmul.f32 0.6931472, %v7594_v47 }
 0x297   : > { %11171 = vst [vmem:[#allocation30_spill] sm:$0xff] %v9250_v9  ;;  %v9257_v13 = vmul.f32 %v9105_v61, %v3391_v60  ;;  %v3603_v33 = vadd.f32 %v3587_v58, %v3569_v31  ;;  %v3843_v1 = vadd.f32 %v3827_v53, %v3809_v17  ;;  %v9263_v55 = vpop.f32.mrb[49].mxu1  ;;  %v9265_v28 = vpop.f32.mrb[81].mxu0  ;;  %v9268_v9 = vmul.f32 %v9108_v12, %v3391_v60 }
 0x298   : > { %v9271_v57 = vmul.f32 %v9113_v36, %v3391_v60  ;;  %v9275_v21 = vmul.f32 %v9116_v39, %v3391_v60  ;;  %v3520_v58 = vmul.f32 %v9120_v41, %v3389_v38  ;;  %v3640_v14 = vmul.f32 %v9123_v44, %v3389_v38  ;;  %v9279_v53 = vpop.f32.mrb[50].mxu1  ;;  %v9281_v31 = vpop.f32.mrb[82].mxu0 }
 0x299   : > { %11172 = vst [vmem:[#allocation31_spill] sm:$0xff] %v9257_v13  ;;  %11173 = vst [vmem:[#allocation32_spill] sm:$0xff] %v9268_v9  ;;  %v3399_v3 = vmul.f32 0.6931472, %v7596_v7  ;;  %v9284_v17 = vadd.f32 %v9146_v51, %v3603_v33  ;;  %v3880_v47 = vmul.f32 %v9130_v56, %v3389_v38  ;;  %v3397_v8 = vmul.f32 0.6931472, %v7598_v52 }
 0x29a   : > { %11174 = vst [vmem:[#allocation33_spill] sm:$0xff] %v9271_v57  ;;  %11175 = vst [vmem:[#allocation34_spill] sm:$0xff] %v9275_v21  ;;  %v3760_v57 = vmul.f32 %v9127_v63, %v3389_v38  ;;  %v9288_v13 = vpop.f32.mrb[51].mxu1  ;;  %v9290_v60 = vpop.f32.mrb[83].mxu0  ;;  %v9293_v21 = vadd.f32 %v9089_v16, %v3843_v1  ;;  %v9295_v7 = vadd.f32 %v3520_v58, %v3502_v24  ;;  %7601 = vlog2.f32 %v9186_v34 }
 0x29b   : > { %11176 = vst [vmem:[#allocation35_spill] sm:$0xff] %v9284_v17  ;;  %v9297_v9 = vadd.f32 %v3640_v14, %v3622_v4  ;;  %v9300_v49 = vmul.f32 %v9134_v45, %v3393_v0  ;;  %v9304_v51 = vadd.f32 %v3880_v47, %v3862_v40  ;;  %v3503_v52 = vmul.f32 %v9092_v29, %v3395_v62 }
 0x29c   : > { %11177 = vst [vmem:[#allocation36_spill] sm:$0xff] %v9293_v21  ;;  %11178 = vst [vmem:[#allocation37_spill] sm:$0xff] %v9295_v7  ;;  %v9302_v33 = vadd.f32 %v3760_v57, %v3742_v18  ;;  %v3623_v38 = vmul.f32 %v9096_v30, %v3395_v62  ;;  %v9309_v17 = vmul.f32 %v9137_v46, %v3393_v0  ;;  %7603 = vlog2.f32 %v9189_v50 }
 0x29d   : > { %11179 = vst [vmem:[#allocation38_spill] sm:$0xff] %v9300_v49  ;;  %11181 = vst [vmem:[#allocation40_spill] sm:$0xff] %v9304_v51  ;;  %v9312_v1 = vmul.f32 %v9140_v2, %v3393_v0  ;;  %v3743_v24 = vmul.f32 %v9099_v32, %v3395_v62  ;;  %v3863_v4 = vmul.f32 %v9102_v37, %v3395_v62 }
 0x29e   : > { %11180 = vst [vmem:[#allocation39_spill] sm:$0xff] %v9302_v33  ;;  %11182 = vst [vmem:[#allocation41_spill] sm:$0xff] %v9309_v17  ;;  %v9317_v58 = vmul.f32 %v9143_v26, %v3393_v0  ;;  %v9320_v18 = vmul.f32 %v9105_v61, %v3399_v3  ;;  %v3521_v40 = vmul.f32 %v9120_v41, %v3397_v8  ;;  %v9324_v14 = vpop.f32.mrb[52].mxu1  ;;  %v9326_v47 = vpop.f32.mrb[84].mxu0 }
 0x29f   : > { %11183 = vst [vmem:[#allocation42_spill] sm:$0xff] %v9312_v1  ;;  %v3641_v57 = vmul.f32 %v9123_v44, %v3397_v8  ;;  %v3761_v16 = vmul.f32 %v9127_v63, %v3397_v8  ;;  %v3881_v1 = vmul.f32 %v9130_v56, %v3397_v8  ;;  %v6911_v62 = vadd.f32 %v9161_v23, %v9043_v48  ;;  %v9333_v0 = vpop.f32.mrb[53].mxu1  ;;  %v9335_v33 = vpop.f32.mrb[85].mxu0 }
 0x2a0   : > { %11184 = vst [vmem:[#allocation43_spill] sm:$0xff] %v9317_v58  ;;  %11185 = vst [vmem:[#allocation44_spill] sm:$0xff] %v9320_v18  ;;  %v9337_v58 = vadd.f32 %v3521_v40, %v3503_v52  ;;  %v6943_v21 = vadd.f32 %v9163_v11, %v9046_v22  ;;  %v9344_v49 = vpop.f32.mrb[54].mxu1  ;;  %v9346_v8 = vpop.f32.mrb[86].mxu0  ;;  %v6912_v52 = vadd.f32 %v9172_v15, %v9035_v5 }
 0x2a1   : > { %v9339_v51 = vadd.f32 %v3641_v57, %v3623_v38  ;;  %11187 = vst [vmem:[#allocation46_spill] sm:$0xff] %v9346_v8  ;;  %v9348_v34 = vadd.f32 %v3761_v16, %v3743_v24  ;;  %v9350_v23 = vadd.f32 %v3881_v1, %v3863_v4  ;;  %7605 = vlog2.f32 %v6911_v62  ;;  %v9354_v40 = vpop.f32.mrb[55].mxu1  ;;  %v9356_v38 = vpop.f32.mrb[87].mxu0 }
 0x2a2   : > { %11186 = vst [vmem:[#allocation45_spill] sm:$0xff] %v9337_v58  ;;  %11190 = vst [vmem:[#allocation49_spill] sm:$0xff] %v9354_v40  ;;  %v7600_v50 = vpop.eup %7599  ;;  %v9359_v57 = vmul.f32 %v9108_v12, %v3399_v3  ;;  %7607 = vlog2.f32 %v6943_v21  ;;  %v6944_v11 = vadd.f32 %v9174_v42, %v9038_v25  ;;  %v6913_v16 = vadd.f32 %v9180_v10, %v9043_v48 }
 0x2a3   : > { %11188 = vst [vmem:[#allocation47_spill] sm:$0xff] %v9348_v34  ;;  %11189 = vst [vmem:[#allocation48_spill] sm:$0xff] %v9350_v23  ;;  %v9366_v1 = vmul.f32 %v9113_v36, %v3399_v3  ;;  %v3401_v24 = vmul.f32 0.6931472, %v7600_v50  ;;  %7609 = vlog2.f32 %v6912_v52  ;;  %v6945_v15 = vadd.f32 %v9182_v35, %v9046_v22  ;;  %v11196_v52 = vld [vmem:[#allocation21_spill] sm:$0xff]  ;;  %v11197_v35 = vld [vmem:[#allocation22_spill] sm:$0xff] }
 0x2a4   : > { %11191 = vst [vmem:[#allocation50_spill] sm:$0xff] %v9356_v38  ;;  %11192 = vst [vmem:[#allocation51_spill] sm:$0xff] %v9359_v57  ;;  %v9371_v4 = vmul.f32 %v9116_v39, %v3399_v3  ;;  %7611 = vlog2.f32 %v6944_v11  ;;  %v6914_v21 = vadd.f32 %v9205_v19, %v9035_v5  ;;  %v6946_v42 = vadd.f32 %v9207_v20, %v9038_v25 }
 0x2a5   : > { %11193 = vst [vmem:[#allocation52_spill] sm:$0xff] %v9366_v1  ;;  %v9378_v10 = vmul.f32 %v9134_v45, %v3401_v24  ;;  %v6915_v62 = vadd.f32 %v9214_v6, %v9043_v48  ;;  %v6947_v50 = vadd.f32 %v11196_v52, %v9046_v22  ;;  %v6916_v3 = vadd.f32 %v11197_v35, %v9035_v5  ;;  %v11203_v6 = vld [vmem:[#allocation23_spill] sm:$0xff] }
 0x2a6   : > { %11194 = vst [vmem:[#allocation53_spill] sm:$0xff] %v9371_v4  ;;  %v9387_v11 = vmul.f32 %v9137_v46, %v3401_v24  ;;  %v9390_v19 = vmul.f32 %v9140_v2, %v3401_v24  ;;  %v9393_v20 = vmul.f32 %v9143_v26, %v3401_v24  ;;  %7613 = vlog2.f32 %v6913_v16  ;;  %v9395_v1 = vpop.f32.mrb[56].mxu1  ;;  %v9397_v34 = vpop.f32.mrb[88].mxu0  ;;  %v11204_v4 = vld [vmem:[#allocation24_spill] sm:$0xff] }
 0x2a7   : > { %11195 = vst [vmem:[#allocation54_spill] sm:$0xff] %v9378_v10  ;;  %11201 = vst [vmem:[#allocation56_spill] sm:$0xff] %v9395_v1  ;;  %7615 = vlog2.f32 %v6945_v15  ;;  %v6948_v52 = vadd.f32 %v11203_v6, %v9038_v25  ;;  %v9403_v35 = vadd.f32 %v9226_v54, %v9043_v48  ;;  %v9407_v23 = vadd.f32 %v11204_v4, %v9046_v22  ;;  %v9411_v24 = vpop.f32.mrb[89].mxu0 }
 0x2a8   : > { %11198 = vst [vmem:[#allocation21_spill] sm:$0xff] %v9387_v11  ;;  %11199 = vst [vmem:[#allocation22_spill] sm:$0xff] %v9390_v19  ;;  %v9409_v19 = vpop.f32.mrb[57].mxu1  ;;  %7617 = vlog2.f32 %v6914_v21  ;;  %v9415_v16 = vadd.f32 %v9259_v27, %v9035_v5  ;;  %v9419_v15 = vadd.f32 %v9261_v43, %v9038_v25  ;;  %v9423_v54 = vadd.f32 %v9263_v55, %v9043_v48  ;;  %v9427_v4 = vpop.f32.mrb[90].mxu0  ;;  %v11209_v27 = vld [vmem:[#allocation16_spill] sm:$0xff] }
 0x2a9   : > { %11200 = vst [vmem:[#allocation55_spill] sm:$0xff] %v9393_v20  ;;  %11202 = vst [vmem:[#allocation57_spill] sm:$0xff] %v9397_v34  ;;  %v9425_v6 = vpop.f32.mrb[58].mxu1  ;;  %v7602_v20 = vpop.eup %7601  ;;  %7619 = vlog2.f32 %v6946_v42  ;;  %v9431_v21 = vadd.f32 %v9265_v28, %v9046_v22  ;;  %v11211_v43 = vld [vmem:[#allocation20_spill] sm:$0xff]  ;;  %v9443_v42 = vadd.f32 %v9279_v53, %v9035_v5  ;;  %v9447_v28 = vadd.f32 %v9281_v31, %v9038_v25 }
 0x2aa   : > { %11205 = vst [vmem:[#allocation23_spill] sm:$0xff] %v9409_v19  ;;  %11206 = vst [vmem:[#allocation24_spill] sm:$0xff] %v9411_v24  ;;  %v11210_v24 = vld [vmem:[#allocation14_spill] sm:$0xff]  ;;  %v3689_v34 = vadd.f32 %v11211_v43, %v9237_v59  ;;  %v9437_v10 = vpop.f32.mrb[59].mxu1  ;;  %v9439_v55 = vpop.f32.mrb[91].mxu0  ;;  %7621 = vlog2.f32 %v6915_v62  ;;  %v11215_v43 = vld [vmem:[#allocation29_spill] sm:$0xff]  ;;  %v9455_v53 = vadd.f32 %v9288_v13, %v9043_v48  ;;  %v9459_v31 = vadd.f32 %v9290_v60, %v9046_v22 }
 0x2ab   : > { %11207 = vst [vmem:[#allocation58_spill] sm:$0xff] %v9425_v6  ;;  %11208 = vst [vmem:[#allocation59_spill] sm:$0xff] %v9427_v4  ;;  %v3688_v19 = vadd.f32 %v11210_v24, %v11209_v27  ;;  %v7604_v1 = vpop.eup %7603  ;;  %v3403_v6 = vmul.f32 0.6931472, %v7602_v20  ;;  %7623 = vlog2.f32 %v6947_v50  ;;  %v11214_v27 = vld [vmem:[#allocation18_spill] sm:$0xff] }
 0x2ac   : > { %11212 = vst [vmem:[#allocation16_spill] sm:$0xff] %v9437_v10  ;;  %11213 = vst [vmem:[#allocation14_spill] sm:$0xff] %v9439_v55  ;;  %v7606_v4 = vpop.eup %7605  ;;  %v3407_v24 = vmul.f32 0.6931472, %v7604_v1  ;;  %v3723_v10 = vadd.f32 %v11215_v43, %v3689_v34  ;;  %7625 = vlog2.f32 %v6916_v3 }
 0x2ad   : > { %v3722_v59 = vadd.f32 %v11214_v27, %v3688_v19  ;;  %v7608_v18 = vpop.eup %7607  ;;  %v3504_v55 = vmul.f32 %v9092_v29, %v3403_v6  ;;  %v3624_v62 = vmul.f32 %v9096_v30, %v3403_v6  ;;  %v3744_v1 = vmul.f32 %v9099_v32, %v3403_v6 }
 0x2ae   : > { %v7610_v20 = vpop.eup %7609  ;;  %v3864_v50 = vmul.f32 %v9102_v37, %v3403_v6  ;;  %v9464_v34 = vmul.f32 %v9105_v61, %v3407_v24  ;;  %v9467_v19 = vmul.f32 %v9108_v12, %v3407_v24  ;;  %v9470_v43 = vmul.f32 %v9113_v36, %v3407_v24  ;;  %v9475_v6 = vpop.f32.mrb[60].mxu1 }
 0x2af   : > { %v7612_v27 = vpop.eup %7611  ;;  %v3405_v13 = vmul.f32 0.6931472, %v7606_v4  ;;  %v3409_v58 = vmul.f32 0.6931472, %v7608_v18  ;;  %v9473_v60 = vmul.f32 %v9116_v39, %v3407_v24  ;;  %v3411_v38 = vmul.f32 0.6931472, %v7610_v20 }
 0x2b0   : > { %11216 = vst [vmem:[#allocation20_spill] sm:$0xff] %v9464_v34  ;;  %11217 = vst [vmem:[#allocation18_spill] sm:$0xff] %v9467_v19  ;;  %v3415_v40 = vmul.f32 0.6931472, %v7612_v27  ;;  %7627 = vlog2.f32 %v6948_v52  ;;  %v9477_v7 = vpop.f32.mrb[92].mxu0  ;;  %v7614_v34 = vpop.eup %7613  ;;  %v11226_v27 = vld [vmem:[#allocation13_spill] sm:$0xff] }
 0x2b1   : > { %11218 = vst [vmem:[#allocation29_spill] sm:$0xff] %v9470_v43  ;;  %11219 = vst [vmem:[#allocation60_spill] sm:$0xff] %v9473_v60  ;;  %v3522_v19 = vmul.f32 %v9120_v41, %v3405_v13  ;;  %v3642_v11 = vmul.f32 %v9123_v44, %v3405_v13  ;;  %v3762_v43 = vmul.f32 %v9127_v63, %v3405_v13  ;;  %v9483_v3 = vpop.f32.mrb[61].mxu1  ;;  %v9485_v4 = vpop.f32.mrb[93].mxu0  ;;  %7629 = vlog2.f32 %v9403_v35 }
 0x2b2   : > { %11220 = vst [vmem:[#allocation61_spill] sm:$0xff] %v9475_v6  ;;  %11221 = vst [vmem:[#allocation62_spill] sm:$0xff] %v9477_v7  ;;  %v3882_v18 = vmul.f32 %v9130_v56, %v3405_v13  ;;  %v7616_v24 = vpop.eup %7615  ;;  %v9488_v52 = vmul.f32 %v9134_v45, %v3409_v58  ;;  %v9491_v20 = vmul.f32 %v9137_v46, %v3409_v58  ;;  %v9499_v6 = vpop.f32.mrb[62].mxu1  ;;  %7631 = vlog2.f32 %v9407_v23 }
 0x2b3   : > { %11222 = vst [vmem:[#allocation63_spill] sm:$0xff] %v9483_v3  ;;  %11223 = vst [vmem:[#allocation64_spill] sm:$0xff] %v9485_v4  ;;  %v9494_v60 = vadd.f32 %v11226_v27, %v3722_v59  ;;  %v9497_v7 = vadd.f32 %v11226_v27, %v3723_v10  ;;  %v9501_v13 = vpop.f32.mrb[94].mxu0  ;;  %v7618_v3 = vpop.eup %7617  ;;  %v9503_v17 = vadd.f32 %v3522_v19, %v3504_v55  ;;  %7633 = vlog2.f32 %v9415_v16 }
 0x2b4   : > { %11224 = vst [vmem:[#allocation65_spill] sm:$0xff] %v9488_v52  ;;  %11225 = vst [vmem:[#allocation66_spill] sm:$0xff] %v9491_v20  ;;  %v9505_v4 = vadd.f32 %v3642_v11, %v3624_v62  ;;  %v9507_v8 = vadd.f32 %v3762_v43, %v3744_v1  ;;  %v9509_v52 = vadd.f32 %v3882_v18, %v3864_v50  ;;  %v9511_v20 = vpop.f32.mrb[63].mxu1  ;;  %v9513_v59 = vpop.f32.mrb[95].mxu0  ;;  %7635 = vlog2.f32 %v9419_v15 }
 0x2b5   : > { %11227 = vst [vmem:[#allocation67_spill] sm:$0xff] %v9499_v6  ;;  %11228 = vst [vmem:[#allocation68_spill] sm:$0xff] %v9501_v13  ;;  %v7620_v57 = vpop.eup %7619  ;;  %v9516_v10 = vmul.f32 %v9140_v2, %v3409_v58  ;;  %v9519_v6 = vmul.f32 %v9143_v26, %v3409_v58  ;;  %v3505_v55 = vmul.f32 %v9092_v29, %v3411_v38  ;;  %v3413_v58 = vmul.f32 0.6931472, %v7614_v34 }
 0x2b6   : > { %11229 = vst [vmem:[#allocation69_spill] sm:$0xff] %v9503_v17  ;;  %11230 = vst [vmem:[#allocation70_spill] sm:$0xff] %v9505_v4  ;;  %v3625_v11 = vmul.f32 %v9096_v30, %v3411_v38  ;;  %v7622_v62 = vpop.eup %7621  ;;  %v3745_v1 = vmul.f32 %v9099_v32, %v3411_v38  ;;  %v3865_v50 = vmul.f32 %v9102_v37, %v3411_v38  ;;  %vm4065_vm2 = vcmp.ge.f32.partialorder %v9494_v60, 0.0 }
 0x2b7   : > { %11231 = vst [vmem:[#allocation71_spill] sm:$0xff] %v9507_v8  ;;  %11232 = vst [vmem:[#allocation72_spill] sm:$0xff] %v9509_v52  ;;  %v9526_v19 = vmul.f32 %v9105_v61, %v3415_v40  ;;  %v9529_v43 = vmul.f32 %v9108_v12, %v3415_v40  ;;  %v7624_v18 = vpop.eup %7623  ;;  %v3417_v8 = vmul.f32 0.6931472, %v7616_v24  ;;  %v3419_v52 = vmul.f32 0.6931472, %v7618_v3 }
 0x2b8   : > { %11233 = vst [vmem:[#allocation73_spill] sm:$0xff] %v9511_v20  ;;  %11234 = vst [vmem:[#allocation74_spill] sm:$0xff] %v9513_v59  ;;  %v3423_v59 = vmul.f32 0.6931472, %v7620_v57  ;;  %v3523_v38 = vmul.f32 %v9120_v41, %v3413_v58  ;;  %v3643_v20 = vmul.f32 %v9123_v44, %v3413_v58  ;;  %v3763_v13 = vmul.f32 %v9127_v63, %v3413_v58 }
 0x2b9   : > { %11235 = vst [vmem:[#allocation75_spill] sm:$0xff] %v9516_v10  ;;  %11236 = vst [vmem:[#allocation76_spill] sm:$0xff] %v9519_v6  ;;  %v9532_v10 = vmul.f32 %v9113_v36, %v3415_v40  ;;  %v9536_v6 = vmul.f32 %v9116_v39, %v3415_v40  ;;  %v9544_v34 = vmul.f32 %v9134_v45, %v3417_v8  ;;  %v3421_v40 = vmul.f32 0.6931472, %v7622_v62 }
 0x2ba   : > { %11237 = vst [vmem:[#allocation77_spill] sm:$0xff] %v9526_v19  ;;  %11238 = vst [vmem:[#allocation78_spill] sm:$0xff] %v9529_v43  ;;  %v3883_v19 = vmul.f32 %v9130_v56, %v3413_v58  ;;  %v9547_v35 = vmul.f32 %v9137_v46, %v3417_v8  ;;  %v3425_v3 = vmul.f32 0.6931472, %v7624_v18  ;;  %v9549_v24 = vadd.f32 %v3523_v38, %v3505_v55 }
 0x2bb   : > { %11239 = vst [vmem:[#allocation79_spill] sm:$0xff] %v9532_v10  ;;  %11240 = vst [vmem:[#allocation80_spill] sm:$0xff] %v9536_v6  ;;  %v7626_v10 = vpop.eup %7625  ;;  %v9551_v23 = vadd.f32 %v3643_v20, %v3625_v11  ;;  %v9553_v6 = vadd.f32 %v3763_v13, %v3745_v1  ;;  %v3506_v58 = vmul.f32 %v9092_v29, %v3419_v52  ;;  %vm4069_vm3 = vcmp.ge.f32.partialorder %v9497_v7, 0.0 }
 0x2bc   : > { %11241 = vst [vmem:[#allocation81_spill] sm:$0xff] %v9544_v34  ;;  %v7628_v57 = vpop.eup %7627  ;;  %v9555_v17 = vadd.f32 %v3883_v19, %v3865_v50  ;;  %v3626_v43 = vmul.f32 %v9096_v30, %v3419_v52  ;;  %v3746_v34 = vmul.f32 %v9099_v32, %v3419_v52  ;;  %v3866_v4 = vmul.f32 %v9102_v37, %v3419_v52 }
 0x2bd   : > { %11242 = vst [vmem:[#allocation82_spill] sm:$0xff] %v9553_v6  ;;  %v9562_v62 = vmul.f32 %v9140_v2, %v3417_v8  ;;  %v9565_v55 = vmul.f32 %v9143_v26, %v3417_v8  ;;  %v9568_v20 = vmul.f32 %v9105_v61, %v3423_v59  ;;  %v9571_v13 = vmul.f32 %v9108_v12, %v3423_v59 }
 0x2be   : > { %11243 = vst [vmem:[#allocation83_spill] sm:$0xff] %v9555_v17  ;;  %v3524_v11 = vmul.f32 %v9120_v41, %v3421_v40  ;;  %v3644_v1 = vmul.f32 %v9123_v44, %v3421_v40  ;;  %v3764_v50 = vmul.f32 %v9127_v63, %v3421_v40  ;;  %v3884_v52 = vmul.f32 %v9130_v56, %v3421_v40  ;;  %v11253_v40 = vld [vmem:[#allocation25_spill] sm:$0xff] }
 0x2bf   : > { %11244 = vst [vmem:[#allocation84_spill] sm:$0xff] %v9562_v62  ;;  %11245 = vst [vmem:[#allocation85_spill] sm:$0xff] %v9565_v55  ;;  %v9578_v19 = vmul.f32 %v9113_v36, %v3423_v59  ;;  %v9581_v8 = vmul.f32 %v9116_v39, %v3423_v59  ;;  %v9584_v18 = vmul.f32 %v9134_v45, %v3425_v3  ;;  %vm4064_vm1 = vcmp.ge.f32.partialorder %v11253_v40, 0.0 }
 0x2c0   : > { %11246 = vst [vmem:[#allocation86_spill] sm:$0xff] %v9568_v20  ;;  %v9587_v38 = vmul.f32 %v9137_v46, %v3425_v3  ;;  %v9589_v62 = vadd.f32 %v3524_v11, %v3506_v58  ;;  %v9591_v6 = vadd.f32 %v3644_v1, %v3626_v43  ;;  %v9593_v55 = vadd.f32 %v3764_v50, %v3746_v34 }
 0x2c1   : > { %11247 = vst [vmem:[#allocation87_spill] sm:$0xff] %v9578_v19  ;;  %11248 = vst [vmem:[#allocation88_spill] sm:$0xff] %v9581_v8  ;;  %v9595_v17 = vadd.f32 %v3884_v52, %v3866_v4  ;;  %v7630_v19 = vpop.eup %7629  ;;  %v9599_v59 = vmul.f32 %v9140_v2, %v3425_v3  ;;  %v3427_v8 = vmul.f32 0.6931472, %v7626_v10  ;;  %v3431_v20 = vmul.f32 0.6931472, %v7628_v57 }
 0x2c2   : > { %11249 = vst [vmem:[#allocation89_spill] sm:$0xff] %v9584_v18  ;;  %11250 = vst [vmem:[#allocation90_spill] sm:$0xff] %v9587_v38  ;;  %v7632_v18 = vpop.eup %7631  ;;  %v9603_v58 = vmul.f32 %v9143_v26, %v3425_v3  ;;  %v3429_v43 = vmul.f32 0.6931472, %v7630_v19  ;;  %v4129_v15 = vmul.f32 0.01, %v9494_v60  ;;  %7637 = vlog2.f32 %v9423_v54 }
 0x2c3   : > { %11251 = vst [vmem:[#allocation91_spill] sm:$0xff] %v9593_v55  ;;  %11252 = vst [vmem:[#allocation92_spill] sm:$0xff] %v9595_v17  ;;  %v3507_v4 = vmul.f32 %v9092_v29, %v3427_v8  ;;  %v3627_v34 = vmul.f32 %v9096_v30, %v3427_v8  ;;  %v3747_v11 = vmul.f32 %v9099_v32, %v3427_v8  ;;  %7639 = vlog2.f32 %v9431_v21 }
 0x2c4   : > { %11254 = vst [vmem:[#allocation25_spill] sm:$0xff] %v9599_v59  ;;  %11255 = vst [vmem:[#allocation93_spill] sm:$0xff] %v9603_v58  ;;  %v3867_v10 = vmul.f32 %v9102_v37, %v3427_v8  ;;  %v9612_v57 = vmul.f32 %v9105_v61, %v3431_v20  ;;  %v9615_v16 = vmul.f32 %v9108_v12, %v3431_v20  ;;  %v3433_v8 = vmul.f32 0.6931472, %v7632_v18 }
 0x2c5   : > { %v3525_v3 = vmul.f32 %v9120_v41, %v3429_v43  ;;  %v3645_v1 = vmul.f32 %v9123_v44, %v3429_v43  ;;  %v3765_v50 = vmul.f32 %v9127_v63, %v3429_v43  ;;  %v3885_v52 = vmul.f32 %v9130_v56, %v3429_v43 }
 0x2c6   : > { %11256 = vst [vmem:[#allocation94_spill] sm:$0xff] %v9612_v57  ;;  %v9624_v19 = vmul.f32 %v9113_v36, %v3431_v20  ;;  %v4133_v59 = vmul.f32 0.01, %v9497_v7  ;;  %v9637_v57 = vmul.f32 %v9116_v39, %v3431_v20  ;;  %v9640_v43 = vmul.f32 %v9134_v45, %v3433_v8 }
 0x2c7   : > { %v9628_v55 = vadd.f32 %v3525_v3, %v3507_v4  ;;  %v9630_v58 = vadd.f32 %v3645_v1, %v3627_v34  ;;  %v9632_v17 = vadd.f32 %v3765_v50, %v3747_v11  ;;  %v9634_v38 = vadd.f32 %v3885_v52, %v3867_v10  ;;  %v11261_v34 = vld [vmem:[#allocation35_spill] sm:$0xff]  ;;  %v7634_v1 = vpop.eup %7633 }
 0x2c8   : > { %11257 = vst [vmem:[#allocation95_spill] sm:$0xff] %v9624_v19  ;;  %11260 = vst [vmem:[#allocation98_spill] sm:$0xff] %v9637_v57  ;;  %v9643_v18 = vmul.f32 %v9137_v46, %v3433_v8  ;;  %v4193_v54 = vsel %vm4065_vm2, %v9494_v60, %v4129_v15  ;;  %v4197_v4 = vsel %vm4069_vm3, %v9497_v7, %v4133_v59  ;;  %vm4068_vm4 = vcmp.ge.f32.partialorder %v11261_v34, 0.0  ;;  %v7636_v59 = vpop.eup %7635  ;;  %v7521_v50 = vld [vmem:[%s11148_s7 + $0x100] ss:$8 sps:$4 sm:$0xff]   ;;  %v11272_v19 = vld [vmem:[#allocation37_spill] sm:$0xff] }
 0x2c9   : > { %11258 = vst [vmem:[#allocation96_spill] sm:$0xff] %v9632_v17  ;;  %11259 = vst [vmem:[#allocation97_spill] sm:$0xff] %v9634_v38  ;;  %v4128_v20 = vmul.f32 0.01, %v11253_v40  ;;  %v9655_v11 = vmul.f32 %v9140_v2, %v3433_v8  ;;  %7641 = vlog2.f32 %v9443_v42  ;;  %v4257_v10 = vpack.c.bf16 %v4197_v4, %v4193_v54 }
 0x2ca   : > { %v4132_v3 = vmul.f32 0.01, %v11261_v34  ;;  %v9660_v60 = vmul.f32 %v9143_v26, %v3433_v8  ;;  %7643 = vlog2.f32 %v9447_v28  ;;  %v6922_v21 = vadd.f32 %v9324_v14, %v9035_v5  ;;  %v7526_v14 = vld [vmem:[%s11148_s7 + $0x114] ss:$8 sps:$4 sm:$0xff]  }
 0x2cb   : > { %11262 = vst [vmem:[#allocation35_spill] sm:$0xff] %v9655_v11  ;;  %v4192_v7 = vsel %vm4064_vm1, %v11253_v40, %v4128_v20  ;;  %v3435_v15 = vmul.f32 0.6931472, %v7634_v1  ;;  %4704 = vmatprep.mubr.bf16.mxu1 %v4257_v10  ;;  %7645 = vlog2.f32 %v9455_v53  ;;  %v6954_v28 = vadd.f32 %v9326_v47, %v9038_v25 }
 0x2cc   : > { %11263 = vst [vmem:[#allocation99_spill] sm:$0xff] %v9660_v60  ;;  %v4196_v42 = vsel %vm4068_vm4, %v11261_v34, %v4132_v3  ;;  %v3439_v52 = vmul.f32 0.6931472, %v7636_v59  ;;  %7647 = vlog2.f32 %v9459_v31  ;;  %v6923_v53 = vadd.f32 %v9333_v0, %v9043_v48  ;;  %v7638_v0 = vpop.eup %7637 }
 0x2cd   : > { %v4256_v40 = vpack.c.bf16 %v4196_v42, %v4192_v7  ;;  %v3508_v8 = vmul.f32 %v9092_v29, %v3435_v15  ;;  %v3628_v54 = vmul.f32 %v9096_v30, %v3435_v15  ;;  %v6955_v4 = vadd.f32 %v9335_v33, %v9046_v22  ;;  %v11266_v33 = vld [vmem:[#allocation32_spill] sm:$0xff]  ;;  %v11267_v7 = vld [vmem:[#allocation51_spill] sm:$0xff] }
 0x2ce   : > { %v6924_v47 = vadd.f32 %v9344_v49, %v9035_v5  ;;  %v3748_v31 = vmul.f32 %v9099_v32, %v3435_v15  ;;  %v3868_v34 = vmul.f32 %v9102_v37, %v3435_v15  ;;  %v9690_v20 = vmul.f32 %v9105_v61, %v3439_v52  ;;  %v7524_v49 = vld [vmem:[%s11148_s7 + $0x110] ss:$8 sps:$4 sm:$0xff]  }
 0x2cf   : > { %v9693_v10 = vmul.f32 %v9108_v12, %v3439_v52  ;;  %4705 = vmatmul.mubr.bf16.vlgmr.msra.gmra.mrb[64].mxu1 %v4256_v40  ;;  %v9696_v3 = vmul.f32 %v9113_v36, %v3439_v52  ;;  %7649 = vlog2.f32 %v6922_v21  ;;  %v3690_v1 = vadd.f32 %v11266_v33, %v9297_v9  ;;  %v11269_v40 = vld [vmem:[#allocation46_spill] sm:$0xff]  ;;  %v11270_v21 = vld [vmem:[#allocation41_spill] sm:$0xff] }
 0x2d0   : > { %11264 = vst [vmem:[#allocation100_spill] sm:$0xff] %v9690_v20  ;;  %4786 = vmatpush1.bf16.msra.mxu1 %v7521_v50  ;;  %v3691_v59 = vadd.f32 %v11267_v7, %v9339_v51  ;;  %v9706_v15 = vmul.f32 %v9116_v39, %v3439_v52  ;;  %v3437_v42 = vmul.f32 0.6931472, %v7638_v0  ;;  %7651 = vlog2.f32 %v6954_v28  ;;  %v11271_v9 = vld [vmem:[#allocation21_spill] sm:$0xff]  ;;  %v11273_v51 = vld [vmem:[#allocation31_spill] sm:$0xff]  ;;  %v7640_v52 = vpop.eup %7639 }
 0x2d1   : > { %11265 = vst [vmem:[#allocation101_spill] sm:$0xff] %v9696_v3  ;;  %4787 = vmatprep.subr.bf16.mxu1 %v7526_v14  ;;  %v6956_v50 = vadd.f32 %v11269_v40, %v9038_v25  ;;  %v7529_v3 = vld [vmem:[%s11148_s7 + $0x124] ss:$8 sps:$4 sm:$0xff]   ;;  %7653 = vlog2.f32 %v6923_v53  ;;  %v3724_v11 = vadd.f32 %v11270_v21, %v3690_v1  ;;  %v9717_v7 = vadd.f32 %v11273_v51, %v11272_v19  ;;  %v11274_v53 = vld [vmem:[#allocation49_spill] sm:$0xff]  ;;  %v7527_v21 = vld [vmem:[%s11148_s7 + $0x120] ss:$8 sps:$4 sm:$0xff]  }
 0x2d2   : > { %11268 = vst [vmem:[#allocation32_spill] sm:$0xff] %v9706_v15  ;;  %v3725_v33 = vadd.f32 %v11271_v9, %v3691_v59  ;;  %v3526_v14 = vmul.f32 %v9120_v41, %v3437_v42  ;;  %v3646_v28 = vmul.f32 %v9123_v44, %v3437_v42  ;;  %v3766_v0 = vmul.f32 %v9127_v63, %v3437_v42  ;;  %v11275_v59 = vld [vmem:[#allocation50_spill] sm:$0xff] }
 0x2d3   : > { %v3886_v40 = vmul.f32 %v9130_v56, %v3437_v42  ;;  %v7642_v15 = vpop.eup %7641  ;;  %v3441_v17 = vmul.f32 0.6931472, %v7640_v52  ;;  %7655 = vlog2.f32 %v6955_v4  ;;  %v6925_v1 = vadd.f32 %v11274_v53, %v9043_v48  ;;  %v7532_v4 = vld [vmem:[%s11148_s7 + $0x134] ss:$8 sps:$4 sm:$0xff]  }
 0x2d4   : > { %4788 = vmatpush1.bf16.msra.mxu1 %v7524_v49  ;;  %v6957_v19 = vadd.f32 %v11275_v59, %v9046_v22  ;;  %v7644_v9 = vpop.eup %7643  ;;  %v9730_v51 = vadd.f32 %v3526_v14, %v3508_v8  ;;  %v9732_v60 = vadd.f32 %v3646_v28, %v3628_v54  ;;  %v9734_v42 = vadd.f32 %v3766_v0, %v3748_v31 }
 0x2d5   : > { %v9736_v52 = vadd.f32 %v3886_v40, %v3868_v34  ;;  %4789 = vmatprep.subr.bf16.mxu1 %v7529_v3  ;;  %v7646_v49 = vpop.eup %7645  ;;  %v9742_v53 = vmul.f32 %v9134_v45, %v3441_v17  ;;  %v9745_v59 = vmul.f32 %v9137_v46, %v3441_v17  ;;  %v9748_v8 = vadd.f32 %v11226_v27, %v3724_v11  ;;  %v7530_v11 = vld [vmem:[%s11148_s7 + $0x130] ss:$8 sps:$4 sm:$0xff]  }
 0x2d6   : > { %11276 = vst [vmem:[#allocation51_spill] sm:$0xff] %v9730_v51  ;;  %11277 = vst [vmem:[#allocation46_spill] sm:$0xff] %v9734_v42  ;;  %v9751_v54 = vadd.f32 %v11226_v27, %v3725_v33  ;;  %v7648_v31 = vpop.eup %7647  ;;  %v3443_v34 = vmul.f32 0.6931472, %v7642_v15  ;;  %v3447_v3 = vmul.f32 0.6931472, %v7644_v9  ;;  %7657 = vlog2.f32 %v6924_v47 }
 0x2d7   : > { %11278 = vst [vmem:[#allocation41_spill] sm:$0xff] %v9736_v52  ;;  %11279 = vst [vmem:[#allocation21_spill] sm:$0xff] %v9742_v53  ;;  %v3445_v14 = vmul.f32 0.6931472, %v7646_v49  ;;  %v9754_v28 = vmul.f32 %v9140_v2, %v3441_v17  ;;  %v9757_v0 = vmul.f32 %v9143_v26, %v3441_v17  ;;  %v3449_v40 = vmul.f32 0.6931472, %v7648_v31 }
 0x2d8   : > { %11280 = vst [vmem:[#allocation37_spill] sm:$0xff] %v9745_v59  ;;  %7659 = vlog2.f32 %v6956_v50  ;;  %4790 = vmatpush1.bf16.msra.mxu1 %v7527_v21  ;;  %v3509_v33 = vmul.f32 %v9092_v29, %v3443_v34  ;;  %v3629_v15 = vmul.f32 %v9096_v30, %v3443_v34  ;;  %v3749_v9 = vmul.f32 %v9099_v32, %v3443_v34  ;;  %v7535_v17 = vld [vmem:[%s11148_s7 + $0x144] ss:$8 sps:$4 sm:$0xff]  }
 0x2d9   : > { %11281 = vst [vmem:[#allocation31_spill] sm:$0xff] %v9754_v28  ;;  %11282 = vst [vmem:[#allocation49_spill] sm:$0xff] %v9757_v0  ;;  %v3869_v47 = vmul.f32 %v9102_v37, %v3443_v34  ;;  %4791 = vmatprep.subr.bf16.mxu1 %v7532_v4  ;;  %v7650_v49 = vpop.eup %7649  ;;  %v9770_v50 = vmul.f32 %v9105_v61, %v3447_v3  ;;  %v9773_v21 = vmul.f32 %v9108_v12, %v3447_v3 }
 0x2da   : > { %v9776_v31 = vmul.f32 %v9113_v36, %v3447_v3  ;;  %vm4073_vm5 = vcmp.ge.f32.partialorder %v9748_v8, 0.0  ;;  %vm4077_vm6 = vcmp.ge.f32.partialorder %v9751_v54, 0.0  ;;  %v7652_v34 = vpop.eup %7651  ;;  %v3527_v4 = vmul.f32 %v9120_v41, %v3445_v14 }
 0x2db   : > { %11283 = vst [vmem:[#allocation50_spill] sm:$0xff] %v9770_v50  ;;  %11284 = vst [vmem:[#allocation102_spill] sm:$0xff] %v9773_v21  ;;  %v3647_v28 = vmul.f32 %v9123_v44, %v3445_v14  ;;  %v3767_v42 = vmul.f32 %v9127_v63, %v3445_v14  ;;  %v3887_v0 = vmul.f32 %v9130_v56, %v3445_v14  ;;  %v7654_v52 = vpop.eup %7653  ;;  %v7533_v50 = vld [vmem:[%s11148_s7 + $0x140] ss:$8 sps:$4 sm:$0xff]   ;;  %7661 = vlog2.f32 %v6925_v1  ;;  %v7536_v1 = vld [vmem:[%s11148_s7 + $0x150] ss:$8 sps:$4 sm:$0xff]  }
 0x2dc   : > { %11285 = vst [vmem:[#allocation103_spill] sm:$0xff] %v9776_v31  ;;  %v9785_v57 = vmul.f32 %v9116_v39, %v3447_v3  ;;  %v9788_v38 = vmul.f32 %v9134_v45, %v3449_v40  ;;  %v9791_v31 = vmul.f32 %v9137_v46, %v3449_v40  ;;  %v9794_v53 = vmul.f32 %v9140_v2, %v3449_v40 }
 0x2dd   : > { %4792 = vmatpush1.bf16.msra.mxu1 %v7530_v11  ;;  %v9799_v20 = vadd.f32 %v3527_v4, %v3509_v33  ;;  %v9801_v14 = vadd.f32 %v3647_v28, %v3629_v15  ;;  %v9803_v3 = vadd.f32 %v3767_v42, %v3749_v9  ;;  %v7656_v51 = vpop.eup %7655  ;;  %v3455_v11 = vmul.f32 0.6931472, %v7652_v34 }
 0x2de   : > { %11286 = vst [vmem:[#allocation104_spill] sm:$0xff] %v9785_v57  ;;  %11287 = vst [vmem:[#allocation105_spill] sm:$0xff] %v9788_v38  ;;  %v9805_v57 = vadd.f32 %v3887_v0, %v3869_v47  ;;  %4793 = vmatprep.subr.bf16.mxu1 %v7535_v17  ;;  %v7538_v38 = vld [vmem:[%s11148_s7 + $0x154] ss:$8 sps:$4 sm:$0xff]   ;;  %v9811_v59 = vmul.f32 %v9143_v26, %v3449_v40  ;;  %v3457_v33 = vmul.f32 0.6931472, %v7656_v51  ;;  %7663 = vlog2.f32 %v6957_v19 }
 0x2df   : > { %11288 = vst [vmem:[#allocation106_spill] sm:$0xff] %v9791_v31  ;;  %11289 = vst [vmem:[#allocation107_spill] sm:$0xff] %v9794_v53  ;;  %v3451_v53 = vmul.f32 0.6931472, %v7650_v49  ;;  %v3453_v31 = vmul.f32 0.6931472, %v7654_v52  ;;  %v9822_v40 = vmul.f32 %v9105_v61, %v3455_v11  ;;  %v9825_v51 = vmul.f32 %v9108_v12, %v3455_v11 }
 0x2e0   : > { %11290 = vst [vmem:[#allocation108_spill] sm:$0xff] %v9799_v20  ;;  %11291 = vst [vmem:[#allocation109_spill] sm:$0xff] %v9803_v3  ;;  %v4137_v28 = vmul.f32 0.01, %v9748_v8  ;;  %v7658_v52 = vpop.eup %7657  ;;  %v9828_v19 = vmul.f32 %v9113_v36, %v3455_v11  ;;  %v4141_v47 = vmul.f32 0.01, %v9751_v54  ;;  %v9839_v3 = vmul.f32 %v9116_v39, %v3455_v11 }
 0x2e1   : > { %11292 = vst [vmem:[#allocation110_spill] sm:$0xff] %v9805_v57  ;;  %11293 = vst [vmem:[#allocation111_spill] sm:$0xff] %v9811_v59  ;;  %v3510_v42 = vmul.f32 %v9092_v29, %v3451_v53  ;;  %v3630_v0 = vmul.f32 %v9096_v30, %v3451_v53  ;;  %v3750_v15 = vmul.f32 %v9099_v32, %v3451_v53  ;;  %4794 = vmatpush1.bf16.msra.mxu1 %v7533_v50 }
 0x2e2   : > { %v3870_v9 = vmul.f32 %v9102_v37, %v3451_v53  ;;  %11294 = vst [vmem:[#allocation112_spill] sm:$0xff] %v9822_v40  ;;  %11295 = vst [vmem:[#allocation113_spill] sm:$0xff] %v9825_v51  ;;  %4795 = vmatprep.subr.bf16.mxu1 %v7538_v38  ;;  %v7541_v53 = vld [vmem:[%s11148_s7 + $0x164] ss:$8 sps:$4 sm:$0xff]   ;;  %v7660_v17 = vpop.eup %7659  ;;  %v3528_v49 = vmul.f32 %v9120_v41, %v3453_v31  ;;  %v3648_v50 = vmul.f32 %v9123_v44, %v3453_v31 }
 0x2e3   : > { %11296 = vst [vmem:[#allocation114_spill] sm:$0xff] %v9828_v19  ;;  %v3768_v34 = vmul.f32 %v9127_v63, %v3453_v31  ;;  %v3888_v4 = vmul.f32 %v9130_v56, %v3453_v31  ;;  %11297 = vst [vmem:[#allocation115_spill] sm:$0xff] %v9839_v3  ;;  %v9842_v19 = vmul.f32 %v9134_v45, %v3457_v33  ;;  %v3459_v31 = vmul.f32 0.6931472, %v7658_v52 }
 0x2e4   : > { %v9845_v38 = vmul.f32 %v9137_v46, %v3457_v33  ;;  %v9848_v59 = vmul.f32 %v9140_v2, %v3457_v33  ;;  %v9850_v57 = vadd.f32 %v3528_v49, %v3510_v42  ;;  %v9852_v40 = vadd.f32 %v3648_v50, %v3630_v0  ;;  %v7539_v42 = vld [vmem:[%s11148_s7 + $0x160] ss:$8 sps:$4 sm:$0xff]  }
 0x2e5   : > { %11298 = vst [vmem:[#allocation116_spill] sm:$0xff] %v9842_v19  ;;  %v9854_v51 = vadd.f32 %v3768_v34, %v3750_v15  ;;  %v9856_v20 = vadd.f32 %v3888_v4, %v3870_v9  ;;  %4796 = vmatpush1.bf16.msra.mxu1 %v7536_v1  ;;  %v3463_v11 = vmul.f32 0.6931472, %v7660_v17  ;;  %v4201_v3 = vsel %vm4073_vm5, %v9748_v8, %v4137_v28  ;;  %v11305_v15 = vld [vmem:[#allocation45_spill] sm:$0xff]  ;;  %v11306_v9 = vld [vmem:[#allocation44_spill] sm:$0xff]  ;;  %v11307_v1 = vld [vmem:[#allocation38_spill] sm:$0xff] }
 0x2e6   : > { %11299 = vst [vmem:[#allocation117_spill] sm:$0xff] %v9845_v38  ;;  %11300 = vst [vmem:[#allocation118_spill] sm:$0xff] %v9848_v59  ;;  %v4205_v19 = vsel %vm4077_vm6, %v9751_v54, %v4141_v47  ;;  %4797 = vmatprep.subr.bf16.mxu1 %v7541_v53  ;;  %v3571_v49 = vadd.f32 %v11306_v9, %v11305_v15  ;;  %v3604_v52 = vadd.f32 %v11307_v1, %v9717_v7  ;;  %v11308_v17 = vld [vmem:[#allocation56_spill] sm:$0xff]  ;;  %v7544_v8 = vld [vmem:[%s11148_s7 + $0x174] ss:$8 sps:$4 sm:$0xff]   ;;  %v7662_v47 = vpop.eup %7661 }
 0x2e7   : > { %11301 = vst [vmem:[#allocation119_spill] sm:$0xff] %v9850_v57  ;;  %11302 = vst [vmem:[#allocation120_spill] sm:$0xff] %v9852_v40  ;;  %v4261_v0 = vpack.c.bf16 %v4205_v19, %v4201_v3  ;;  %v6926_v50 = vadd.f32 %v11308_v17, %v9035_v5  ;;  %v9877_v54 = vmul.f32 %v9143_v26, %v3457_v33  ;;  %v3461_v9 = vmul.f32 0.6931472, %v7662_v47  ;;  %v11314_v1 = vld [vmem:[#allocation54_spill] sm:$0xff] }
 0x2e8   : > { %11303 = vst [vmem:[#allocation121_spill] sm:$0xff] %v9854_v51  ;;  %11304 = vst [vmem:[#allocation122_spill] sm:$0xff] %v9856_v20  ;;  %v3511_v28 = vmul.f32 %v9092_v29, %v3459_v31  ;;  %v3631_v3 = vmul.f32 %v9096_v30, %v3459_v31  ;;  %v3751_v19 = vmul.f32 %v9099_v32, %v3459_v31  ;;  %v7664_v33 = vpop.eup %7663  ;;  %v11315_v51 = vld [vmem:[#allocation12_spill] sm:$0xff]  ;;  %v11317_v20 = vld [vmem:[#allocation23_spill] sm:$0xff] }
 0x2e9   : > { %11309 = vst [vmem:[#allocation45_spill] sm:$0xff] %v9877_v54  ;;  %v3871_v53 = vmul.f32 %v9102_v37, %v3459_v31  ;;  %v9884_v7 = vmul.f32 %v9105_v61, %v3463_v11  ;;  %v9887_v34 = vmul.f32 %v9108_v12, %v3463_v11  ;;  %v9890_v4 = vmul.f32 %v9113_v36, %v3463_v11  ;;  %v7542_v31 = vld [vmem:[%s11148_s7 + $0x170] ss:$8 sps:$4 sm:$0xff]  }
 0x2ea   : > { %4714 = vmatprep.mubr.bf16.mxu1 %v4261_v0  ;;  %v9893_v15 = vmul.f32 %v9116_v39, %v3463_v11  ;;  %v3605_v17 = vadd.f32 %v11314_v1, %v3571_v49  ;;  %7665 = vlog2.f32 %v6926_v50  ;;  %4798 = vmatpush1.bf16.msra.mxu1 %v7539_v42  ;;  %v9899_v59 = vmul.f32 0.6931472, %v7664_v33  ;;  %v7547_v49 = vld [vmem:[%s11148_s7 + $0x184] ss:$8 sps:$4 sm:$0xff]  }
 0x2eb   : > { %11310 = vst [vmem:[#allocation44_spill] sm:$0xff] %v9884_v7  ;;  %11311 = vst [vmem:[#allocation38_spill] sm:$0xff] %v9887_v34  ;;  %v4008_v54 = vadd.f32 %v11315_v51, %v3604_v52  ;;  %v6927_v11 = vadd.f32 %v11317_v20, %v9043_v48  ;;  %4799 = vmatprep.subr.bf16.mxu1 %v7544_v8  ;;  %v5050_v42 = vld [vmem:[%s11079_s11] sm:$0xff]  ;;  %v3529_v50 = vmul.f32 %v9120_v41, %v3461_v9  ;;  %v11321_v1 = vld [vmem:[#allocation24_spill] sm:$0xff] }
 0x2ec   : > { %11312 = vst [vmem:[#allocation56_spill] sm:$0xff] %v9890_v4  ;;  %11313 = vst [vmem:[#allocation123_spill] sm:$0xff] %v9893_v15  ;;  %v11316_v4 = vld [vmem:[#allocation57_spill] sm:$0xff]  ;;  %v3649_v47 = vmul.f32 %v9123_v44, %v3461_v9  ;;  %v3769_v52 = vmul.f32 %v9127_v63, %v3461_v9  ;;  %5068 = vperm.xlu0 %7147, %v5050_v42   ;;  %v9918_v20 = vmul.f32 %v9134_v45, %v9899_v59 }
 0x2ed   : > { %v6958_v0 = vadd.f32 %v11316_v4, %v9038_v25  ;;  %v3889_v4 = vmul.f32 %v9130_v56, %v3461_v9  ;;  %v9922_v8 = vmul.f32 %v9137_v46, %v9899_v59  ;;  %v9926_v33 = vmul.f32 %v9140_v2, %v9899_v59 }
 0x2ee   : > { %11318 = vst [vmem:[#allocation54_spill] sm:$0xff] %v9918_v20  ;;  %v6959_v15 = vadd.f32 %v11321_v1, %v9046_v22  ;;  %v9930_v38 = vadd.f32 %v3529_v50, %v3511_v28  ;;  %v9932_v7 = vadd.f32 %v3649_v47, %v3631_v3  ;;  %v9934_v9 = vadd.f32 %v3769_v52, %v3751_v19  ;;  %v7545_v20 = vld [vmem:[%s11148_s7 + $0x180] ss:$8 sps:$4 sm:$0xff]   ;;  %v7550_v28 = vld [vmem:[%s11148_s7 + $0x194] ss:$8 sps:$4 sm:$0xff]  }
 0x2ef   : > { %11319 = vst [vmem:[#allocation57_spill] sm:$0xff] %v9922_v8  ;;  %11320 = vst [vmem:[#allocation23_spill] sm:$0xff] %v9926_v33  ;;  %v9936_v42 = vadd.f32 %v3889_v4, %v3871_v53  ;;  %4800 = vmatpush1.bf16.msra.mxu1 %v7542_v31  ;;  %v4012_v8 = vadd.f32 %v11315_v51, %v3605_v17  ;;  %vm4072_vm7 = vcmp.ge.f32.partialorder %v4008_v54, 0.0  ;;  %v4136_v33 = vmul.f32 0.01, %v4008_v54  ;;  %v11326_v3 = vld [vmem:[#allocation58_spill] sm:$0xff] }
 0x2f0   : > { %11322 = vst [vmem:[#allocation24_spill] sm:$0xff] %v9930_v38  ;;  %11323 = vst [vmem:[#allocation124_spill] sm:$0xff] %v9932_v7  ;;  %7667 = vlog2.f32 %v6958_v0  ;;  %4801 = vmatprep.subr.bf16.mxu1 %v7547_v49  ;;  %v6928_v19 = vadd.f32 %v11326_v3, %v9035_v5  ;;  %v11327_v53 = vld [vmem:[#allocation59_spill] sm:$0xff]  ;;  %v11328_v50 = vld [vmem:[#allocation70_spill] sm:$0xff] }
 0x2f1   : > { %11324 = vst [vmem:[#allocation125_spill] sm:$0xff] %v9934_v9  ;;  %11325 = vst [vmem:[#allocation126_spill] sm:$0xff] %v9936_v42  ;;  %7669 = vlog2.f32 %v6927_v11  ;;  %v6960_v31 = vadd.f32 %v11327_v53, %v9038_v25  ;;  %v11329_v47 = vld [vmem:[#allocation18_spill] sm:$0xff]  ;;  %vm4076_vm8 = vcmp.ge.f32.partialorder %v4012_v8, 0.0  ;;  %v4140_v17 = vmul.f32 0.01, %v4012_v8 }
 0x2f2   : > { %v3692_v52 = vadd.f32 %v11329_v47, %v11328_v50  ;;  %v4200_v4 = vsel %vm4072_vm7, %v4008_v54, %v4136_v33  ;;  %7671 = vlog2.f32 %v6959_v15  ;;  %v11330_v0 = vld [vmem:[#allocation78_spill] sm:$0xff]  ;;  %v11332_v11 = vld [vmem:[#allocation16_spill] sm:$0xff]  ;;  %v11334_v15 = vld [vmem:[#allocation69_spill] sm:$0xff] }
 0x2f3   : > { %7673 = vlog2.f32 %v6928_v19  ;;  %v3693_v49 = vadd.f32 %v11330_v0, %v9551_v23  ;;  %v11331_v1 = vld [vmem:[#allocation66_spill] sm:$0xff]  ;;  %v6929_v42 = vadd.f32 %v11332_v11, %v9043_v48  ;;  %4802 = vmatpush1.bf16.msra.mxu1 %v7545_v20  ;;  %v5051_v3 = vld [vmem:[%s11079_s11 + $0x8] sm:$0xff]  ;;  %v4204_v53 = vsel %vm4076_vm8, %v4012_v8, %v4140_v17  ;;  %v5052_v20 = vld [vmem:[%s11079_s11 + $0x10] sm:$0xff] }
 0x2f4   : > { %v3726_v9 = vadd.f32 %v11331_v1, %v3692_v52  ;;  %7675 = vlog2.f32 %v6960_v31  ;;  %v11333_v50 = vld [vmem:[#allocation14_spill] sm:$0xff]  ;;  %v11335_v33 = vld [vmem:[#allocation20_spill] sm:$0xff]  ;;  %4803 = vmatprep.subr.bf16.mxu1 %v7550_v28  ;;  %5073 = vperm.xlu0 %7147, %v5051_v3   ;;  %v7666_v47 = vpop.eup %7665  ;;  %v4260_v52 = vpack.c.bf16 %v4204_v53, %v4200_v4  ;;  %v11336_v28 = vld [vmem:[#allocation77_spill] sm:$0xff]  ;;  %v9985_v53 = vmul.f32 %v9143_v26, %v9899_v59 }
 0x2f5   : > { %v6961_v54 = vadd.f32 %v11333_v50, %v9046_v22  ;;  %v3572_v19 = vadd.f32 %v11335_v33, %v11334_v15  ;;  %v7548_v23 = vld [vmem:[%s11148_s7 + $0x190] ss:$8 sps:$4 sm:$0xff]   ;;  %v3727_v8 = vadd.f32 %v9547_v35, %v3693_v49  ;;  %7677 = vlog2.f32 %v6929_v42  ;;  %v7553_v17 = vld [vmem:[%s11148_s7 + $0x1a4] ss:$8 sps:$4 sm:$0xff]   ;;  %5078 = vperm.xlu1 %7148, %v5052_v20   ;;  %v7551_v15 = vld [vmem:[%s11148_s7 + $0x1a0] ss:$8 sps:$4 sm:$0xff]  }
 0x2f6   : > { %v4017_v31 = vadd.f32 %v11226_v27, %v3726_v9  ;;  %v3467_v0 = vmul.f32 0.6931472, %v7666_v47  ;;  %v3573_v1 = vadd.f32 %v11336_v28, %v9549_v24  ;;  %v11337_v11 = vld [vmem:[#allocation65_spill] sm:$0xff]  ;;  %v5054_v4 = vld [vmem:[%s11079_s11 + $0x20] sm:$0xff]  ;;  %4715 = vmatmul.mubr.bf16.gmra.mrb[68].mxu1 %v4260_v52  ;;  %11339 = vst [vmem:[#allocation58_spill] sm:$0xff] %v9985_v53  ;;  %v11341_v28 = vld [vmem:[#allocation62_spill] sm:$0xff] }
 0x2f7   : > { %7679 = vlog2.f32 %v6961_v54  ;;  %v3606_v3 = vadd.f32 %v11337_v11, %v3572_v19  ;;  %v4021_v35 = vadd.f32 %v11226_v27, %v3727_v8  ;;  %v11338_v42 = vld [vmem:[#allocation61_spill] sm:$0xff]  ;;  %4804 = vmatpush1.bf16.msra.mxu1 %v7548_v23  ;;  %v10002_v11 = vadd.f32 %v11341_v28, %v9038_v25 }
 0x2f8   : > { %vm4081_vm9 = vcmp.ge.f32.partialorder %v4017_v31, 0.0  ;;  %v4145_v9 = vmul.f32 0.01, %v4017_v31  ;;  %v6930_v49 = vadd.f32 %v11338_v42, %v9035_v5  ;;  %v3512_v24 = vmul.f32 %v9092_v29, %v3467_v0  ;;  %v11340_v20 = vld [vmem:[#allocation81_spill] sm:$0xff]  ;;  %4805 = vmatprep.subr.bf16.mxu1 %v7553_v17  ;;  %5088 = vperm.xlu0 %7147, %v5054_v4  }
 0x2f9   : > { %v3632_v50 = vmul.f32 %v9096_v30, %v3467_v0  ;;  %v3752_v54 = vmul.f32 %v9099_v32, %v3467_v0  ;;  %v3872_v33 = vmul.f32 %v9102_v37, %v3467_v0  ;;  %vm4085_vm10 = vcmp.ge.f32.partialorder %v4021_v35, 0.0  ;;  %v7556_v59 = vld [vmem:[%s11148_s7 + $0x1b4] ss:$8 sps:$4 sm:$0xff]  }
 0x2fa   : > { %v4149_v19 = vmul.f32 0.01, %v4021_v35  ;;  %v3607_v47 = vadd.f32 %v11340_v20, %v3573_v1  ;;  %v7668_v52 = vpop.eup %7667  ;;  %v4209_v8 = vsel %vm4081_vm9, %v4017_v31, %v4145_v9  ;;  %v4016_v23 = vadd.f32 %v11315_v51, %v3606_v3  ;;  %v11342_v1 = vld [vmem:[#allocation63_spill] sm:$0xff]  ;;  %v5053_v31 = vld [vmem:[%s11079_s11 + $0x18] sm:$0xff] }
 0x2fb   : > { %7681 = vlog2.f32 %v6930_v49  ;;  %v7670_v0 = vpop.eup %7669  ;;  %v3471_v42 = vmul.f32 0.6931472, %v7668_v52  ;;  %v10009_v20 = vadd.f32 %v11342_v1, %v9043_v48  ;;  %v11343_v49 = vld [vmem:[#allocation64_spill] sm:$0xff]  ;;  %4806 = vmatpush1.bf16.msra.mxu1 %v7551_v15  ;;  %5083 = vperm.xlu1 %7148, %v5053_v31  }
 0x2fc   : > { %v4213_v53 = vsel %vm4085_vm10, %v4021_v35, %v4149_v19  ;;  %v10005_v17 = vadd.f32 %v11315_v51, %v3607_v47  ;;  %v7672_v3 = vpop.eup %7671  ;;  %v3469_v4 = vmul.f32 0.6931472, %v7670_v0  ;;  %vm4080_vm11 = vcmp.ge.f32.partialorder %v4016_v23, 0.0  ;;  %v7554_v35 = vld [vmem:[%s11148_s7 + $0x1b0] ss:$8 sps:$4 sm:$0xff]   ;;  %4807 = vmatprep.subr.bf16.mxu1 %v7556_v59 }
 0x2fd   : > { %v4265_v9 = vpack.c.bf16 %v4213_v53, %v4209_v8  ;;  %v10016_v28 = vadd.f32 %v11343_v49, %v9046_v22  ;;  %v5056_v19 = vld [vmem:[%s11079_s11 + $0x30] sm:$0xff]  ;;  %v7674_v47 = vpop.eup %7673  ;;  %v10025_v52 = vmul.f32 %v9105_v61, %v3471_v42  ;;  %v10028_v53 = vmul.f32 %v9108_v12, %v3471_v42  ;;  %v7559_v0 = vld [vmem:[%s11148_s7 + $0x1c4] ss:$8 sps:$4 sm:$0xff]  }
 0x2fe   : > { %v10031_v8 = vmul.f32 %v9113_v36, %v3471_v42  ;;  %v4144_v15 = vmul.f32 0.01, %v4016_v23  ;;  %v7676_v1 = vpop.eup %7675  ;;  %v3530_v31 = vmul.f32 %v9120_v41, %v3469_v4  ;;  %v3650_v49 = vmul.f32 %v9123_v44, %v3469_v4  ;;  %5098 = vperm.xlu0 %7147, %v5056_v19  }
 0x2ff   : > { %11344 = vst [vmem:[#allocation59_spill] sm:$0xff] %v10025_v52  ;;  %11345 = vst [vmem:[#allocation70_spill] sm:$0xff] %v10028_v53  ;;  %v3770_v38 = vmul.f32 %v9127_v63, %v3469_v4  ;;  %v3890_v52 = vmul.f32 %v9130_v56, %v3469_v4  ;;  %4724 = vmatprep.mubr.bf16.mxu1 %v4265_v9  ;;  %v7678_v53 = vpop.eup %7677  ;;  %v10044_v59 = vmul.f32 %v9116_v39, %v3471_v42  ;;  %v7557_v9 = vld [vmem:[%s11148_s7 + $0x1c0] ss:$8 sps:$4 sm:$0xff]  }
 0x300   : > { %11346 = vst [vmem:[#allocation18_spill] sm:$0xff] %v10031_v8  ;;  %v5055_v8 = vld [vmem:[%s11079_s11 + $0x28] sm:$0xff]  ;;  %v3473_v57 = vmul.f32 0.6931472, %v7672_v3  ;;  %v3475_v34 = vmul.f32 0.6931472, %v7674_v47  ;;  %v10046_v51 = vadd.f32 %v3530_v31, %v3512_v24  ;;  %v10048_v27 = vadd.f32 %v3650_v49, %v3632_v50  ;;  %4808 = vmatpush1.bf16.msra.mxu1 %v7554_v35 }
 0x301   : > { %11347 = vst [vmem:[#allocation78_spill] sm:$0xff] %v10044_v59  ;;  %v3479_v7 = vmul.f32 0.6931472, %v7676_v1  ;;  %v7680_v40 = vpop.eup %7679  ;;  %v10050_v21 = vadd.f32 %v3770_v38, %v3752_v54  ;;  %v10052_v4 = vadd.f32 %v3890_v52, %v3872_v33  ;;  %v5058_v42 = vld [vmem:[%s11079_s11 + $0x40] sm:$0xff]  ;;  %v10070_v50 = vsel %vm4080_vm11, %v4016_v23, %v4144_v15  ;;  %4809 = vmatprep.subr.bf16.mxu1 %v7559_v0  ;;  %v7562_v54 = vld [vmem:[%s11148_s7 + $0x1d4] ss:$8 sps:$4 sm:$0xff]  }
 0x302   : > { %v10061_v3 = vmul.f32 %v9134_v45, %v3473_v57  ;;  %v10064_v24 = vmul.f32 %v9137_v46, %v3473_v57  ;;  %v10067_v38 = vmul.f32 %v9140_v2, %v3473_v57  ;;  %v10076_v33 = vmul.f32 %v9143_v26, %v3473_v57  ;;  %5093 = vperm.xlu1 %7148, %v5055_v8   ;;  %v7560_v57 = vld [vmem:[%s11148_s7 + $0x1d0] ss:$8 sps:$4 sm:$0xff]   ;;  %v7565_v1 = vld [vmem:[%s11148_s7 + $0x1e4] ss:$8 sps:$4 sm:$0xff]  }
 0x303   : > { %11348 = vst [vmem:[#allocation66_spill] sm:$0xff] %v10050_v21  ;;  %11349 = vst [vmem:[#allocation16_spill] sm:$0xff] %v10052_v4  ;;  %v3513_v35 = vmul.f32 %v9092_v29, %v3475_v34  ;;  %v3633_v19 = vmul.f32 %v9096_v30, %v3475_v34  ;;  %v3753_v47 = vmul.f32 %v9099_v32, %v3475_v34  ;;  %5108 = vperm.xlu0 %7147, %v5058_v42  }
 0x304   : > { %11350 = vst [vmem:[#allocation14_spill] sm:$0xff] %v10067_v38  ;;  %11351 = vst [vmem:[#allocation69_spill] sm:$0xff] %v10076_v33  ;;  %v3873_v52 = vmul.f32 %v9102_v37, %v3475_v34  ;;  %v10083_v23 = vmul.f32 %v9105_v61, %v3479_v7  ;;  %v10086_v15 = vmul.f32 %v9108_v12, %v3479_v7  ;;  %v5057_v34 = vld [vmem:[%s11079_s11 + $0x38] sm:$0xff]  ;;  %v3477_v49 = vmul.f32 0.6931472, %v7678_v53 }
 0x305   : > { %v10089_v0 = vmul.f32 %v9113_v36, %v3479_v7  ;;  %v7682_v8 = vpop.eup %7681  ;;  %v10101_v31 = vmul.f32 %v9116_v39, %v3479_v7  ;;  %v3481_v38 = vmul.f32 0.6931472, %v7680_v40  ;;  %7683 = vlog2.f32 %v10002_v11  ;;  %4810 = vmatpush1.bf16.msra.mxu1 %v7557_v9 }
 0x306   : > { %vm4084_vm12 = vcmp.ge.f32.partialorder %v10005_v17, 0.0  ;;  %v4148_v42 = vmul.f32 0.01, %v10005_v17  ;;  %v10109_v33 = vmul.f32 0.6931472, %v7682_v8  ;;  %7685 = vlog2.f32 %v10009_v20  ;;  %4811 = vmatprep.subr.bf16.mxu1 %v7562_v54  ;;  %5103 = vperm.xlu1 %7148, %v5057_v34   ;;  %v11355_v20 = vld [vmem:[#allocation67_spill] sm:$0xff] }
 0x307   : > { %11352 = vst [vmem:[#allocation20_spill] sm:$0xff] %v10089_v0  ;;  %11353 = vst [vmem:[#allocation77_spill] sm:$0xff] %v10101_v31  ;;  %v5060_v0 = vld [vmem:[%s11079_s11 + $0x50] sm:$0xff]  ;;  %v3531_v7 = vmul.f32 %v9120_v41, %v3477_v49  ;;  %v3651_v40 = vmul.f32 %v9123_v44, %v3477_v49  ;;  %v3771_v11 = vmul.f32 %v9127_v63, %v3477_v49  ;;  %v5059_v31 = vld [vmem:[%s11079_s11 + $0x48] sm:$0xff]  ;;  %7687 = vlog2.f32 %v10016_v28 }
 0x308   : > { %v3891_v53 = vmul.f32 %v9130_v56, %v3477_v49  ;;  %v10117_v9 = vmul.f32 %v9134_v45, %v3481_v38  ;;  %v10120_v21 = vmul.f32 %v9137_v46, %v3481_v38  ;;  %v10123_v8 = vmul.f32 %v9140_v2, %v3481_v38  ;;  %5118 = vperm.xlu0 %7147, %v5060_v0   ;;  %v11358_v28 = vld [vmem:[#allocation74_spill] sm:$0xff] }
 0x309   : > { %v6932_v54 = vadd.f32 %v11355_v20, %v9035_v5  ;;  %v10130_v59 = vadd.f32 %v3531_v7, %v3513_v35  ;;  %v10132_v34 = vadd.f32 %v3651_v40, %v3633_v19  ;;  %v10134_v49 = vadd.f32 %v3771_v11, %v3753_v47  ;;  %4812 = vmatpush1.bf16.msra.mxu1 %v7560_v57  ;;  %v7563_v47 = vld [vmem:[%s11148_s7 + $0x1e0] ss:$8 sps:$4 sm:$0xff]   ;;  %v11359_v11 = vld [vmem:[#allocation86_spill] sm:$0xff] }
 0x30a   : > { %11354 = vst [vmem:[#allocation65_spill] sm:$0xff] %v10123_v8  ;;  %v10136_v4 = vadd.f32 %v3891_v53, %v3873_v52  ;;  %v5062_v8 = vld [vmem:[%s11079_s11 + $0x60] sm:$0xff]  ;;  %v10142_v5 = vmul.f32 %v9143_v26, %v3481_v38  ;;  %v4212_v0 = vsel %vm4084_vm12, %v10005_v17, %v4148_v42  ;;  %v10149_v35 = vmul.f32 %v9092_v29, %v10109_v33  ;;  %v11356_v17 = vld [vmem:[#allocation68_spill] sm:$0xff]  ;;  %v7568_v42 = vld [vmem:[%s11148_s7 + $0x1f4] ss:$8 sps:$4 sm:$0xff]  }
 0x30b   : > { %v10153_v19 = vmul.f32 %v9096_v30, %v10109_v33  ;;  %4813 = vmatprep.subr.bf16.mxu1 %v7565_v1  ;;  %v4264_v38 = vpack.c.bf16 %v4212_v0, %v10070_v50  ;;  %v3754_v52 = vmul.f32 %v9099_v32, %v10109_v33  ;;  %v6964_v57 = vadd.f32 %v11356_v17, %v9038_v25  ;;  %v11357_v1 = vld [vmem:[#allocation73_spill] sm:$0xff]  ;;  %v5061_v25 = vld [vmem:[%s11079_s11 + $0x58] sm:$0xff] }
 0x30c   : > { %5113 = vperm.xlu1 %7148, %v5059_v31   ;;  %7689 = vlog2.f32 %v6932_v54  ;;  %v3694_v7 = vadd.f32 %v9571_v13, %v9591_v6  ;;  %v3695_v50 = vadd.f32 %v9615_v16, %v9630_v58  ;;  %v6933_v40 = vadd.f32 %v11357_v1, %v9043_v48  ;;  %5128 = vperm.xlu0 %7147, %v5062_v8   ;;  %v11360_v6 = vld [vmem:[#allocation94_spill] sm:$0xff]  ;;  %v5064_v48 = vld [vmem:[%s11079_s11 + $0x70] sm:$0xff]  ;;  %v5063_v1 = vld [vmem:[%s11079_s11 + $0x68] sm:$0xff] }
 0x30d   : > { %4725 = vmatmul.mubr.bf16.gmra.mrb[72].mxu1 %v4264_v38  ;;  %7691 = vlog2.f32 %v6964_v57  ;;  %v6965_v31 = vadd.f32 %v11358_v28, %v9046_v22  ;;  %v3574_v53 = vadd.f32 %v11359_v11, %v9589_v62  ;;  %v3575_v13 = vadd.f32 %v11360_v6, %v9628_v55  ;;  %v11361_v58 = vld [vmem:[#allocation90_spill] sm:$0xff]  ;;  %v11362_v55 = vld [vmem:[#allocation89_spill] sm:$0xff] }
 0x30e   : > { %v3728_v16 = vadd.f32 %v11361_v58, %v3694_v7  ;;  %v3729_v8 = vadd.f32 %v9643_v18, %v3695_v50  ;;  %7693 = vlog2.f32 %v6933_v40  ;;  %v3696_v20 = vadd.f32 %v9693_v10, %v9732_v60  ;;  %4814 = vmatpush1.bf16.msra.mxu1 %v7563_v47  ;;  %v7566_v22 = vld [vmem:[%s11148_s7 + $0x1f0] ss:$8 sps:$4 sm:$0xff]  }
 0x30f   : > { %v7684_v62 = vpop.eup %7683  ;;  %7695 = vlog2.f32 %v6965_v31  ;;  %v3608_v54 = vadd.f32 %v11362_v55, %v3574_v53  ;;  %v3609_v0 = vadd.f32 %v9640_v43, %v3575_v13  ;;  %v11363_v38 = vld [vmem:[#allocation102_spill] sm:$0xff]  ;;  %4815 = vmatprep.subr.bf16.mxu1 %v7568_v42  ;;  %v11364_v7 = vld [vmem:[#allocation13_spill] sm:$0xff]  ;;  %v3874_v43 = vmul.f32 %v9102_v37, %v10109_v33  ;;  %v5505_v31 = vld [vmem:[%s11083_s15] sm:$0xff] }
 0x310   : > { %v3697_v17 = vadd.f32 %v11363_v38, %v9801_v14  ;;  %5123 = vperm.xlu1 %7148, %v5061_v25   ;;  %v7686_v18 = vpop.eup %7685  ;;  %v3487_v57 = vmul.f32 0.6931472, %v7684_v62  ;;  %v4025_v60 = vadd.f32 %v11364_v7, %v3728_v16  ;;  %v4029_v10 = vadd.f32 %v11364_v7, %v3729_v8  ;;  %v11365_v47 = vld [vmem:[#allocation37_spill] sm:$0xff]  ;;  %5138 = vperm.xlu0 %7147, %v5064_v48   ;;  %v11366_v14 = vld [vmem:[#allocation12_spill] sm:$0xff]  ;;  %v11367_v25 = vld [vmem:[#allocation106_spill] sm:$0xff] }
 0x311   : > { %v3730_v50 = vadd.f32 %v11365_v47, %v3696_v20  ;;  %v3485_v40 = vmul.f32 0.6931472, %v7686_v18  ;;  %v4024_v42 = vadd.f32 %v11366_v14, %v3608_v54  ;;  %v10219_v33 = vadd.f32 %v11366_v14, %v3609_v0  ;;  %v5065_v8 = vld [vmem:[%s11079_s11 + $0x78] sm:$0xff]  ;;  %v7688_v55 = vpop.eup %7687 }
 0x312   : > { %v3731_v28 = vadd.f32 %v11367_v25, %v3697_v17  ;;  %v10210_v11 = vmul.f32 %v9105_v61, %v3487_v57  ;;  %v10213_v53 = vmul.f32 %v9108_v12, %v3487_v57  ;;  %v10216_v6 = vmul.f32 %v9113_v36, %v3487_v57  ;;  %4816 = vmatpush1.bf16.msra.mxu1 %v7566_v22  ;;  %v5506_v17 = vld [vmem:[%s11083_s15 + $0x8] sm:$0xff] }
 0x313   : > { %v3532_v13 = vmul.f32 %v9120_v41, %v3485_v40  ;;  %v3652_v48 = vmul.f32 %v9123_v44, %v3485_v40  ;;  %v3772_v58 = vmul.f32 %v9127_v63, %v3485_v40  ;;  %v3892_v16 = vmul.f32 %v9130_v56, %v3485_v40 }
 0x314   : > { %5133 = vperm.xlu1 %7148, %v5063_v1   ;;  %vm4089_vm13 = vcmp.ge.f32.partialorder %v4025_v60, 0.0  ;;  %vm4093_vm14 = vcmp.ge.f32.partialorder %v4029_v10, 0.0  ;;  %v4153_v20 = vmul.f32 0.01, %v4025_v60  ;;  %v4157_v62 = vmul.f32 0.01, %v4029_v10  ;;  %5513 = vperm.xlu0 %7147, %v5505_v31  }
 0x315   : > { %v10229_v22 = vadd.f32 %v3532_v13, %v10149_v35  ;;  %v10232_v54 = vadd.f32 %v3652_v48, %v10153_v19  ;;  %v10234_v0 = vadd.f32 %v3772_v58, %v3754_v52  ;;  %v10236_v38 = vadd.f32 %v3892_v16, %v3874_v43 }
 0x316   : > { %v7690_v18 = vpop.eup %7689  ;;  %v10242_v47 = vmul.f32 %v9116_v39, %v3487_v57  ;;  %v3489_v1 = vmul.f32 0.6931472, %v7688_v55  ;;  %v4217_v40 = vsel %vm4089_vm13, %v4025_v60, %v4153_v20  ;;  %v4221_v25 = vsel %vm4093_vm14, %v4029_v10, %v4157_v62  ;;  %v5553_v57 = vld [vmem:[%s11084_s16] sm:$0xff]  ;;  %v5507_v62 = vld [vmem:[%s11083_s15 + $0x10] sm:$0xff] }
 0x317   : > { %v7692_v35 = vpop.eup %7691  ;;  %v3491_v31 = vmul.f32 0.6931472, %v7690_v18  ;;  %v4269_v13 = vpack.c.bf16 %v4221_v25, %v4217_v40  ;;  %vm4088_vm15 = vcmp.ge.f32.partialorder %v4024_v42, 0.0  ;;  %v4152_v19 = vmul.f32 0.01, %v4024_v42 }
 0x318   : > { %5143 = vperm.xlu1 %7148, %v5065_v8   ;;  %v7694_v52 = vpop.eup %7693  ;;  %v10245_v43 = vmul.f32 %v9134_v45, %v3489_v1  ;;  %v10248_v48 = vmul.f32 %v9137_v46, %v3489_v1  ;;  %v10251_v58 = vmul.f32 %v9140_v2, %v3489_v1  ;;  %vm4092_vm0 = vcmp.ge.f32.partialorder %v10219_v33, 0.0  ;;  %5518 = vperm.xlu0 %7147, %v5506_v17  }
 0x319   : > { %v7696_v60 = vpop.eup %7695  ;;  %v10258_v10 = vmul.f32 %v9143_v26, %v3489_v1  ;;  %v3515_v16 = vmul.f32 %v9092_v29, %v3491_v31  ;;  %v3635_v8 = vmul.f32 %v9096_v30, %v3491_v31  ;;  %v3755_v20 = vmul.f32 %v9099_v32, %v3491_v31  ;;  %4734 = vmatprep.mubr.bf16.mxu1 %v4269_v13  ;;  %v11369_v30 = vld [vmem:[#allocation51_spill] sm:$0xff] }
 0x31a   : > { %11368 = vst [vmem:[#allocation61_spill] sm:$0xff] %v10251_v58  ;;  %v3875_v55 = vmul.f32 %v9102_v37, %v3491_v31  ;;  %v3495_v17 = vmul.f32 0.6931472, %v7692_v35  ;;  %v3493_v18 = vmul.f32 0.6931472, %v7694_v52  ;;  %v4216_v25 = vsel %vm4088_vm15, %v4024_v42, %v4152_v19  ;;  %v11370_v58 = vld [vmem:[#allocation100_spill] sm:$0xff] }
 0x31b   : > { %v10267_v40 = vmul.f32 0.6931472, %v7696_v60  ;;  %v4156_v1 = vmul.f32 0.01, %v10219_v33  ;;  %v4033_v29 = vadd.f32 %v11364_v7, %v3730_v50  ;;  %v3576_v32 = vadd.f32 %v11370_v58, %v11369_v30  ;;  %v5554_v50 = vld [vmem:[%s11084_s16 + $0x8] sm:$0xff]  ;;  %v11372_v60 = vld [vmem:[#allocation50_spill] sm:$0xff] }
 0x31c   : > { %5561 = vperm.xlu1 %7148, %v5553_v57   ;;  %v10275_v13 = vmul.f32 %v9105_v61, %v3495_v17  ;;  %v10278_v2 = vmul.f32 %v9108_v12, %v3495_v17  ;;  %v10281_v37 = vmul.f32 %v9113_v36, %v3495_v17  ;;  %v4037_v35 = vadd.f32 %v11364_v7, %v3731_v28  ;;  %v5508_v12 = vld [vmem:[%s11083_s15 + $0x18] sm:$0xff]  ;;  %v11371_v57 = vld [vmem:[#allocation108_spill] sm:$0xff] }
 0x31d   : > { %5523 = vperm.xlu0 %7147, %v5507_v62   ;;  %v3533_v42 = vmul.f32 %v9120_v41, %v3493_v18  ;;  %v3653_v31 = vmul.f32 %v9123_v44, %v3493_v18  ;;  %v3773_v61 = vmul.f32 %v9127_v63, %v3493_v18  ;;  %v3893_v19 = vmul.f32 %v9130_v56, %v3493_v18  ;;  %v11375_v18 = vld [vmem:[#allocation113_spill] sm:$0xff] }
 0x31e   : > { %v10295_v36 = vmul.f32 %v9116_v39, %v3495_v17  ;;  %v10299_v28 = vmul.f32 %v9134_v45, %v10267_v40  ;;  %v10303_v41 = vmul.f32 %v9137_v46, %v10267_v40  ;;  %v10307_v44 = vmul.f32 %v9143_v26, %v10267_v40  ;;  %v11374_v17 = vld [vmem:[#allocation120_spill] sm:$0xff] }
 0x31f   : > { %v10309_v63 = vadd.f32 %v3533_v42, %v3515_v16  ;;  %v10311_v56 = vadd.f32 %v3653_v31, %v3635_v8  ;;  %v10313_v52 = vadd.f32 %v3773_v61, %v3755_v20  ;;  %v10315_v39 = vadd.f32 %v3893_v19, %v3875_v55  ;;  %v11373_v8 = vld [vmem:[#allocation21_spill] sm:$0xff]  ;;  %v11378_v42 = vld [vmem:[#allocation119_spill] sm:$0xff]  ;;  %v11379_v31 = vld [vmem:[#allocation112_spill] sm:$0xff] }
 0x320   : > { %5566 = vperm.xlu1 %7148, %v5554_v50   ;;  %v4220_v45 = vsel %vm4092_vm0, %v10219_v33, %v4156_v1  ;;  %vm4097_vm1 = vcmp.ge.f32.partialorder %v4033_v29, 0.0  ;;  %vm4101_vm2 = vcmp.ge.f32.partialorder %v4037_v35, 0.0  ;;  %v4161_v46 = vmul.f32 0.01, %v4033_v29  ;;  %v5555_v20 = vld [vmem:[%s11084_s16 + $0x10] sm:$0xff]  ;;  %v11376_v33 = vld [vmem:[#allocation124_spill] sm:$0xff] }
 0x321   : > { %5528 = vperm.xlu0 %7147, %v5508_v12   ;;  %v4268_v58 = vpack.c.bf16 %v4220_v45, %v4216_v25  ;;  %v4165_v26 = vmul.f32 0.01, %v4037_v35  ;;  %v3577_v16 = vadd.f32 %v11372_v60, %v11371_v57  ;;  %v3610_v62 = vadd.f32 %v11373_v8, %v3576_v32  ;;  %v11377_v1 = vld [vmem:[#allocation38_spill] sm:$0xff]  ;;  %v5509_v61 = vld [vmem:[%s11083_s15 + $0x20] sm:$0xff]  ;;  %v11380_v19 = vld [vmem:[#allocation105_spill] sm:$0xff] }
 0x322   : > { %v4225_v55 = vsel %vm4097_vm1, %v4033_v29, %v4161_v46  ;;  %v3698_v30 = vadd.f32 %v11375_v18, %v11374_v17  ;;  %v3699_v50 = vadd.f32 %v11377_v1, %v11376_v33  ;;  %v3578_v25 = vadd.f32 %v11379_v31, %v11378_v42  ;;  %v11381_v29 = vld [vmem:[#allocation24_spill] sm:$0xff]  ;;  %v11383_v8 = vld [vmem:[#allocation117_spill] sm:$0xff] }
 0x323   : > { %4735 = vmatmul.mubr.bf16.gmra.mrb[76].mxu1 %v4268_v58  ;;  %v4229_v32 = vsel %vm4101_vm2, %v4037_v35, %v4165_v26  ;;  %v3611_v12 = vadd.f32 %v11380_v19, %v3577_v16  ;;  %v4032_v45 = vadd.f32 %v11366_v14, %v3610_v62  ;;  %v11382_v46 = vld [vmem:[#allocation44_spill] sm:$0xff]  ;;  %v11384_v18 = vld [vmem:[#allocation57_spill] sm:$0xff]  ;;  %v11386_v35 = vld [vmem:[#allocation54_spill] sm:$0xff] }
 0x324   : > { %v3579_v57 = vadd.f32 %v11382_v46, %v11381_v29  ;;  %v4273_v60 = vpack.c.bf16 %v4229_v32, %v4225_v55  ;;  %v3732_v17 = vadd.f32 %v11383_v8, %v3698_v30  ;;  %v3733_v33 = vadd.f32 %v11384_v18, %v3699_v50  ;;  %v11385_v1 = vld [vmem:[#allocation116_spill] sm:$0xff]  ;;  %5571 = vperm.xlu1 %7148, %v5555_v20   ;;  %v5556_v16 = vld [vmem:[%s11084_s16 + $0x18] sm:$0xff] }
 0x325   : > { %v3612_v42 = vadd.f32 %v11385_v1, %v3578_v25  ;;  %v4036_v31 = vadd.f32 %v11366_v14, %v3611_v12  ;;  %vm4096_vm3 = vcmp.ge.f32.partialorder %v4032_v45, 0.0  ;;  %v4160_v58 = vmul.f32 0.01, %v4032_v45  ;;  %5533 = vperm.xlu0 %7147, %v5509_v61   ;;  %v11387_v20 = vld [vmem:[#allocation70_spill] sm:$0xff]  ;;  %v5510_v25 = vld [vmem:[%s11083_s15 + $0x28] sm:$0xff] }
 0x326   : > { %v3613_v26 = vadd.f32 %v11386_v35, %v3579_v57  ;;  %4744 = vmatprep.mubr.bf16.mxu1 %v4273_v60  ;;  %v4041_v62 = vadd.f32 %v11364_v7, %v3732_v17  ;;  %v4045_v55 = vadd.f32 %v11364_v7, %v3733_v33  ;;  %v3700_v50 = vadd.f32 %v11387_v20, %v10048_v27 }
 0x327   : > { %v4040_v30 = vadd.f32 %v11366_v14, %v3612_v42  ;;  %vm4100_vm4 = vcmp.ge.f32.partialorder %v4036_v31, 0.0  ;;  %v4164_v61 = vmul.f32 0.01, %v4036_v31  ;;  %v4224_v32 = vsel %vm4096_vm3, %v4032_v45, %v4160_v58  ;;  %v5557_v42 = vld [vmem:[%s11084_s16 + $0x20] sm:$0xff] }
 0x328   : > { %v4044_v19 = vadd.f32 %v11366_v14, %v3613_v26  ;;  %vm4105_vm5 = vcmp.ge.f32.partialorder %v4041_v62, 0.0  ;;  %vm4109_vm6 = vcmp.ge.f32.partialorder %v4045_v55, 0.0  ;;  %v4169_v12 = vmul.f32 0.01, %v4041_v62  ;;  %5576 = vperm.xlu1 %7148, %v5556_v16   ;;  %v11388_v58 = vld [vmem:[#allocation59_spill] sm:$0xff] }
 0x329   : > { %v4173_v29 = vmul.f32 0.01, %v4045_v55  ;;  %v4228_v46 = vsel %vm4100_vm4, %v4036_v31, %v4164_v61  ;;  %vm4104_vm7 = vcmp.ge.f32.partialorder %v4040_v30, 0.0  ;;  %v4168_v57 = vmul.f32 0.01, %v4040_v30  ;;  %5538 = vperm.xlu0 %7147, %v5510_v25  }
 0x32a   : > { %vm4108_vm8 = vcmp.ge.f32.partialorder %v4044_v19, 0.0  ;;  %v4272_v27 = vpack.c.bf16 %v4228_v46, %v4224_v32  ;;  %v4233_v60 = vsel %vm4105_vm5, %v4041_v62, %v4169_v12  ;;  %v4172_v17 = vmul.f32 0.01, %v4044_v19 }
 0x32b   : > { %v4237_v8 = vsel %vm4109_vm6, %v4045_v55, %v4173_v29  ;;  %v4232_v33 = vsel %vm4104_vm7, %v4040_v30, %v4168_v57  ;;  %v3701_v45 = vadd.f32 %v10086_v15, %v10132_v34  ;;  %v3734_v1 = vadd.f32 %v10064_v24, %v3700_v50  ;;  %v11389_v57 = vld [vmem:[#allocation17_spill] sm:$0xff] }
 0x32c   : > { %v4277_v18 = vpack.c.bf16 %v4237_v8, %v4233_v60  ;;  %4745 = vmatmul.mubr.bf16.gmra.mrb[80].mxu1 %v4272_v27  ;;  %v4236_v31 = vsel %vm4108_vm8, %v4044_v19, %v4172_v17  ;;  %v3580_v35 = vadd.f32 %v11388_v58, %v10046_v51  ;;  %v3581_v26 = vadd.f32 %v10083_v23, %v10130_v59  ;;  %v11390_v27 = vld [vmem:[#allocation15_spill] sm:$0xff]  ;;  %v11392_v17 = vld [vmem:[#allocation26_spill] sm:$0xff] }
 0x32d   : > { %v3702_v16 = vadd.f32 %v10213_v53, %v10232_v54  ;;  %v4276_v62 = vpack.c.bf16 %v4236_v31, %v4232_v33  ;;  %v3735_v15 = vadd.f32 %v10120_v21, %v3701_v45  ;;  %v4049_v24 = vadd.f32 %v11364_v7, %v3734_v1  ;;  %5581 = vperm.xlu1 %7148, %v5557_v42   ;;  %v11391_v8 = vld [vmem:[#allocation27_spill] sm:$0xff]  ;;  %v11393_v45 = vld [vmem:[#allocation9_spill] sm:$0xff]  ;;  %v11394_v31 = vld [vmem:[#allocation28_spill] sm:$0xff] }
 0x32e   : > { %4754 = vmatprep.mubr.bf16.mxu1 %v4277_v18  ;;  %v3703_v34 = vadd.f32 %v10278_v2, %v10311_v56  ;;  %v3614_v55 = vadd.f32 %v10061_v3, %v3580_v35  ;;  %v3615_v30 = vadd.f32 %v10117_v9, %v3581_v26  ;;  %v3582_v59 = vadd.f32 %v10210_v11, %v10229_v22  ;;  %v5558_v2 = vld [vmem:[%s11084_s16 + $0x28] sm:$0xff]  ;;  %v7711_v33 = vld [vmem:[%s11150_s26] sm:$0xf]  ;;  %v11396_v26 = vld [vmem:[#allocation30_spill] sm:$0xff] }
 0x32f   : > { %v3736_v51 = vadd.f32 %v10248_v48, %v3702_v16  ;;  %v4053_v23 = vadd.f32 %v11364_v7, %v3735_v15  ;;  %vm4113_vm9 = vcmp.ge.f32.partialorder %v4049_v24, 0.0  ;;  %v4177_v53 = vmul.f32 0.01, %v4049_v24  ;;  %v11395_v58 = vld [vmem:[#allocation19_spill] sm:$0xff] }
 0x330   : > { %v3737_v21 = vadd.f32 %v10303_v41, %v3703_v34  ;;  %v4048_v3 = vadd.f32 %v11366_v14, %v3614_v55  ;;  %v4052_v9 = vadd.f32 %v11366_v14, %v3615_v30  ;;  %v3583_v11 = vadd.f32 %v10275_v13, %v10309_v63 }
 0x331   : > { %v4057_v54 = vadd.f32 %v11364_v7, %v3736_v51  ;;  %vm4117_vm10 = vcmp.ge.f32.partialorder %v4053_v23, 0.0  ;;  %v4181_v22 = vmul.f32 0.01, %v4053_v23  ;;  %v4241_v48 = vsel %vm4113_vm9, %v4049_v24, %v4177_v53  ;;  %5586 = vperm.xlu1 %7148, %v5558_v2   ;;  %v11398_v53 = vld [vmem:[#allocation40_spill] sm:$0xff] }
 0x332   : > { %v4061_v56 = vadd.f32 %v11364_v7, %v3737_v21  ;;  %vm4112_vm11 = vcmp.ge.f32.partialorder %v4048_v3, 0.0  ;;  %vm4116_vm12 = vcmp.ge.f32.partialorder %v4052_v9, 0.0  ;;  %v4176_v41 = vmul.f32 0.01, %v4048_v3  ;;  %v11399_v21 = vld [vmem:[#allocation34_spill] sm:$0xff] }
 0x333   : > { %v4180_v20 = vmul.f32 0.01, %v4052_v9  ;;  %v4245_v50 = vsel %vm4117_vm10, %v4053_v23, %v4181_v22  ;;  %vm4121_vm13 = vcmp.ge.f32.partialorder %v4057_v54, 0.0  ;;  %v4185_v25 = vmul.f32 0.01, %v4057_v54 }
 0x334   : > { %vm4125_vm14 = vcmp.ge.f32.partialorder %v4061_v56, 0.0  ;;  %4755 = vmatmul.mubr.bf16.gmra.mrb[84].mxu1 %v4276_v62  ;;  %v4281_v61 = vpack.c.bf16 %v4245_v50, %v4241_v48  ;;  %v4240_v32 = vsel %vm4112_vm11, %v4048_v3, %v4176_v41  ;;  %v4189_v12 = vmul.f32 0.01, %v4061_v56  ;;  %v11397_v62 = vld [vmem:[#allocation36_spill] sm:$0xff]  ;;  %v11402_v41 = vld [vmem:[#allocation43_spill] sm:$0xff] }
 0x335   : > { %v4244_v19 = vsel %vm4116_vm12, %v4052_v9, %v4180_v20  ;;  %v4249_v63 = vsel %vm4121_vm13, %v4057_v54, %v4185_v25  ;;  %v3616_v29 = vadd.f32 %v10245_v43, %v3582_v59  ;;  %v3617_v7 = vadd.f32 %v10299_v28, %v3583_v11  ;;  %v11400_v3 = vld [vmem:[#allocation48_spill] sm:$0xff]  ;;  %v11401_v9 = vld [vmem:[#allocation53_spill] sm:$0xff]  ;;  %v11403_v50 = vld [vmem:[#allocation55_spill] sm:$0xff] }
 0x336   : > { %v4280_v13 = vpack.c.bf16 %v4244_v19, %v4240_v32  ;;  %4764 = vmatprep.mubr.bf16.mxu1 %v4281_v61  ;;  %v4253_v46 = vsel %vm4125_vm14, %v4061_v56, %v4189_v12  ;;  %v3928_v60 = vadd.f32 %v11390_v27, %v11389_v57  ;;  %v3929_v18 = vadd.f32 %v11392_v17, %v11391_v8  ;;  %v11404_v19 = vld [vmem:[#allocation39_spill] sm:$0xff]  ;;  %v11405_v12 = vld [vmem:[#allocation33_spill] sm:$0xff]  ;;  %v11409_v8 = vld [vmem:[#allocation60_spill] sm:$0xff] }
 0x337   : > { %v10398_v1 = vrot.slane %v7711_v33, %v11393_v45  ;;  %v4285_v42 = vpack.c.bf16 %v4253_v46, %v4249_v63  ;;  %v4056_v43 = vadd.f32 %v11366_v14, %v3616_v29  ;;  %v4060_v28 = vadd.f32 %v11366_v14, %v3617_v7  ;;  %v11406_v63 = vld [vmem:[#allocation47_spill] sm:$0xff]  ;;  %v11407_v29 = vld [vmem:[#allocation52_spill] sm:$0xff]  ;;  %v11410_v33 = vld [vmem:[#allocation42_spill] sm:$0xff] }
 0x338   : > { %vm4066_vm15 = vcmp.ge.f32.partialorder %v11394_v31, 0.0  ;;  %v3962_v35 = vadd.f32 %v11395_v58, %v3928_v60  ;;  %v3963_v16 = vadd.f32 %v11396_v26, %v3929_v18  ;;  %vm4070_vm0 = vcmp.ge.f32.partialorder %v11397_v62, 0.0  ;;  %v11408_v60 = vld [vmem:[#allocation72_spill] sm:$0xff] }
 0x339   : > { %v4130_v15 = vmul.f32 0.01, %v11394_v31  ;;  %vm4120_vm1 = vcmp.ge.f32.partialorder %v4056_v43, 0.0  ;;  %vm4124_vm2 = vcmp.ge.f32.partialorder %v4060_v28, 0.0  ;;  %v4184_v24 = vmul.f32 0.01, %v4056_v43 }
 0x33a   : > { %v4188_v34 = vmul.f32 0.01, %v4060_v28  ;;  %v4003_v55 = vadd.f32 %v10398_v1, %v3962_v35  ;;  %v4007_v30 = vadd.f32 %v10398_v1, %v3963_v16  ;;  %v4134_v14 = vmul.f32 0.01, %v11397_v62  ;;  %v11414_v16 = vld [vmem:[#allocation10_spill] sm:$0xff] }
 0x33b   : > { %v10411_v51 = vsel %vm4066_vm15, %v11394_v31, %v4130_v15  ;;  %v4248_v59 = vsel %vm4120_vm1, %v4056_v43, %v4184_v24  ;;  %v3930_v2 = vadd.f32 %v11399_v21, %v11398_v53  ;;  %v3931_v54 = vadd.f32 %v11401_v9, %v11400_v3  ;;  %v11413_v31 = vld [vmem:[#allocation80_spill] sm:$0xff]  ;;  %v11419_v21 = vld [vmem:[#allocation82_spill] sm:$0xff] }
 0x33c   : > { %v4252_v23 = vsel %vm4124_vm2, %v4060_v28, %v4188_v34  ;;  %4765 = vmatmul.mubr.bf16.gmra.mrb[88].mxu1 %v4280_v13  ;;  %vm4067_vm3 = vcmp.ge.f32.partialorder %v4003_v55, 0.0  ;;  %vm4071_vm4 = vcmp.ge.f32.partialorder %v4007_v30, 0.0  ;;  %v4131_v22 = vmul.f32 0.01, %v4003_v55  ;;  %v11412_v28 = vld [vmem:[#allocation83_spill] sm:$0xff]  ;;  %v11415_v24 = vld [vmem:[#allocation76_spill] sm:$0xff] }
 0x33d   : > { %v4284_v11 = vpack.c.bf16 %v4252_v23, %v4248_v59  ;;  %4774 = vmatprep.mubr.bf16.mxu1 %v4285_v42  ;;  %v4135_v48 = vmul.f32 0.01, %v4007_v30  ;;  %v4198_v56 = vsel %vm4070_vm0, %v11397_v62, %v4134_v14  ;;  %v3964_v20 = vadd.f32 %v11402_v41, %v3930_v2  ;;  %v11411_v42 = vld [vmem:[#allocation22_spill] sm:$0xff]  ;;  %v11417_v59 = vld [vmem:[#allocation71_spill] sm:$0xff]  ;;  %v11418_v23 = vld [vmem:[#allocation29_spill] sm:$0xff] }
 0x33e   : > { %v3965_v25 = vadd.f32 %v11403_v50, %v3931_v54  ;;  %v4195_v61 = vsel %vm4067_vm3, %v4003_v55, %v4131_v22  ;;  %v4258_v32 = vpack.c.bf16 %v4198_v56, %v10411_v51  ;;  %v3810_v13 = vadd.f32 %v11405_v12, %v11404_v19  ;;  %v11416_v55 = vld [vmem:[#allocation85_spill] sm:$0xff]  ;;  %v11420_v2 = vld [vmem:[#allocation79_spill] sm:$0xff]  ;;  %v11423_v19 = vld [vmem:[#allocation92_spill] sm:$0xff] }
 0x33f   : > { %v3811_v7 = vadd.f32 %v11407_v29, %v11406_v63  ;;  %v4199_v46 = vsel %vm4071_vm4, %v4007_v30, %v4135_v48  ;;  %v4011_v57 = vadd.f32 %v10398_v1, %v3964_v20  ;;  %v3932_v17 = vadd.f32 %v11409_v8, %v11408_v60  ;;  %v11421_v41 = vld [vmem:[#allocation75_spill] sm:$0xff]  ;;  %v11424_v12 = vld [vmem:[#allocation88_spill] sm:$0xff]  ;;  %v11425_v63 = vld [vmem:[#allocation97_spill] sm:$0xff] }
 0x340   : > { %v4015_v27 = vadd.f32 %v10398_v1, %v3965_v25  ;;  %v4259_v18 = vpack.c.bf16 %v4199_v46, %v4195_v61  ;;  %v3844_v45 = vadd.f32 %v11410_v33, %v3810_v13  ;;  %v3933_v58 = vadd.f32 %v11413_v31, %v11412_v28  ;;  %v11422_v25 = vld [vmem:[#allocation84_spill] sm:$0xff]  ;;  %v11430_v28 = vld [vmem:[#allocation87_spill] sm:$0xff] }
 0x341   : > { %v3845_v43 = vadd.f32 %v11411_v42, %v3811_v7  ;;  %vm4075_vm5 = vcmp.ge.f32.partialorder %v4011_v57, 0.0  ;;  %v4139_v35 = vmul.f32 0.01, %v4011_v57  ;;  %v3966_v34 = vadd.f32 %v11415_v24, %v3932_v17 }
 0x342   : > { %vm4079_vm6 = vcmp.ge.f32.partialorder %v4015_v27, 0.0  ;;  %v4143_v26 = vmul.f32 0.01, %v4015_v27  ;;  %v4010_v62 = vadd.f32 %v11414_v16, %v3844_v45  ;;  %v3967_v30 = vadd.f32 %v11416_v55, %v3933_v58  ;;  %v11428_v45 = vld [vmem:[#allocation99_spill] sm:$0xff]  ;;  %v11431_v55 = vld [vmem:[#allocation96_spill] sm:$0xff] }
 0x343   : > { %v4014_v15 = vadd.f32 %v11414_v16, %v3845_v43  ;;  %v4203_v14 = vsel %vm4075_vm5, %v4011_v57, %v4139_v35  ;;  %v3812_v53 = vadd.f32 %v11418_v23, %v11417_v59  ;;  %v3813_v3 = vadd.f32 %v11420_v2, %v11419_v21  ;;  %v11429_v43 = vld [vmem:[#allocation91_spill] sm:$0xff]  ;;  %v11434_v23 = vld [vmem:[#allocation41_spill] sm:$0xff] }
 0x344   : > { %v4207_v51 = vsel %vm4079_vm6, %v4015_v27, %v4143_v26  ;;  %4775 = vmatmul.mubr.bf16.gmra.mrb[92].mxu1 %v4284_v11  ;;  %vm4074_vm7 = vcmp.ge.f32.partialorder %v4010_v62, 0.0  ;;  %v4138_v54 = vmul.f32 0.01, %v4010_v62  ;;  %v4019_v48 = vadd.f32 %v10398_v1, %v3966_v34  ;;  %v11426_v11 = vld [vmem:[#allocation98_spill] sm:$0xff] }
 0x345   : > { %v4263_v9 = vpack.c.bf16 %v4207_v51, %v4203_v14  ;;  %vm4078_vm8 = vcmp.ge.f32.partialorder %v4014_v15, 0.0  ;;  %4817 = vmatprep.mubr.bf16.mxu1 %v4259_v18  ;;  %v4142_v22 = vmul.f32 0.01, %v4014_v15  ;;  %v4023_v56 = vadd.f32 %v10398_v1, %v3967_v30  ;;  %v11427_v18 = vld [vmem:[#allocation93_spill] sm:$0xff]  ;;  %v11432_v30 = vld [vmem:[#allocation95_spill] sm:$0xff] }
 0x346   : > { %v3846_v20 = vadd.f32 %v11421_v41, %v3812_v53  ;;  %v4202_v50 = vsel %vm4074_vm7, %v4010_v62, %v4138_v54  ;;  %v3847_v61 = vadd.f32 %v11422_v25, %v3813_v3  ;;  %v3934_v13 = vadd.f32 %v11424_v12, %v11423_v19  ;;  %v11433_v51 = vld [vmem:[#allocation25_spill] sm:$0xff]  ;;  %v11435_v53 = vld [vmem:[#allocation32_spill] sm:$0xff]  ;;  %v11440_v12 = vld [vmem:[#allocation46_spill] sm:$0xff] }
 0x347   : > { %v3935_v29 = vadd.f32 %v11426_v11, %v11425_v63  ;;  %v4206_v7 = vsel %vm4078_vm8, %v4014_v15, %v4142_v22  ;;  %vm4083_vm9 = vcmp.ge.f32.partialorder %v4019_v48, 0.0  ;;  %vm4087_vm10 = vcmp.ge.f32.partialorder %v4023_v56, 0.0 }
 0x348   : > { %v4147_v46 = vmul.f32 0.01, %v4019_v48  ;;  %v4262_v57 = vpack.c.bf16 %v4206_v7, %v4202_v50  ;;  %v4151_v27 = vmul.f32 0.01, %v4023_v56  ;;  %v4018_v60 = vadd.f32 %v11414_v16, %v3846_v20  ;;  %v11437_v20 = vld [vmem:[#allocation110_spill] sm:$0xff]  ;;  %v11438_v50 = vld [vmem:[#allocation104_spill] sm:$0xff] }
 0x349   : > { %v4022_v8 = vadd.f32 %v11414_v16, %v3847_v61  ;;  %v3968_v33 = vadd.f32 %v11427_v18, %v3934_v13  ;;  %v3969_v42 = vadd.f32 %v11428_v45, %v3935_v29  ;;  %v3814_v31 = vadd.f32 %v11430_v28, %v11429_v43  ;;  %v11439_v61 = vld [vmem:[#allocation49_spill] sm:$0xff] }
 0x34a   : > { %v4211_v17 = vsel %vm4083_vm9, %v4019_v48, %v4147_v46  ;;  %v4215_v58 = vsel %vm4087_vm10, %v4023_v56, %v4151_v27  ;;  %vm4082_vm11 = vcmp.ge.f32.partialorder %v4018_v60, 0.0  ;;  %v4146_v35 = vmul.f32 0.01, %v4018_v60  ;;  %v11436_v48 = vld [vmem:[#allocation35_spill] sm:$0xff]  ;;  %v11441_v13 = vld [vmem:[#allocation101_spill] sm:$0xff] }
 0x34b   : > { %vm4086_vm12 = vcmp.ge.f32.partialorder %v4022_v8, 0.0  ;;  %v4267_v26 = vpack.c.bf16 %v4215_v58, %v4211_v17  ;;  %v4150_v62 = vmul.f32 0.01, %v4022_v8  ;;  %v4027_v15 = vadd.f32 %v10398_v1, %v3968_v33  ;;  %v11442_v46 = vld [vmem:[#allocation111_spill] sm:$0xff] }
 0x34c   : > { %v4031_v24 = vadd.f32 %v10398_v1, %v3969_v42  ;;  %4818 = vmatmul.mubr.bf16.vlgmr.msra.gmra.mrb[64].mxu1 %v4258_v32  ;;  %v10459_v34 = vsel %vm4082_vm11, %v4018_v60, %v4146_v35  ;;  %v3815_v14 = vadd.f32 %v11432_v30, %v11431_v55  ;;  %v3848_v59 = vadd.f32 %v11433_v51, %v3814_v31  ;;  %v11444_v17 = vld [vmem:[#allocation103_spill] sm:$0xff]  ;;  %v11449_v30 = vld [vmem:[#allocation126_spill] sm:$0xff] }
 0x34d   : > { %v3936_v21 = vadd.f32 %v11435_v53, %v11434_v23  ;;  %4827 = vmatprep.mubr.bf16.mxu1 %v4263_v9  ;;  %v4214_v2 = vsel %vm4086_vm12, %v4022_v8, %v4150_v62  ;;  %vm4091_vm13 = vcmp.ge.f32.partialorder %v4027_v15, 0.0  ;;  %v4155_v3 = vmul.f32 0.01, %v4027_v15  ;;  %v11443_v8 = vld [vmem:[#allocation109_spill] sm:$0xff]  ;;  %v11445_v42 = vld [vmem:[#allocation31_spill] sm:$0xff] }
 0x34e   : > { %vm4095_vm14 = vcmp.ge.f32.partialorder %v4031_v24, 0.0  ;;  %v4266_v54 = vpack.c.bf16 %v4214_v2, %v10459_v34  ;;  %v4159_v22 = vmul.f32 0.01, %v4031_v24  ;;  %v3849_v32 = vadd.f32 %v11436_v48, %v3815_v14  ;;  %v11446_v58 = vld [vmem:[#allocation107_spill] sm:$0xff]  ;;  %v11451_v2 = vld [vmem:[#allocation45_spill] sm:$0xff]  ;;  %v11452_v48 = vld [vmem:[#allocation58_spill] sm:$0xff] }
 0x34f   : > { %v4026_v56 = vadd.f32 %v11414_v16, %v3848_v59  ;;  %v4219_v41 = vsel %vm4091_vm13, %v4027_v15, %v4155_v3  ;;  %v3937_v25 = vadd.f32 %v11438_v50, %v11437_v20  ;;  %v3970_v19 = vadd.f32 %v11439_v61, %v3936_v21  ;;  %v11448_v34 = vld [vmem:[#allocation115_spill] sm:$0xff]  ;;  %v11456_v50 = vld [vmem:[#allocation56_spill] sm:$0xff] }
 0x350   : > { %v3816_v9 = vadd.f32 %v11441_v13, %v11440_v12  ;;  %v4223_v63 = vsel %vm4095_vm14, %v4031_v24, %v4159_v22  ;;  %v4030_v11 = vadd.f32 %v11414_v16, %v3849_v32  ;;  %v3817_v18 = vadd.f32 %v11444_v17, %v11443_v8  ;;  %v11447_v24 = vld [vmem:[#allocation122_spill] sm:$0xff]  ;;  %v11450_v14 = vld [vmem:[#allocation123_spill] sm:$0xff] }
 0x351   : > { %vm4090_vm15 = vcmp.ge.f32.partialorder %v4026_v56, 0.0  ;;  %v4154_v29 = vmul.f32 0.01, %v4026_v56  ;;  %v4271_v7 = vpack.c.bf16 %v4223_v63, %v4219_v41  ;;  %v3971_v27 = vadd.f32 %v11442_v46, %v3937_v25  ;;  %v11454_v41 = vld [vmem:[#allocation114_spill] sm:$0xff] }
 0x352   : > { %v4035_v60 = vadd.f32 %v10398_v1, %v3970_v19  ;;  %vm4094_vm0 = vcmp.ge.f32.partialorder %v4030_v11, 0.0  ;;  %v4158_v33 = vmul.f32 0.01, %v4030_v11  ;;  %v3850_v43 = vadd.f32 %v11445_v42, %v3816_v9  ;;  %v11457_v63 = vld [vmem:[#allocation118_spill] sm:$0xff] }
 0x353   : > { %v10479_v45 = vsel %vm4090_vm15, %v4026_v56, %v4154_v29  ;;  %v4039_v28 = vadd.f32 %v10398_v1, %v3971_v27  ;;  %v3851_v35 = vadd.f32 %v11446_v58, %v3817_v18  ;;  %v3938_v55 = vadd.f32 %v11448_v34, %v11447_v24  ;;  %v11453_v56 = vld [vmem:[#allocation121_spill] sm:$0xff]  ;;  %v11458_v29 = vld [vmem:[#allocation23_spill] sm:$0xff]  ;;  %v11460_v8 = vld [vmem:[#allocation78_spill] sm:$0xff] }
 0x354   : > { %vm4099_vm1 = vcmp.ge.f32.partialorder %v4035_v60, 0.0  ;;  %v4163_v31 = vmul.f32 0.01, %v4035_v60  ;;  %4828 = vmatmul.mubr.bf16.gmra.mrb[68].mxu1 %v4262_v57  ;;  %v10484_v62 = vsel %vm4094_vm0, %v4030_v11, %v4158_v33  ;;  %v4034_v15 = vadd.f32 %v11414_v16, %v3850_v43  ;;  %v11461_v18 = vld [vmem:[#allocation77_spill] sm:$0xff]  ;;  %v11463_v42 = vld [vmem:[#allocation18_spill] sm:$0xff] }
 0x355   : > { %v3939_v51 = vadd.f32 %v11450_v14, %v11449_v30  ;;  %4837 = vmatprep.mubr.bf16.mxu1 %v4267_v26  ;;  %v4270_v59 = vpack.c.bf16 %v10484_v62, %v10479_v45  ;;  %vm4103_vm2 = vcmp.ge.f32.partialorder %v4039_v28, 0.0  ;;  %v4167_v23 = vmul.f32 0.01, %v4039_v28  ;;  %v11455_v26 = vld [vmem:[#allocation125_spill] sm:$0xff]  ;;  %v11462_v45 = vld [vmem:[#allocation66_spill] sm:$0xff] }
 0x356   : > { %v10493_v53 = vsel %vm4099_vm1, %v4035_v60, %v4163_v31  ;;  %v4038_v57 = vadd.f32 %v11414_v16, %v3851_v35  ;;  %vm4098_vm3 = vcmp.ge.f32.partialorder %v4034_v15, 0.0  ;;  %v4162_v21 = vmul.f32 0.01, %v4034_v15  ;;  %v11459_v60 = vld [vmem:[#allocation16_spill] sm:$0xff]  ;;  %v11466_v14 = vld [vmem:[#allocation14_spill] sm:$0xff] }
 0x357   : > { %v3972_v3 = vadd.f32 %v11451_v2, %v3938_v55  ;;  %v4231_v22 = vsel %vm4103_vm2, %v4039_v28, %v4167_v23  ;;  %v3973_v32 = vadd.f32 %v11452_v48, %v3939_v51  ;;  %v3818_v20 = vadd.f32 %v11454_v41, %v11453_v56  ;;  %v11465_v55 = vld [vmem:[#allocation20_spill] sm:$0xff] }
 0x358   : > { %v3819_v25 = vadd.f32 %v11456_v50, %v11455_v26  ;;  %v4275_v61 = vpack.c.bf16 %v4231_v22, %v10493_v53  ;;  %vm4102_vm4 = vcmp.ge.f32.partialorder %v4038_v57, 0.0  ;;  %v4166_v19 = vmul.f32 0.01, %v4038_v57 }
 0x359   : > { %v10503_v12 = vsel %vm4098_vm3, %v4034_v15, %v4162_v21  ;;  %v4043_v13 = vadd.f32 %v10398_v1, %v3972_v3  ;;  %v4047_v9 = vadd.f32 %v10398_v1, %v3973_v32  ;;  %v3852_v11 = vadd.f32 %v11457_v63, %v3818_v20  ;;  %v11464_v15 = vld [vmem:[#allocation69_spill] sm:$0xff] }
 0x35a   : > { %v3853_v46 = vadd.f32 %v11458_v29, %v3819_v25  ;;  %v10509_v27 = vsel %vm4102_vm4, %v4038_v57, %v4166_v19  ;;  %v3940_v17 = vadd.f32 %v11460_v8, %v11459_v60  ;;  %v3941_v33 = vadd.f32 %v11461_v18, %v10136_v4 }
 0x35b   : > { %v3820_v43 = vadd.f32 %v11463_v42, %v11462_v45  ;;  %v4274_v28 = vpack.c.bf16 %v10509_v27, %v10503_v12  ;;  %vm4107_vm5 = vcmp.ge.f32.partialorder %v4043_v13, 0.0  ;;  %vm4111_vm6 = vcmp.ge.f32.partialorder %v4047_v9, 0.0  ;;  %v4898_v12 = vld [vmem:[%s11470_s3] sm:$0x3] }
 0x35c   : > { %v4171_v31 = vmul.f32 0.01, %v4043_v13  ;;  %4838 = vmatmul.mubr.bf16.gmra.mrb[72].mxu1 %v4266_v54  ;;  %v4175_v58 = vmul.f32 0.01, %v4047_v9  ;;  %v4042_v35 = vadd.f32 %v11414_v16, %v3852_v11  ;;  %v4046_v62 = vadd.f32 %v11414_v16, %v3853_v46  ;;  %v4942_v27 = vld [vmem:[%s11471_s8] sm:$0x3] }
 0x35d   : > { %v3974_v24 = vadd.f32 %v11464_v15, %v3940_v17  ;;  %4847 = vmatprep.mubr.bf16.mxu1 %v4271_v7  ;;  %v3975_v4 = vadd.f32 %v10142_v5, %v3941_v33  ;;  %v3821_v30 = vadd.f32 %v11465_v55, %v10134_v49  ;;  %v3854_v51 = vadd.f32 %v11466_v14, %v3820_v43  ;;  %v11467_v7 = vld [vmem:[#allocation65_spill] sm:$0xff]  ;;  %s11476_s8 = sld [smem:[#allocation6_spill]] }
 0x35e   : > { %v4235_v34 = vsel %vm4107_vm5, %v4043_v13, %v4171_v31  ;;  %v4239_v23 = vsel %vm4111_vm6, %v4047_v9, %v4175_v58  ;;  %vm4106_vm7 = vcmp.ge.f32.partialorder %v4042_v35, 0.0  ;;  %vm4110_vm8 = vcmp.ge.f32.partialorder %v4046_v62, 0.0  ;;  %v11468_v9 = vld [vmem:[#allocation11_spill] sm:$0xff]  ;;  %v11473_v58 = vld [vmem:[#allocation8_spill] sm:$0xff] }
 0x35f   : > { %v4170_v54 = vmul.f32 0.01, %v4042_v35  ;;  %v4279_v53 = vpack.c.bf16 %v4239_v23, %v4235_v34  ;;  %v4174_v57 = vmul.f32 0.01, %v4046_v62  ;;  %v4051_v21 = vadd.f32 %v10398_v1, %v3974_v24 }
 0x360   : > { %v4055_v2 = vadd.f32 %v10398_v1, %v3975_v4  ;;  %v3855_v22 = vadd.f32 %v11467_v7, %v3821_v30  ;;  %v4050_v5 = vadd.f32 %v11414_v16, %v3854_v51  ;;  %v3942_v49 = vadd.f32 %v10242_v47, %v10236_v38  ;;  %v4986_v30 = vld [vmem:[%s11474_s10] sm:$0xff] }
 0x361   : > { %v4234_v3 = vsel %vm4106_vm7, %v4042_v35, %v4170_v54  ;;  %v4238_v48 = vsel %vm4110_vm8, %v4046_v62, %v4174_v57  ;;  %vm4115_vm9 = vcmp.ge.f32.partialorder %v4051_v21, 0.0  ;;  %v4179_v32 = vmul.f32 0.01, %v4051_v21  ;;  %v4987_v54 = vld [vmem:[%s11474_s10 + $0x8] sm:$0xff] }
 0x362   : > { %vm4119_vm10 = vcmp.ge.f32.partialorder %v4055_v2, 0.0  ;;  %v4278_v56 = vpack.c.bf16 %v4238_v48, %v4234_v3  ;;  %v4183_v41 = vmul.f32 0.01, %v4055_v2  ;;  %v4054_v20 = vadd.f32 %v11414_v16, %v3855_v22 }
 0x363   : > { %vm4114_vm11 = vcmp.ge.f32.partialorder %v4050_v5, 0.0  ;;  %v4243_v26 = vsel %vm4115_vm9, %v4051_v21, %v4179_v32  ;;  %v4178_v50 = vmul.f32 0.01, %v4050_v5  ;;  %v3943_v25 = vadd.f32 %v10295_v36, %v10315_v39  ;;  %v11469_v39 = vld [vmem:[#allocation61_spill] sm:$0xff]  ;;  %s6328_s27 = sshll.u32 %s11476_s8, 1 }
 0x364   : > { %v3976_v19 = vadd.f32 %v10258_v10, %v3942_v49  ;;  %4848 = vmatmul.mubr.bf16.gmra.mrb[76].mxu1 %v4270_v59  ;;  %v4247_v13 = vsel %vm4119_vm10, %v4055_v2, %v4183_v41  ;;  %vm4118_vm12 = vcmp.ge.f32.partialorder %v4054_v20, 0.0  ;;  %v4182_v38 = vmul.f32 0.01, %v4054_v20  ;;  %v4988_v2 = vld [vmem:[%s11474_s10 + $0x10] sm:$0xff]  ;;  %p804_p1 = scmp.lt.s32.totalorder %s6328_s27, 3 }
 0x365   : > { %v3822_v47 = vadd.f32 %v10216_v6, %v10234_v0  ;;  %v3841_v63 = vmul.f32 %v11468_v9, %v10267_v40  ;;  %4857 = vmatprep.mubr.bf16.mxu1 %v4275_v61  ;;  %v4283_v11 = vpack.c.bf16 %v4247_v13, %v4243_v26  ;;  %v3977_v29 = vadd.f32 %v10307_v44, %v3943_v25 }
 0x366   : > { %v4059_v46 = vadd.f32 %v10398_v1, %v3976_v19  ;;  %v4242_v60 = vsel %vm4114_vm11, %v4050_v5, %v4178_v50  ;;  %v4246_v36 = vsel %vm4118_vm12, %v4054_v20, %v4182_v38  ;;  %v3823_v10 = vadd.f32 %v10281_v37, %v10313_v52  ;;  %v4989_v5 = vld [vmem:[%s11474_s10 + $0x18] sm:$0xff]  ;;  %s11484_s27 = smov (!%p804_p1, %s6328_s27), 3 }
 0x367   : > { %v3856_v59 = vadd.f32 %v11469_v39, %v3822_v47  ;;  %v4282_v8 = vpack.c.bf16 %v4246_v36, %v4242_v60  ;;  %v4063_v17 = vadd.f32 %v10398_v1, %v3977_v29  ;;  %v10562_v35 = vrot.slane %v4898_v12, %v11473_v58  ;;  %v4990_v47 = vld [vmem:[%s11474_s10 + $0x20] sm:$0xff]  ;;  %v4991_v36 = vld [vmem:[%s11474_s10 + $0x28] sm:$0xff]  ;;  %s6329_s9 = sshll.u32 %s11484_s27, 3 }
 0x368   : > { %v4187_v6 = vmul.f32 0.01, %v4059_v46  ;;  %vm4123_vm13 = vcmp.ge.f32.partialorder %v4059_v46, 0.0  ;;  %v3857_v0 = vadd.f32 %v3841_v63, %v3823_v10  ;;  %v10568_v24 = vrot.slane %v4942_v27, %v11473_v58  ;;  %s807_s28 = scalar_lea.vmem %s11479_s30, %s6329_s9 }
 0x369   : > { %v4058_v40 = vadd.f32 %v11414_v16, %v3856_v59  ;;  %vm4127_vm14 = vcmp.ge.f32.partialorder %v4063_v17, 0.0  ;;  %v4191_v61 = vmul.f32 0.01, %v4063_v17  ;;  %vm5442_vm1 = vcmask 392192  }
 0x36a   : > { %v4062_v44 = vadd.f32 %v11414_v16, %v3857_v0  ;;  %v4251_v33 = vsel %vm4123_vm13, %v4059_v46, %v4187_v6  ;;  %v7741_v16 = vmov 0.0   ;;  %vm5945_vm9 = vcmask 64512  }
 0x36b   : > { %v4186_v18 = vmul.f32 0.01, %v4058_v40  ;;  %v4255_v45 = vsel %vm4127_vm14, %v4063_v17, %v4191_v61  ;;  %vm4122_vm15 = vcmp.ge.f32.partialorder %v4058_v40, 0.0  ;;  %5280 = vmatprep.mubr.f32.mxu0 %v7741_v16  ;;  %v5069_v55 = vpop.permute.xlu0 %5068  ;;  %vm6169_vm10 = vcmask 1045504  }
 0x36c   : > { %4858 = vmatmul.mubr.bf16.gmra.mrb[80].mxu1 %v4274_v28  ;;  %v4287_v37 = vpack.c.bf16 %v4255_v45, %v4251_v33  ;;  %vm4126_vm0 = vcmp.ge.f32.partialorder %v4062_v44, 0.0  ;;  %v4190_v52 = vmul.f32 0.01, %v4062_v44  ;;  %v11472_v28 = vld [vmem:[#allocation7_spill] sm:$0xff]  ;;  %vm6162_vm11 = vcmask 48128  }
 0x36d   : > { %4867 = vmatprep.mubr.bf16.mxu1 %v4279_v53  ;;  %v4250_v1 = vsel %vm4122_vm15, %v4058_v40, %v4186_v18  ;;  %v10559_v31 = vrot.slane %v4898_v12, %v11472_v28  ;;  %v10565_v62 = vrot.slane %v4942_v27, %v11472_v28  ;;  %vm6248_vm12 = vcmask 15360  }
 0x36e   : > { %v4254_v42 = vsel %vm4126_vm0, %v4062_v44, %v4190_v52  ;;  %v4993_v44 = vld [vmem:[%s11474_s10 + $0x38] sm:$0xff] }
 0x36f   : > { %v4286_v43 = vpack.c.bf16 %v4254_v42, %v4250_v1 }
 0x373   : > { %v5074_v41 = vpop.permute.xlu0 %5073 }
 0x374   : > { %4868 = vmatmul.mubr.bf16.gmra.mrb[84].mxu1 %v4278_v56  ;;  %v5079_v38 = vpop.permute.xlu1 %5078 }
 0x375   : > { %4877 = vmatprep.mubr.bf16.mxu1 %v4283_v11 }
 0x37a   : > { %v5084_v42 = vpop.permute.xlu1 %5083 }
 0x37c   : > { %4878 = vmatmul.mubr.bf16.gmra.mrb[88].mxu1 %v4282_v8  ;;  %v4992_v8 = vld [vmem:[%s11474_s10 + $0x30] sm:$0xff] }
 0x37d   : > { %4887 = vmatprep.mubr.bf16.mxu1 %v4287_v37 }
 0x384   : > { %4888 = vmatmul.mubr.bf16.gmra.mrb[92].mxu1 %v4286_v43 }
 0x41f   : > { %v4819_v15 = vpop.f32.mrb[64].mxu1 }
 0x420   : > { %v4910_v34 = vmul.f32 %v10559_v31, %v4819_v15  ;;  %v4821_v4 = vpop.f32.mrb[65].mxu1 }
 0x421   : > { %v4911_v14 = vmul.f32 %v10562_v35, %v4821_v4  ;;  %v4823_v51 = vpop.f32.mrb[66].mxu1 }
 0x422   : > { %v4954_v23 = vadd.f32 %v10565_v62, %v4910_v34  ;;  %v4912_v53 = vmul.f32 %v10559_v31, %v4823_v51  ;;  %v4825_v57 = vpop.f32.mrb[67].mxu1  ;;  %v4994_v34 = vld [vmem:[%s11474_s10 + $0x40] sm:$0xff] }
 0x423   : > { %v4955_v21 = vadd.f32 %v10568_v24, %v4911_v14  ;;  %v4913_v3 = vmul.f32 %v10562_v35, %v4825_v57 }
 0x424   : > { %v5018_v7 = vmul.f32 %v4986_v30, %v4954_v23  ;;  %v4956_v22 = vadd.f32 %v10565_v62, %v4912_v53 }
 0x425   : > { %v5019_v49 = vmul.f32 %v4987_v54, %v4955_v21  ;;  %v4957_v48 = vadd.f32 %v10568_v24, %v4913_v3  ;;  %v4995_v54 = vld [vmem:[%s11474_s10 + $0x48] sm:$0xff] }
 0x426   : > { %v5146_v32 = vsub.f32 %v5018_v7, %v5069_v55  ;;  %v5020_v56 = vmul.f32 %v4988_v2, %v4956_v22  ;;  %v4996_v2 = vld [vmem:[%s11474_s10 + $0x50] sm:$0xff] }
 0x427   : > { %v5021_v20 = vmul.f32 %v4989_v5, %v4957_v48  ;;  %v4829_v26 = vpop.f32.mrb[68].mxu1  ;;  %v5147_v50 = vsub.f32 %v5019_v49, %v5069_v55  ;;  %v4997_v48 = vld [vmem:[%s11474_s10 + $0x58] sm:$0xff] }
 0x428   : > { %v5148_v25 = vsub.f32 %v5020_v56, %v5074_v41  ;;  %v4914_v19 = vmul.f32 %v10559_v31, %v4829_v26  ;;  %v4831_v13 = vpop.f32.mrb[69].mxu1  ;;  %v5178_v29 = vmax.f32 %v5146_v32, 0.0  ;;  %v5089_v56 = vpop.permute.xlu0 %5088 }
 0x429   : > { %v4915_v9 = vmul.f32 %v10562_v35, %v4831_v13  ;;  %v4833_v63 = vpop.f32.mrb[70].mxu1  ;;  %v5149_v11 = vsub.f32 %v5021_v20, %v5074_v41  ;;  %v5179_v6 = vmax.f32 %v5147_v50, 0.0 }
 0x42a   : > { %v5180_v46 = vmax.f32 %v5148_v25, 0.0  ;;  %v4958_v60 = vadd.f32 %v10565_v62, %v4914_v19  ;;  %v4916_v10 = vmul.f32 %v10559_v31, %v4833_v63  ;;  %v4835_v39 = vpop.f32.mrb[71].mxu1  ;;  %v5094_v19 = vpop.permute.xlu1 %5093 }
 0x42b   : > { %v4959_v59 = vadd.f32 %v10568_v24, %v4915_v9  ;;  %v4917_v17 = vmul.f32 %v10562_v35, %v4835_v39  ;;  %v5181_v0 = vmax.f32 %v5149_v11, 0.0 }
 0x42c   : > { %v5022_v40 = vmul.f32 %v4990_v47, %v4958_v60  ;;  %v4960_v61 = vadd.f32 %v10565_v62, %v4916_v10  ;;  %v6804_v18 = vpack.c.bf16 %v5180_v46, %v5178_v29  ;;  %v4998_v29 = vld [vmem:[%s11474_s10 + $0x60] sm:$0xff] }
 0x42d   : > { %v5023_v33 = vmul.f32 %v4991_v36, %v4959_v59  ;;  %v4961_v45 = vadd.f32 %v10568_v24, %v4917_v17  ;;  %v6802_v37 = vpack.c.bf16 %v5181_v0, %v5179_v6 }
 0x42e   : > { %v5150_v52 = vsub.f32 %v5022_v40, %v5079_v38  ;;  %v5024_v1 = vmul.f32 %v4992_v8, %v4960_v61  ;;  %v4999_v8 = vld [vmem:[%s11474_s10 + $0x68] sm:$0xff]  ;;  %v5000_v40 = vld [vmem:[%s11474_s10 + $0x70] sm:$0xff] }
 0x42f   : > { %v5025_v43 = vmul.f32 %v4993_v44, %v4961_v45  ;;  %v4839_v12 = vpop.f32.mrb[72].mxu1  ;;  %6803 = vmatprep.subr.bf16.mxu0 %v6802_v37  ;;  %v5151_v27 = vsub.f32 %v5023_v33, %v5079_v38  ;;  %v5001_v37 = vld [vmem:[%s11474_s10 + $0x78] sm:$0xff] }
 0x430   : > { %v5152_v28 = vsub.f32 %v5024_v1, %v5084_v42  ;;  %v4918_v58 = vmul.f32 %v10559_v31, %v4839_v12  ;;  %v4841_v15 = vpop.f32.mrb[73].mxu1  ;;  %6805 = vmatpush1.bf16.msra.mxu0 %v6804_v18  ;;  %v5182_v14 = vmax.f32 %v5150_v52, 0.0  ;;  %v5099_v1 = vpop.permute.xlu0 %5098 }
 0x431   : > { %v4919_v4 = vmul.f32 %v10562_v35, %v4841_v15  ;;  %v4843_v55 = vpop.f32.mrb[74].mxu1  ;;  %v5153_v30 = vsub.f32 %v5025_v43, %v5084_v42  ;;  %v5183_v7 = vmax.f32 %v5151_v27, 0.0 }
 0x432   : > { %v5184_v51 = vmax.f32 %v5152_v28, 0.0  ;;  %v4962_v23 = vadd.f32 %v10565_v62, %v4918_v58  ;;  %v4920_v53 = vmul.f32 %v10559_v31, %v4843_v55  ;;  %v4845_v57 = vpop.f32.mrb[75].mxu1  ;;  %v5104_v58 = vpop.permute.xlu1 %5103 }
 0x433   : > { %v4963_v21 = vadd.f32 %v10568_v24, %v4919_v4  ;;  %v4921_v3 = vmul.f32 %v10562_v35, %v4845_v57  ;;  %v5185_v22 = vmax.f32 %v5153_v30, 0.0 }
 0x434   : > { %v5026_v5 = vmul.f32 %v4994_v34, %v4962_v23  ;;  %v4964_v49 = vadd.f32 %v10565_v62, %v4920_v53  ;;  %v6808_v32 = vpack.c.bf16 %v5184_v51, %v5182_v14  ;;  %v5002_v51 = vld [vmem:[%s11474_s10 + $0x80] sm:$0xff] }
 0x435   : > { %v5027_v41 = vmul.f32 %v4995_v54, %v4963_v21  ;;  %v4965_v20 = vadd.f32 %v10568_v24, %v4921_v3  ;;  %v6806_v26 = vpack.c.bf16 %v5185_v22, %v5183_v7  ;;  %v5003_v3 = vld [vmem:[%s11474_s10 + $0x88] sm:$0xff] }
 0x436   : > { %v5154_v50 = vsub.f32 %v5026_v5, %v5089_v56  ;;  %v5028_v25 = vmul.f32 %v4996_v2, %v4964_v49  ;;  %v5004_v49 = vld [vmem:[%s11474_s10 + $0x90] sm:$0xff] }
 0x437   : > { %v5029_v13 = vmul.f32 %v4997_v48, %v4965_v20  ;;  %v4849_v38 = vpop.f32.mrb[76].mxu1  ;;  %6807 = vmatprep.subr.bf16.mxu0 %v6806_v26  ;;  %v5155_v47 = vsub.f32 %v5027_v41, %v5089_v56  ;;  %v5005_v26 = vld [vmem:[%s11474_s10 + $0x98] sm:$0xff] }
 0x438   : > { %v5156_v9 = vsub.f32 %v5028_v25, %v5094_v19  ;;  %v4922_v63 = vmul.f32 %v10559_v31, %v4849_v38  ;;  %v4851_v11 = vpop.f32.mrb[77].mxu1  ;;  %6809 = vmatpush1.bf16.msra.mxu0 %v6808_v32  ;;  %v5186_v10 = vmax.f32 %v5154_v50, 0.0  ;;  %v5109_v25 = vpop.permute.xlu0 %5108 }
 0x439   : > { %v4923_v46 = vmul.f32 %v10562_v35, %v4851_v11  ;;  %v4853_v60 = vpop.f32.mrb[78].mxu1  ;;  %v5157_v36 = vsub.f32 %v5029_v13, %v5094_v19  ;;  %v5187_v44 = vmax.f32 %v5155_v47, 0.0 }
 0x43a   : > { %v5188_v39 = vmax.f32 %v5156_v9, 0.0  ;;  %v4966_v59 = vadd.f32 %v10565_v62, %v4922_v63  ;;  %v4924_v17 = vmul.f32 %v10559_v31, %v4853_v60  ;;  %v4855_v6 = vpop.f32.mrb[79].mxu1  ;;  %v5114_v63 = vpop.permute.xlu1 %5113 }
 0x43b   : > { %v4967_v0 = vadd.f32 %v10568_v24, %v4923_v46  ;;  %v4925_v61 = vmul.f32 %v10562_v35, %v4855_v6  ;;  %v5189_v18 = vmax.f32 %v5157_v36, 0.0 }
 0x43c   : > { %v5030_v33 = vmul.f32 %v4998_v29, %v4966_v59  ;;  %v4968_v45 = vadd.f32 %v10565_v62, %v4924_v17  ;;  %v6812_v52 = vpack.c.bf16 %v5188_v39, %v5186_v10  ;;  %v5006_v39 = vld [vmem:[%s11474_s10 + $0xa0] sm:$0xff] }
 0x43d   : > { %v5031_v42 = vmul.f32 %v4999_v8, %v4967_v0  ;;  %v4969_v43 = vadd.f32 %v10568_v24, %v4925_v61  ;;  %v6810_v12 = vpack.c.bf16 %v5189_v18, %v5187_v44  ;;  %v5007_v61 = vld [vmem:[%s11474_s10 + $0xa8] sm:$0xff] }
 0x43e   : > { %v5158_v27 = vsub.f32 %v5030_v33, %v5099_v1  ;;  %v5032_v28 = vmul.f32 %v5000_v40, %v4968_v45  ;;  %v5008_v45 = vld [vmem:[%s11474_s10 + $0xb0] sm:$0xff] }
 0x43f   : > { %v5033_v15 = vmul.f32 %v5001_v37, %v4969_v43  ;;  %v4859_v34 = vpop.f32.mrb[80].mxu1  ;;  %6811 = vmatprep.subr.bf16.mxu0 %v6810_v12  ;;  %v5159_v4 = vsub.f32 %v5031_v42, %v5099_v1  ;;  %v5009_v12 = vld [vmem:[%s11474_s10 + $0xb8] sm:$0xff] }
 0x440   : > { %v5160_v55 = vsub.f32 %v5032_v28, %v5104_v58  ;;  %v4926_v30 = vmul.f32 %v10559_v31, %v4859_v34  ;;  %v4861_v14 = vpop.f32.mrb[81].mxu1  ;;  %6813 = vmatpush1.bf16.msra.mxu0 %v6812_v52  ;;  %v5190_v57 = vmax.f32 %v5158_v27, 0.0  ;;  %v5119_v28 = vpop.permute.xlu0 %5118 }
 0x441   : > { %v4927_v23 = vmul.f32 %v10562_v35, %v4861_v14  ;;  %v4863_v54 = vpop.f32.mrb[82].mxu1  ;;  %v5161_v53 = vsub.f32 %v5033_v15, %v5104_v58  ;;  %v5191_v32 = vmax.f32 %v5159_v4, 0.0 }
 0x442   : > { %v5192_v21 = vmax.f32 %v5160_v55, 0.0  ;;  %v4970_v2 = vadd.f32 %v10565_v62, %v4926_v30  ;;  %v4928_v7 = vmul.f32 %v10559_v31, %v4863_v54  ;;  %v4865_v22 = vpop.f32.mrb[83].mxu1  ;;  %v5124_v30 = vpop.permute.xlu1 %5123 }
 0x443   : > { %v4971_v5 = vadd.f32 %v10568_v24, %v4927_v23  ;;  %v4929_v48 = vmul.f32 %v10562_v35, %v4865_v22  ;;  %v5193_v56 = vmax.f32 %v5161_v53, 0.0 }
 0x444   : > { %v5034_v41 = vmul.f32 %v5002_v51, %v4970_v2  ;;  %v4972_v20 = vadd.f32 %v10565_v62, %v4928_v7  ;;  %v6816_v50 = vpack.c.bf16 %v5192_v21, %v5190_v57  ;;  %v5010_v21 = vld [vmem:[%s11474_s10 + $0xc0] sm:$0xff] }
 0x445   : > { %v5035_v19 = vmul.f32 %v5003_v3, %v4971_v5  ;;  %v4973_v13 = vadd.f32 %v10568_v24, %v4929_v48  ;;  %v6814_v38 = vpack.c.bf16 %v5193_v56, %v5191_v32  ;;  %v5011_v48 = vld [vmem:[%s11474_s10 + $0xc8] sm:$0xff] }
 0x446   : > { %v5162_v47 = vsub.f32 %v5034_v41, %v5109_v25  ;;  %v5036_v9 = vmul.f32 %v5004_v49, %v4972_v20  ;;  %v5012_v20 = vld [vmem:[%s11474_s10 + $0xd0] sm:$0xff] }
 0x447   : > { %v5037_v11 = vmul.f32 %v5005_v26, %v4973_v13  ;;  %v4869_v29 = vpop.f32.mrb[84].mxu1  ;;  %6815 = vmatprep.subr.bf16.mxu0 %v6814_v38  ;;  %v5163_v46 = vsub.f32 %v5035_v19, %v5109_v25  ;;  %v5013_v38 = vld [vmem:[%s11474_s10 + $0xd8] sm:$0xff] }
 0x448   : > { %v5164_v60 = vsub.f32 %v5036_v9, %v5114_v63  ;;  %v4930_v36 = vmul.f32 %v10559_v31, %v4869_v29  ;;  %v4871_v10 = vpop.f32.mrb[85].mxu1  ;;  %6817 = vmatpush1.bf16.msra.mxu0 %v6816_v50  ;;  %v5194_v6 = vmax.f32 %v5162_v47, 0.0  ;;  %v5129_v9 = vpop.permute.xlu0 %5128 }
 0x449   : > { %v4931_v59 = vmul.f32 %v10562_v35, %v4871_v10  ;;  %v4873_v8 = vpop.f32.mrb[86].mxu1  ;;  %v5165_v17 = vsub.f32 %v5037_v11, %v5114_v63  ;;  %v5195_v52 = vmax.f32 %v5163_v46, 0.0 }
 0x44a   : > { %v5196_v0 = vmax.f32 %v5164_v60, 0.0  ;;  %v4974_v40 = vadd.f32 %v10565_v62, %v4930_v36  ;;  %v4932_v44 = vmul.f32 %v10559_v31, %v4873_v8  ;;  %v4875_v18 = vpop.f32.mrb[87].mxu1  ;;  %v5134_v36 = vpop.permute.xlu1 %5133 }
 0x44b   : > { %v4975_v33 = vadd.f32 %v10568_v24, %v4931_v59  ;;  %v4933_v37 = vmul.f32 %v10562_v35, %v4875_v18  ;;  %v5197_v1 = vmax.f32 %v5165_v17, 0.0 }
 0x44c   : > { %v5038_v42 = vmul.f32 %v5006_v39, %v4974_v40  ;;  %v4976_v43 = vadd.f32 %v10565_v62, %v4932_v44  ;;  %v6820_v27 = vpack.c.bf16 %v5196_v0, %v5194_v6  ;;  %v5014_v0 = vld [vmem:[%s11474_s10 + $0xe0] sm:$0xff] }
 0x44d   : > { %v5039_v58 = vmul.f32 %v5007_v61, %v4975_v33  ;;  %v4977_v15 = vadd.f32 %v10568_v24, %v4933_v37  ;;  %v6818_v34 = vpack.c.bf16 %v5197_v1, %v5195_v52  ;;  %v5015_v37 = vld [vmem:[%s11474_s10 + $0xe8] sm:$0xff] }
 0x44e   : > { %v5166_v4 = vsub.f32 %v5038_v42, %v5119_v28  ;;  %v5040_v55 = vmul.f32 %v5008_v45, %v4976_v43  ;;  %v5016_v43 = vld [vmem:[%s11474_s10 + $0xf0] sm:$0xff] }
 0x44f   : > { %v5041_v14 = vmul.f32 %v5009_v12, %v4977_v15  ;;  %v4879_v51 = vpop.f32.mrb[88].mxu1  ;;  %6819 = vmatprep.subr.bf16.mxu0 %v6818_v34  ;;  %v5167_v23 = vsub.f32 %v5039_v58, %v5119_v28  ;;  %v5017_v34 = vld [vmem:[%s11474_s10 + $0xf8] sm:$0xff] }
 0x450   : > { %v5168_v54 = vsub.f32 %v5040_v55, %v5124_v30  ;;  %v4934_v53 = vmul.f32 %v10559_v31, %v4879_v51  ;;  %v4881_v57 = vpop.f32.mrb[89].mxu1  ;;  %6821 = vmatpush1.bf16.msra.mxu0 %v6820_v27  ;;  %v5198_v22 = vmax.f32 %v5166_v4, 0.0 }
 0x451   : > { %v4935_v2 = vmul.f32 %v10562_v35, %v4881_v57  ;;  %v4883_v3 = vpop.f32.mrb[90].mxu1  ;;  %v5169_v7 = vsub.f32 %v5041_v14, %v5124_v30  ;;  %v5199_v50 = vmax.f32 %v5167_v23, 0.0 }
 0x452   : > { %v5200_v5 = vmax.f32 %v5168_v54, 0.0  ;;  %v4978_v49 = vadd.f32 %v10565_v62, %v4934_v53  ;;  %v4936_v32 = vmul.f32 %v10559_v31, %v4883_v3  ;;  %v4885_v56 = vpop.f32.mrb[91].mxu1  ;;  %v5144_v54 = vpop.permute.xlu1 %5143 }
 0x453   : > { %v4979_v41 = vadd.f32 %v10568_v24, %v4935_v2  ;;  %v4937_v26 = vmul.f32 %v10562_v35, %v4885_v56  ;;  %v5201_v25 = vmax.f32 %v5169_v7, 0.0  ;;  %v5214_v56 = vld [vmem:[%s11080_s12 + $0x20] sm:$0xff] }
 0x454   : > { %v5042_v19 = vmul.f32 %v5010_v21, %v4978_v49  ;;  %v4980_v13 = vadd.f32 %v10565_v62, %v4936_v32  ;;  %v6824_v47 = vpack.c.bf16 %v5200_v5, %v5198_v22  ;;  %v5211_v49 = vld [vmem:[%s11080_s12 + $0x8] sm:$0xff]  ;;  %v5213_v32 = vld [vmem:[%s11080_s12 + $0x18] sm:$0xff] }
 0x455   : > { %v5043_v63 = vmul.f32 %v5011_v48, %v4979_v41  ;;  %v4981_v11 = vadd.f32 %v10568_v24, %v4937_v26  ;;  %v6822_v29 = vpack.c.bf16 %v5201_v25, %v5199_v50  ;;  %v5212_v48 = vld [vmem:[%s11080_s12 + $0x10] sm:$0xff]  ;;  %v5215_v41 = vld [vmem:[%s11080_s12 + $0x28] sm:$0xff] }
 0x456   : > { %v5170_v46 = vsub.f32 %v5042_v19, %v5129_v9  ;;  %v5044_v60 = vmul.f32 %v5012_v20, %v4980_v13 }
 0x457   : > { %v5045_v10 = vmul.f32 %v5013_v38, %v4981_v11  ;;  %v4889_v39 = vpop.f32.mrb[92].mxu1  ;;  %6823 = vmatprep.subr.bf16.mxu0 %v6822_v29  ;;  %v5171_v59 = vsub.f32 %v5043_v63, %v5129_v9 }
 0x458   : > { %v5172_v8 = vsub.f32 %v5044_v60, %v5134_v36  ;;  %v4938_v17 = vmul.f32 %v10559_v31, %v4889_v39  ;;  %v4891_v6 = vpop.f32.mrb[93].mxu1  ;;  %6825 = vmatpush1.bf16.msra.mxu0 %v6824_v47  ;;  %v5202_v18 = vmax.f32 %v5170_v46, 0.0  ;;  %v5617_v60 = vld [vmem:[%s11085_s17 + $0x80] sm:$0xff] }
 0x459   : > { %v4939_v40 = vmul.f32 %v10562_v35, %v4891_v6  ;;  %v4893_v61 = vpop.f32.mrb[94].mxu1  ;;  %v5173_v44 = vsub.f32 %v5045_v10, %v5134_v36  ;;  %v5203_v27 = vmax.f32 %v5171_v59, 0.0  ;;  %v5618_v36 = vld [vmem:[%s11085_s17 + $0x88] sm:$0xff]  ;;  %v5601_v6 = vld [vmem:[%s11085_s17] sm:$0xff] }
 0x45a   : > { %v5204_v33 = vmax.f32 %v5172_v8, 0.0  ;;  %v4982_v45 = vadd.f32 %v10565_v62, %v4938_v17  ;;  %v4940_v52 = vmul.f32 %v10559_v31, %v4893_v61  ;;  %v4895_v1 = vpop.f32.mrb[95].mxu1  ;;  %v5139_v31 = vpop.permute.xlu0 %5138  ;;  %v6846_v17 = vpack.c.bf16 %v5618_v36, %v5617_v60  ;;  %v5620_v61 = vld [vmem:[%s11085_s17 + $0x98] sm:$0xff]  ;;  %v5615_v60 = vld [vmem:[%s11085_s17 + $0x70] sm:$0xff] }
 0x45b   : > { %v4983_v42 = vadd.f32 %v10568_v24, %v4939_v40  ;;  %v4941_v12 = vmul.f32 %v10562_v35, %v4895_v1  ;;  %v5205_v28 = vmax.f32 %v5173_v44, 0.0  ;;  %v5619_v40 = vld [vmem:[%s11085_s17 + $0x90] sm:$0xff]  ;;  %v5616_v36 = vld [vmem:[%s11085_s17 + $0x78] sm:$0xff] }
 0x45c   : > { %v5046_v58 = vmul.f32 %v5014_v0, %v4982_v45  ;;  %v4984_v15 = vadd.f32 %v10565_v62, %v4940_v52  ;;  %v6828_v4 = vpack.c.bf16 %v5204_v33, %v5202_v18  ;;  %v5602_v0 = vld [vmem:[%s11085_s17 + $0x8] sm:$0xff]  ;;  %v6850_v18 = vpack.c.bf16 %v5620_v61, %v5619_v40  ;;  %v5603_v33 = vld [vmem:[%s11085_s17 + $0x10] sm:$0xff]  ;;  %v5604_v45 = vld [vmem:[%s11085_s17 + $0x18] sm:$0xff] }
 0x45d   : > { %v5047_v55 = vmul.f32 %v5015_v37, %v4983_v42  ;;  %v4985_v30 = vadd.f32 %v10568_v24, %v4941_v12  ;;  %v6826_v14 = vpack.c.bf16 %v5205_v28, %v5203_v27  ;;  %v5210_v24 = vld [vmem:[%s11080_s12] sm:$0xff]  ;;  %v6848_v44 = vpack.c.bf16 %v5602_v0, %v5601_v6  ;;  %v5622_v52 = vld [vmem:[%s11085_s17 + $0xa8] sm:$0xff]  ;;  %v5623_v27 = vld [vmem:[%s11085_s17 + $0xb0] sm:$0xff] }
 0x45e   : > { %v5174_v51 = vsub.f32 %v5046_v58, %v5139_v31  ;;  %v5048_v23 = vmul.f32 %v5016_v43, %v4984_v15  ;;  %v5621_v37 = vld [vmem:[%s11085_s17 + $0xa0] sm:$0xff]  ;;  %v6852_v1 = vpack.c.bf16 %v5604_v45, %v5603_v33  ;;  %v5606_v12 = vld [vmem:[%s11085_s17 + $0x28] sm:$0xff]  ;;  %v5624_v28 = vld [vmem:[%s11085_s17 + $0xb8] sm:$0xff] }
 0x45f   : > { %v5049_v53 = vmul.f32 %v5017_v34, %v4985_v30  ;;  %6827 = vmatprep.subr.bf16.mxu0 %v6826_v14  ;;  %v5175_v35 = vsub.f32 %v5047_v55, %v5139_v31  ;;  %v6854_v42 = vpack.c.bf16 %v5622_v52, %v5621_v37  ;;  %v5605_v43 = vld [vmem:[%s11085_s17 + $0x20] sm:$0xff]  ;;  %v6858_v15 = vpack.c.bf16 %v5624_v28, %v5623_v27  ;;  %v5607_v34 = vld [vmem:[%s11085_s17 + $0x30] sm:$0xff]  ;;  %v5626_v55 = vld [vmem:[%s11085_s17 + $0xc8] sm:$0xff] }
 0x460   : > { %v5176_v57 = vsub.f32 %v5048_v23, %v5144_v54  ;;  %6829 = vmatpush1.bf16.msra.mxu0 %v6828_v4  ;;  %v5206_v62 = vmax.f32 %v5174_v51, 0.0  ;;  %v6856_v58 = vpack.c.bf16 %v5606_v12, %v5605_v43  ;;  %v5608_v4 = vld [vmem:[%s11085_s17 + $0x38] sm:$0xff]  ;;  %v5625_v31 = vld [vmem:[%s11085_s17 + $0xc0] sm:$0xff]  ;;  %v5610_v23 = vld [vmem:[%s11085_s17 + $0x48] sm:$0xff] }
 0x461   : > { %v5177_v21 = vsub.f32 %v5049_v53, %v5144_v54  ;;  %v5207_v3 = vmax.f32 %v5175_v35, 0.0  ;;  %v6860_v30 = vpack.c.bf16 %v5608_v4, %v5607_v34  ;;  %v6862_v14 = vpack.c.bf16 %v5626_v55, %v5625_v31  ;;  %v5609_v51 = vld [vmem:[%s11085_s17 + $0x40] sm:$0xff]  ;;  %v5627_v54 = vld [vmem:[%s11085_s17 + $0xd0] sm:$0xff]  ;;  %v5628_v53 = vld [vmem:[%s11085_s17 + $0xd8] sm:$0xff]  ;;  %v5514_v35 = vpop.permute.xlu0 %5513 }
 0x462   : > { %v5208_v2 = vmax.f32 %v5176_v57, 0.0  ;;  %v6864_v57 = vpack.c.bf16 %v5610_v23, %v5609_v51  ;;  %v5412_v31 = vld [vmem:[%s11081_s13] sm:$0xff] }
 0x463   : > { %v5209_v7 = vmax.f32 %v5177_v21, 0.0  ;;  %v6866_v21 = vpack.c.bf16 %v5628_v53, %v5627_v54 }
 0x464   : > { %v6832_v22 = vpack.c.bf16 %v5208_v2, %v5206_v62  ;;  %v5611_v62 = vld [vmem:[%s11085_s17 + $0x50] sm:$0xff]  ;;  %v5612_v2 = vld [vmem:[%s11085_s17 + $0x58] sm:$0xff] }
 0x465   : > { %v6830_v5 = vpack.c.bf16 %v5209_v7, %v5207_v3  ;;  %v5629_v7 = vld [vmem:[%s11085_s17 + $0xe0] sm:$0xff] }
 0x467   : > { %6831 = vmatprep.subr.bf16.mxu0 %v6830_v5  ;;  %v5562_v5 = vpop.permute.xlu1 %5561 }
 0x468   : > { %6833 = vmatpush1.bf16.msra.mxu0 %v6832_v22  ;;  %v5630_v22 = vld [vmem:[%s11085_s17 + $0xe8] sm:$0xff] }
 0x46b   : > { %5281 = vmatmul.mubr.f32.vlgmr.msra.gmra.mrb[96].mxu0 %v5210_v24  ;;  %v6868_v24 = vpack.c.bf16 %v5612_v2, %v5611_v62 }
 0x46c   : > { %5286 = vmatprep.mubr.f32.mxu0 %v7741_v16 }
 0x46f   : > { %5287 = vmatmul.mubr.f32.gmra.mrb[98].mxu0 %v5211_v49  ;;  %v5519_v49 = vpop.permute.xlu0 %5518 }
 0x470   : > { %5292 = vmatprep.mubr.f32.mxu0 %v7741_v16 }
 0x473   : > { %5293 = vmatmul.mubr.f32.gmra.mrb[100].mxu0 %v5212_v48  ;;  %v6870_v48 = vpack.c.bf16 %v5630_v22, %v5629_v7 }
 0x474   : > { %5298 = vmatprep.mubr.f32.mxu0 %v7741_v16 }
 0x477   : > { %5299 = vmatmul.mubr.f32.gmra.mrb[102].mxu0 %v5213_v32  ;;  %v5613_v32 = vld [vmem:[%s11085_s17 + $0x60] sm:$0xff] }
 0x478   : > { %5304 = vmatprep.mubr.f32.mxu0 %v7741_v16 }
 0x47b   : > { %5305 = vmatmul.mubr.f32.gmra.mrb[104].mxu0 %v5214_v56  ;;  %v5614_v56 = vld [vmem:[%s11085_s17 + $0x68] sm:$0xff] }
 0x47c   : > { %5310 = vmatprep.mubr.f32.mxu0 %v7741_v16 }
 0x47f   : > { %5311 = vmatmul.mubr.f32.gmra.mrb[106].mxu0 %v5215_v41 }
 0x53e   : > { %v10753_v20 = vpop.f32.mrb[96].mxu0 }
 0x53f   : > { %v10755_v26 = vpop.f32.mrb[97].mxu0 }
 0x540   : > { %5381 = vmatprep.mubr.f32.mxu0 %v10755_v26  ;;  %v5542_v3 = vmul.f32 %v5514_v35, %v10755_v26 }
 0x542   : > { %v10758_v50 = vpop.f32.mrb[98].mxu0  ;;  %v5590_v41 = vadd.f32 %v5562_v5, %v5542_v3 }
 0x543   : > { %v6836_v25 = vpack.c.bf16 %v10758_v50, %v10753_v20  ;;  %v10762_v19 = vpop.f32.mrb[99].mxu0 }
 0x544   : > { %v6834_v16 = vpack.c.bf16 %v10762_v19, %v10755_v26  ;;  %v5631_v26 = vld [vmem:[%s11085_s17 + $0xf0] sm:$0xff]  ;;  %v5544_v6 = vmul.f32 %v5519_v49, %v10762_v19 }
 0x546   : > { %v10766_v13 = vpop.f32.mrb[100].mxu0  ;;  %6835 = vmatprep.subr.bf16.mxu0 %v6834_v16  ;;  %v6872_v16 = vpack.c.bf16 %v5614_v56, %v5613_v32 }
 0x547   : > { %v10768_v38 = vpop.f32.mrb[101].mxu0  ;;  %6837 = vmatpush1.bf16.xpose.msra.mxu0 %v6836_v25  ;;  %v5632_v25 = vld [vmem:[%s11085_s17 + $0xf8] sm:$0xff] }
 0x54a   : > { %v10770_v47 = vpop.f32.mrb[102].mxu0 }
 0x54b   : > { %v6840_v9 = vpack.c.bf16 %v10770_v47, %v10766_v13  ;;  %v10774_v63 = vpop.f32.mrb[103].mxu0 }
 0x54c   : > { %v6838_v11 = vpack.c.bf16 %v10774_v63, %v10768_v38 }
 0x54e   : > { %v10778_v29 = vpop.f32.mrb[104].mxu0  ;;  %6839 = vmatprep.subr.bf16.mxu0 %v6838_v11  ;;  %v6874_v11 = vpack.c.bf16 %v5632_v25, %v5631_v26 }
 0x54f   : > { %v10780_v46 = vpop.f32.mrb[105].mxu0  ;;  %6841 = vmatpush1.bf16.xpose.msra.mxu0 %v6840_v9  ;;  %v5567_v9 = vpop.permute.xlu1 %5566 }
 0x550   : > { %v5592_v33 = vadd.f32 %v5567_v9, %v5544_v6 }
 0x552   : > { %v10788_v10 = vpop.f32.mrb[106].mxu0 }
 0x553   : > { %v6844_v39 = vpack.c.bf16 %v10788_v10, %v10778_v29  ;;  %v10792_v59 = vpop.f32.mrb[107].mxu0  ;;  %v5572_v0 = vpop.permute.xlu1 %5571 }
 0x554   : > { %v6842_v8 = vpack.c.bf16 %v10792_v59, %v10780_v46 }
 0x556   : > { %6843 = vmatprep.subr.bf16.mxu0 %v6842_v8  ;;  %v6876_v8 = vpack.c.bf16 %v5616_v36, %v5615_v60 }
 0x557   : > { %6845 = vmatpush1.bf16.xpose.msra.mxu0 %v6844_v39  ;;  %v5524_v39 = vpop.permute.xlu0 %5523  ;;  %v5577_v45 = vpop.permute.xlu1 %5576 }
 0x558   : > { %6847 = vmatprep.subr.bf16.mxu0 %v6846_v17  ;;  %v5541_v17 = vmul.f32 %v5514_v35, %v10753_v20  ;;  %v5545_v37 = vmul.f32 %v5524_v39, %v10766_v13  ;;  %v5414_v35 = vld [vmem:[%s11081_s13 + $0x10] sm:$0xff] }
 0x55a   : > { %v5589_v61 = vadd.f32 %v5562_v5, %v5541_v17  ;;  %v5593_v43 = vadd.f32 %v5572_v0, %v5545_v37  ;;  %v5415_v5 = vld [vmem:[%s11081_s13 + $0x18] sm:$0xff] }
 0x55b   : > { %v5529_v40 = vpop.permute.xlu0 %5528 }
 0x55e   : > { %5382 = vmatmul.mubr.f32.vlgmr.msra.gmra.mrb[108].mxu0 %v10753_v20  ;;  %v5548_v20 = vmul.f32 %v5529_v40, %v10774_v63 }
 0x55f   : > { %5386 = vmatprep.mubr.f32.mxu0 %v10762_v19  ;;  %6849 = vmatpush3.bf16.msra.mxu0 %v6848_v44  ;;  %v5543_v44 = vmul.f32 %v5519_v49, %v10758_v50  ;;  %v5547_v19 = vmul.f32 %v5529_v40, %v10770_v47  ;;  %v5434_v40 = vld [vmem:[%s11082_s14 + $0x20] sm:$0xff] }
 0x560   : > { %6851 = vmatprep.subr.bf16.mxu0 %v6850_v18  ;;  %v5546_v18 = vmul.f32 %v5524_v39, %v10768_v38  ;;  %v5596_v12 = vadd.f32 %v5577_v45, %v5548_v20  ;;  %v5435_v20 = vld [vmem:[%s11082_s14 + $0x28] sm:$0xff] }
 0x561   : > { %v5591_v52 = vadd.f32 %v5567_v9, %v5543_v44  ;;  %v5433_v9 = vld [vmem:[%s11082_s14 + $0x18] sm:$0xff] }
 0x562   : > { %5387 = vmatmul.mubr.f32.gmra.mrb[110].mxu0 %v10758_v50 }
 0x563   : > { %5391 = vmatprep.mubr.f32.mxu0 %v10768_v38  ;;  %6853 = vmatpush3.bf16.msra.mxu0 %v6852_v1  ;;  %v5594_v1 = vadd.f32 %v5572_v0, %v5546_v18  ;;  %v5582_v38 = vpop.permute.xlu1 %5581  ;;  %v5417_v0 = vld [vmem:[%s11081_s13 + $0x28] sm:$0xff] }
 0x564   : > { %6855 = vmatprep.subr.bf16.mxu0 %v6854_v42  ;;  %v5534_v42 = vpop.permute.xlu0 %5533 }
 0x565   : > { %v5550_v50 = vmul.f32 %v5534_v42, %v10780_v46  ;;  %v5549_v28 = vmul.f32 %v5534_v42, %v10778_v29 }
 0x566   : > { %5392 = vmatmul.mubr.f32.gmra.mrb[112].mxu0 %v10766_v13  ;;  %v5595_v13 = vadd.f32 %v5577_v45, %v5547_v19 }
 0x567   : > { %5396 = vmatprep.mubr.f32.mxu0 %v10774_v63  ;;  %6857 = vmatpush3.bf16.msra.mxu0 %v6856_v58  ;;  %v5598_v63 = vadd.f32 %v5582_v38, %v5550_v50 }
 0x568   : > { %6859 = vmatprep.subr.bf16.mxu0 %v6858_v15  ;;  %v5539_v27 = vpop.permute.xlu0 %5538  ;;  %v5587_v15 = vpop.permute.xlu1 %5586 }
 0x569   : > { %v5552_v58 = vmul.f32 %v5539_v27, %v10792_v59  ;;  %v5551_v34 = vmul.f32 %v5539_v27, %v10788_v10 }
 0x56a   : > { %5397 = vmatmul.mubr.f32.gmra.mrb[114].mxu0 %v10770_v47  ;;  %v5597_v47 = vadd.f32 %v5582_v38, %v5549_v28 }
 0x56b   : > { %5401 = vmatprep.mubr.f32.mxu0 %v10780_v46  ;;  %6861 = vmatpush3.bf16.msra.mxu0 %v6860_v30  ;;  %v5600_v4 = vadd.f32 %v5587_v15, %v5552_v58  ;;  %v5599_v46 = vadd.f32 %v5587_v15, %v5551_v34  ;;  %v6649_v58 = vld [vmem:[%s11086_s18] ss:$0 sm:$0xff] }
 0x56c   : > { %6863 = vmatprep.subr.bf16.mxu0 %v6862_v14  ;;  %v5860_v34 = vld [vmem:[%s11087_s19] sm:$0xff] }
 0x56e   : > { %5402 = vmatmul.mubr.f32.gmra.mrb[116].mxu0 %v10778_v29 }
 0x56f   : > { %5406 = vmatprep.mubr.f32.mxu0 %v10792_v59  ;;  %6865 = vmatpush3.bf16.msra.mxu0 %v6864_v57  ;;  %v5413_v59 = vld [vmem:[%s11081_s13 + $0x8] sm:$0xff] }
 0x570   : > { %6867 = vmatprep.subr.bf16.mxu0 %v6866_v21  ;;  %v5431_v57 = vld [vmem:[%s11082_s14 + $0x8] sm:$0xff] }
 0x572   : > { %5407 = vmatmul.mubr.f32.gmra.mrb[118].mxu0 %v10788_v10  ;;  %v5430_v10 = vld [vmem:[%s11082_s14] sm:$0xff] }
 0x573   : > { %6869 = vmatpush3.bf16.msra.mxu0 %v6868_v24  ;;  %5697 = vmatprep.mubr.f32.mxu0 %v5590_v41  ;;  %v5432_v24 = vld [vmem:[%s11082_s14 + $0x10] sm:$0xff] }
 0x574   : > { %6871 = vmatprep.subr.bf16.mxu0 %v6870_v48 }
 0x577   : > { %6873 = vmatpush3.bf16.msra.mxu0 %v6872_v16  ;;  %v5416_v16 = vld [vmem:[%s11081_s13 + $0x20] sm:$0xff] }
 0x578   : > { %6875 = vmatprep.subr.bf16.mxu0 %v6874_v11 }
 0x57b   : > { %6877 = vmatpush3.bf16.msra.mxu0 %v6876_v8 }
 0x57e   : > { %5698 = vmatmul.mubr.f32.vlgmr.msra.gmra.mrb[120].mxu0 %v5589_v61 }
 0x57f   : > { %5702 = vmatprep.mubr.f32.mxu0 %v5592_v33 }
 0x582   : > { %5703 = vmatmul.mubr.f32.gmra.mrb[122].mxu0 %v5591_v52 }
 0x583   : > { %5707 = vmatprep.mubr.f32.mxu0 %v5594_v1 }
 0x586   : > { %5708 = vmatmul.mubr.f32.gmra.mrb[124].mxu0 %v5593_v43 }
 0x587   : > { %5712 = vmatprep.mubr.f32.mxu0 %v5596_v12 }
 0x58a   : > { %5713 = vmatmul.mubr.f32.gmra.mrb[126].mxu0 %v5595_v13 }
 0x58b   : > { %5717 = vmatprep.mubr.f32.mxu0 %v5598_v63 }
 0x58e   : > { %5718 = vmatmul.mubr.f32.gmra.mrb[128].mxu0 %v5597_v47 }
 0x58f   : > { %5722 = vmatprep.mubr.f32.mxu0 %v5600_v4 }
 0x592   : > { %5723 = vmatmul.mubr.f32.gmra.mrb[130].mxu0 %v5599_v46 }
 0x631   : > { %v5383_v29 = vpop.f32.mrb[108].mxu0 }
 0x632   : > { %v5418_v55 = vmul.f32 %v5412_v31, %v5383_v29  ;;  %v5385_v30 = vpop.f32.mrb[109].mxu0 }
 0x633   : > { %v5902_v30 = vld [vmem:[%s11088_s20] sm:$0xff] }
 0x634   : > { %v5424_v14 = vmax.f32 %v5418_v55, 0.0 }
 0x635   : > { %v5388_v51 = vpop.f32.mrb[110].mxu0 }
 0x636   : > { %v5419_v23 = vmul.f32 %v5413_v59, %v5388_v51  ;;  %v5390_v54 = vpop.f32.mrb[111].mxu0  ;;  %v10918_v53 = vadd.f32 %v5430_v10, %v5424_v14  ;;  %v5903_v51 = vld [vmem:[%s11088_s20 + $0x8] sm:$0xff] }
 0x638   : > { %v5425_v21 = vmax.f32 %v5419_v23, 0.0  ;;  %v5443_v62 = vsel %vm5442_vm1, %v10918_v53, 0.0  ;;  %v5861_v23 = vld [vmem:[%s11087_s19 + $0x8] sm:$0xff] }
 0x639   : > { %5444 = vadd.xlane.f32.xlu0 %v5443_v62  ;;  %v5393_v2 = vpop.f32.mrb[112].mxu0 }
 0x63a   : > { %v5420_v3 = vmul.f32 %v5414_v35, %v5393_v2  ;;  %v5395_v7 = vpop.f32.mrb[113].mxu0  ;;  %v10928_v22 = vadd.f32 %v5431_v57, %v5425_v21 }
 0x63b   : > { %v5862_v7 = vld [vmem:[%s11087_s19 + $0x10] sm:$0xff] }
 0x63c   : > { %v5426_v49 = vmax.f32 %v5420_v3, 0.0  ;;  %v5446_v48 = vsel %vm5442_vm1, %v10928_v22, 0.0  ;;  %v5863_v3 = vld [vmem:[%s11087_s19 + $0x18] sm:$0xff] }
 0x63d   : > { %5447 = vadd.xlane.f32.xlu1 %v5446_v48  ;;  %v5479_v32 = vadd.f32 %v5446_v48, %v5443_v62  ;;  %v5398_v56 = vpop.f32.mrb[114].mxu0  ;;  %v5905_v48 = vld [vmem:[%s11088_s20 + $0x18] sm:$0xff] }
 0x63e   : > { %v5421_v41 = vmul.f32 %v5415_v5, %v5398_v56  ;;  %v5400_v26 = vpop.f32.mrb[115].mxu0  ;;  %v10938_v25 = vadd.f32 %v5432_v24, %v5426_v49 }
 0x640   : > { %v5427_v11 = vmax.f32 %v5421_v41, 0.0  ;;  %v5449_v60 = vsel %vm5442_vm1, %v10938_v25, 0.0 }
 0x641   : > { %5450 = vadd.xlane.f32.xlu0 %v5449_v60  ;;  %v5480_v36 = vadd.f32 %v5479_v32, %v5449_v60  ;;  %v5403_v39 = vpop.f32.mrb[116].mxu0  ;;  %v5904_v32 = vld [vmem:[%s11088_s20 + $0x10] sm:$0xff]  ;;  %v5906_v60 = vld [vmem:[%s11088_s20 + $0x20] sm:$0xff] }
 0x642   : > { %v5422_v8 = vmul.f32 %v5416_v16, %v5403_v39  ;;  %v5405_v17 = vpop.f32.mrb[117].mxu0  ;;  %v10948_v6 = vadd.f32 %v5433_v9, %v5427_v11  ;;  %v5865_v16 = vld [vmem:[%s11087_s19 + $0x28] sm:$0xff]  ;;  %v5864_v9 = vld [vmem:[%s11087_s19 + $0x20] sm:$0xff] }
 0x643   : > { %v5907_v11 = vld [vmem:[%s11088_s20 + $0x28] sm:$0xff] }
 0x644   : > { %v5428_v61 = vmax.f32 %v5422_v8, 0.0  ;;  %v5452_v44 = vsel %vm5442_vm1, %v10948_v6, 0.0 }
 0x645   : > { %5453 = vadd.xlane.f32.xlu0 %v5452_v44  ;;  %v5481_v18 = vadd.f32 %v5480_v36, %v5452_v44  ;;  %v5408_v33 = vpop.f32.mrb[118].mxu0 }
 0x646   : > { %v5423_v45 = vmul.f32 %v5417_v0, %v5408_v33  ;;  %v5410_v37 = vpop.f32.mrb[119].mxu0  ;;  %v10958_v52 = vadd.f32 %v5434_v40, %v5428_v61 }
 0x648   : > { %v5429_v1 = vmax.f32 %v5423_v45, 0.0  ;;  %v5455_v42 = vsel %vm5442_vm1, %v10958_v52, 0.0 }
 0x649   : > { %5456 = vadd.xlane.f32.xlu1 %v5455_v42  ;;  %v5482_v19 = vadd.f32 %v5481_v18, %v5455_v42 }
 0x64a   : > { %v10965_v43 = vadd.f32 %v5435_v20, %v5429_v1 }
 0x64c   : > { %v5458_v50 = vsel %vm5442_vm1, %v10965_v43, 0.0 }
 0x64d   : > { %5459 = vadd.xlane.f32.xlu0 %v5458_v50  ;;  %v5483_v12 = vadd.f32 %v5482_v19, %v5458_v50 }
 0x64f   : > { %v5484_v36 = vrot.slane %v5483_v12, 4 }
 0x651   : > { %v6702_v38 = vpop.f32.mrb[120].mxu0  ;;  %v5485_v39 = vadd.f32 %v5484_v36, %v5483_v12 }
 0x652   : > { %v6703_v27 = vpop.f32.mrb[121].mxu0 }
 0x653   : > { %v6704_v28 = vadd.f32 %v6703_v27, %v6702_v38  ;;  %v5486_v8 = vrot.slane %v5485_v39, 2 }
 0x655   : > { %v6705_v13 = vpop.f32.mrb[122].mxu0  ;;  %v5735_v47 = vsub.f32 %v6704_v28, %v6649_v58  ;;  %v5487_v17 = vadd.f32 %v5486_v8, %v5485_v39 }
 0x656   : > { %v6706_v63 = vpop.f32.mrb[123].mxu0 }
 0x657   : > { %v6707_v15 = vadd.f32 %v6706_v63, %v6705_v13  ;;  %v5488_v0 = vrot.slane %v5487_v17, 1 }
 0x659   : > { %v5736_v4 = vsub.f32 %v6707_v15, %v6649_v58  ;;  %v6708_v46 = vpop.f32.mrb[124].mxu0  ;;  %v5489_v40 = vadd.f32 %v5488_v0, %v5487_v17 }
 0x65a   : > { %5868 = vperm.xlu1 %7148, %v5860_v34   ;;  %v6709_v31 = vpop.f32.mrb[125].mxu0 }
 0x65b   : > { %v6710_v29 = vadd.f32 %v6709_v31, %v6708_v46  ;;  %v6878_v55 = vpack.c.bf16 %v5736_v4, %v5735_v47  ;;  %vm5490_vm2 = vcmp.eq.f32.partialorder %v5489_v40, 0.0 }
 0x65c   : > { %v5491_v44 = vsel %vm5490_vm2, 1.0, %v5489_v40 }
 0x65d   : > { %v6711_v59 = vpop.f32.mrb[126].mxu0  ;;  %6879 = vmatprep.subr.bf16.mxu1 %v6878_v55  ;;  %v5737_v54 = vsub.f32 %v6710_v29, %v6649_v58 }
 0x65e   : > { %5910 = vperm.xlu1 %7148, %v5902_v30   ;;  %v6712_v10 = vpop.f32.mrb[127].mxu0  ;;  %6881 = vmatpush3.bf16.msra.mxu1 %v6878_v55 }
 0x65f   : > { %v6713_v14 = vadd.f32 %v6712_v10, %v6711_v59 }
 0x661   : > { %v5738_v35 = vsub.f32 %v6713_v14, %v6649_v58  ;;  %v6714_v57 = vpop.f32.mrb[128].mxu0  ;;  %v5944_v14 = vld [vmem:[%s11089_s21] sm:$0xff] }
 0x662   : > { %5915 = vperm.xlu1 %7148, %v5903_v51   ;;  %v6715_v21 = vpop.f32.mrb[129].mxu0 }
 0x663   : > { %v6716_v62 = vadd.f32 %v6715_v21, %v6714_v57  ;;  %5873 = vperm.xlu0 %7147, %v5861_v23   ;;  %v6882_v2 = vpack.c.bf16 %v5738_v35, %v5737_v54 }
 0x665   : > { %v6717_v5 = vpop.f32.mrb[130].mxu0  ;;  %6883 = vmatprep.subr.bf16.mxu1 %v6882_v2  ;;  %v5739_v56 = vsub.f32 %v6716_v62, %v6649_v58 }
 0x666   : > { %5883 = vperm.xlu1 %7148, %v5863_v3   ;;  %v6718_v24 = vpop.f32.mrb[131].mxu0  ;;  %6885 = vmatpush3.bf16.msra.mxu1 %v6882_v2 }
 0x667   : > { %v6719_v49 = vadd.f32 %v6718_v24, %v6717_v5  ;;  %5878 = vperm.xlu0 %7147, %v5862_v7  }
 0x669   : > { %v5740_v41 = vsub.f32 %v6719_v49, %v6649_v58 }
 0x66a   : > { %5925 = vperm.xlu1 %7148, %v5905_v48  }
 0x66b   : > { %5920 = vperm.xlu0 %7147, %v5904_v32   ;;  %v6886_v26 = vpack.c.bf16 %v5740_v41, %v5739_v56 }
 0x66d   : > { %6887 = vmatprep.subr.bf16.mxu1 %v6886_v26 }
 0x66e   : > { %5893 = vperm.xlu1 %7148, %v5865_v16   ;;  %6889 = vmatpush3.bf16.msra.mxu1 %v6886_v26 }
 0x66f   : > { %5888 = vperm.xlu0 %7147, %v5864_v9   ;;  %6771 = vmatprep.subr.mxu1 %v5944_v14 }
 0x672   : > { %5935 = vperm.xlu1 %7148, %v5907_v11  }
 0x673   : > { %5930 = vperm.xlu0 %7147, %v5906_v60  }
 0x6c6   : > { %v5445_v61 = vpop.xlane.xlu0 %5444 }
 0x6c7   : > { %vm5461_vm3 = vcmp.eq.f32.partialorder %v5445_v61, 0.0 }
 0x6c8   : > { %v5467_v18 = vsel %vm5461_vm3, 1.0, %v5445_v61 }
 0x6c9   : > { %7697 = vrsqrt.f32 %v5467_v18 }
 0x6ca   : > { %v5448_v33 = vpop.xlane.xlu1 %5447  ;;  %7699 = vrsqrt.f32 %v5491_v44 }
 0x6cb   : > { %vm5462_vm4 = vcmp.eq.f32.partialorder %v5448_v33, 0.0 }
 0x6cc   : > { %v5468_v45 = vsel %vm5462_vm4, 1.0, %v5448_v33 }
 0x6cd   : > { %7701 = vrsqrt.f32 %v5468_v45 }
 0x6ce   : > { %v5451_v37 = vpop.xlane.xlu0 %5450 }
 0x6cf   : > { %vm5463_vm5 = vcmp.eq.f32.partialorder %v5451_v37, 0.0 }
 0x6d0   : > { %v5469_v20 = vsel %vm5463_vm5, 1.0, %v5451_v37  ;;  %v6071_v37 = vld [vmem:[%s11091_s23] sm:$0xff] }
 0x6d1   : > { %7703 = vrsqrt.f32 %v5469_v20  ;;  %6794 = vmatprep.mubr.msk.f32.mxu0 %vm5442_vm1, %v6071_v37  ;;  %v6060_v20 = vld [vmem:[%s11475_s6 + $0x8] sm:$0xff] }
 0x6d2   : > { %v5454_v1 = vpop.xlane.xlu0 %5453 }
 0x6d3   : > { %v7698_v42 = vpop.eup %7697  ;;  %vm5464_vm6 = vcmp.eq.f32.partialorder %v5454_v1, 0.0 }
 0x6d4   : > { %v5470_v19 = vsel %vm5464_vm6, 1.0, %v5454_v1  ;;  %v5493_v50 = vmul.f32 %v7698_v42, %v10918_v53  ;;  %v7700_v12 = vpop.eup %7699  ;;  %v6059_v1 = vld [vmem:[%s11475_s6] sm:$0xff] }
 0x6d5   : > { %7705 = vrsqrt.f32 %v5470_v19 }
 0x6d6   : > { %v5457_v38 = vpop.xlane.xlu1 %5456  ;;  %v5499_v27 = vmul.f32 %v7700_v12, %v5493_v50 }
 0x6d7   : > { %v7702_v28 = vpop.eup %7701  ;;  %vm5465_vm7 = vcmp.eq.f32.partialorder %v5457_v38, 0.0 }
 0x6d8   : > { %v5494_v13 = vmul.f32 %v7702_v28, %v10928_v22  ;;  %v5471_v58 = vsel %vm5465_vm7, 1.0, %v5457_v38  ;;  %6762 = vmatprep.mubr.msk.f32.mxu1 %vm5442_vm1, %v5499_v27  ;;  %v6062_v27 = vld [vmem:[%s11475_s6 + $0x18] sm:$0xff]  ;;  %v6061_v28 = vld [vmem:[%s11475_s6 + $0x10] sm:$0xff] }
 0x6d9   : > { %7707 = vrsqrt.f32 %v5471_v58 }
 0x6da   : > { %v5500_v63 = vmul.f32 %v7700_v12, %v5494_v13  ;;  %v5460_v15 = vpop.xlane.xlu0 %5459 }
 0x6db   : > { %v7704_v34 = vpop.eup %7703  ;;  %vm5466_vm8 = vcmp.eq.f32.partialorder %v5460_v15, 0.0 }
 0x6dc   : > { %v5472_v47 = vsel %vm5466_vm8, 1.0, %v5460_v15  ;;  %6763 = vmatmul.mubr.msk.f32.vlgmr.msra.gmra.mrb[96].mxu1 %vm5442_vm1, %v5500_v63  ;;  %v5495_v53 = vmul.f32 %v7704_v34, %v10938_v25 }
 0x6dd   : > { %7709 = vrsqrt.f32 %v5472_v47  ;;  %6772 = vmatpush3.msra.mxu1 %v5944_v14  ;;  %v6064_v47 = vld [vmem:[%s11475_s6 + $0x28] sm:$0xff] }
 0x6de   : > { %v5501_v4 = vmul.f32 %v7700_v12, %v5495_v53  ;;  %v6063_v53 = vld [vmem:[%s11475_s6 + $0x20] sm:$0xff] }
 0x6df   : > { %v7706_v46 = vpop.eup %7705 }
 0x6e0   : > { %6765 = vmatprep.mubr.msk.f32.mxu1 %vm5442_vm1, %v5501_v4  ;;  %v5496_v22 = vmul.f32 %v7706_v46, %v10948_v6  ;;  %v5869_v6 = vpop.permute.xlu1 %5868 }
 0x6e2   : > { %v5502_v31 = vmul.f32 %v7700_v12, %v5496_v22  ;;  %v5874_v23 = vpop.permute.xlu0 %5873 }
 0x6e3   : > { %v7708_v29 = vpop.eup %7707 }
 0x6e4   : > { %6766 = vmatmul.mubr.msk.f32.gmra.mrb[98].mxu1 %vm5442_vm1, %v5502_v31  ;;  %v5497_v55 = vmul.f32 %v7708_v29, %v10958_v52  ;;  %v5911_v51 = vpop.permute.xlu1 %5910 }
 0x6e6   : > { %v5503_v30 = vmul.f32 %v7700_v12, %v5497_v55  ;;  %v5879_v62 = vpop.permute.xlu0 %5878  ;;  %v6072_v55 = vld [vmem:[%s11091_s23 + $0x8] sm:$0xff] }
 0x6e7   : > { %v7710_v59 = vpop.eup %7709 }
 0x6e8   : > { %6768 = vmatprep.mubr.msk.f32.mxu1 %vm5442_vm1, %v5503_v30  ;;  %v5498_v10 = vmul.f32 %v7710_v59, %v10965_v43  ;;  %v5916_v54 = vpop.permute.xlu1 %5915  ;;  %v6154_v30 = vld [vmem:[%s11477_s1] sm:$0x3f] }
 0x6ea   : > { %v5504_v25 = vmul.f32 %v7700_v12, %v5498_v10  ;;  %v5921_v49 = vpop.permute.xlu0 %5920 }
 0x6ec   : > { %6769 = vmatmul.mubr.msk.f32.gmra.mrb[100].mxu1 %vm5442_vm1, %v5504_v25  ;;  %v5884_v43 = vpop.permute.xlu1 %5883  ;;  %v6664_v25 = vld [vmem:[%s11478_s24] ss:$0 sm:$0xff] }
 0x6ee   : > { %v5889_v11 = vpop.permute.xlu0 %5888 }
 0x6f0   : > { %v5926_v56 = vpop.permute.xlu1 %5925 }
 0x6f2   : > { %v5931_v44 = vpop.permute.xlu0 %5930 }
 0x6f4   : > { %v5894_v36 = vpop.permute.xlu1 %5893 }
 0x6f8   : > { %v5936_v18 = vpop.permute.xlu1 %5935 }
 0x7af   : > { %v6764_v52 = vpop.f32.mrb[96].mxu1 }
 0x7b0   : > { %v5855_v35 = vmax.f32 %v6764_v52, 0.0  ;;  %v5825_v57 = vpop.f32.mrb[97].mxu1 }
 0x7b1   : > { %v5854_v21 = vmax.f32 %v5825_v57, 0.0 }
 0x7b2   : > { %v5897_v2 = vmul.f32 %v5874_v23, %v5855_v35 }
 0x7b3   : > { %v5896_v3 = vmul.f32 %v5869_v6, %v5854_v21 }
 0x7b4   : > { %v5939_v5 = vadd.f32 %v5916_v54, %v5897_v2 }
 0x7b5   : > { %v5938_v7 = vadd.f32 %v5911_v51, %v5896_v3 }
 0x7b7   : > { %v6767_v24 = vpop.f32.mrb[98].mxu1  ;;  %6773 = vmatprep.mubr.msk.f32.mxu1 %vm5945_vm9, %v5938_v7 }
 0x7b8   : > { %v5857_v48 = vmax.f32 %v6767_v24, 0.0  ;;  %v5835_v32 = vpop.f32.mrb[99].mxu1  ;;  %6774 = vmatmul.mubr.msk.f32.vlgmr.msra.gmra.mrb[102].mxu1 %vm5945_vm9, %v5939_v5 }
 0x7b9   : > { %v5856_v41 = vmax.f32 %v5835_v32, 0.0 }
 0x7ba   : > { %v5899_v26 = vmul.f32 %v5884_v43, %v5857_v48 }
 0x7bb   : > { %v5898_v16 = vmul.f32 %v5879_v62, %v5856_v41 }
 0x7bc   : > { %v5941_v60 = vadd.f32 %v5926_v56, %v5899_v26 }
 0x7bd   : > { %v5940_v9 = vadd.f32 %v5921_v49, %v5898_v16 }
 0x7bf   : > { %v6770_v39 = vpop.f32.mrb[100].mxu1  ;;  %6776 = vmatprep.mubr.msk.f32.mxu1 %vm5945_vm9, %v5940_v9 }
 0x7c0   : > { %v5859_v8 = vmax.f32 %v6770_v39, 0.0  ;;  %v5845_v17 = vpop.f32.mrb[101].mxu1  ;;  %6777 = vmatmul.mubr.msk.f32.gmra.mrb[104].mxu1 %vm5945_vm9, %v5941_v60 }
 0x7c1   : > { %v5858_v0 = vmax.f32 %v5845_v17, 0.0 }
 0x7c2   : > { %v5901_v40 = vmul.f32 %v5894_v36, %v5859_v8 }
 0x7c3   : > { %v5900_v61 = vmul.f32 %v5889_v11, %v5858_v0 }
 0x7c4   : > { %v5943_v45 = vadd.f32 %v5936_v18, %v5901_v40 }
 0x7c5   : > { %v5942_v33 = vadd.f32 %v5931_v44, %v5900_v61 }
 0x7c7   : > { %6779 = vmatprep.mubr.msk.f32.mxu1 %vm5945_vm9, %v5942_v33 }
 0x7c8   : > { %6780 = vmatmul.mubr.msk.f32.gmra.mrb[106].mxu1 %vm5945_vm9, %v5943_v45 }
 0x88b   : > { %v6775_v42 = vpop.f32.mrb[102].mxu1 }
 0x88c   : > { %v6066_v19 = vmul.f32 %v6775_v42, %v6060_v20  ;;  %v6030_v50 = vpop.f32.mrb[103].mxu1 }
 0x88d   : > { %v6065_v12 = vmul.f32 %v6059_v1, %v6030_v50 }
 0x88f   : > { %v6890_v38 = vpack.c.bf16 %v6066_v19, %v6065_v12 }
 0x891   : > { %6891 = vmatprep.subr.bf16.mxu0 %v6890_v38 }
 0x892   : > { %6893 = vmatpush3.bf16.msra.mxu0 %v6890_v38 }
 0x893   : > { %v6778_v13 = vpop.f32.mrb[104].mxu1 }
 0x894   : > { %v6068_v58 = vmul.f32 %v6778_v13, %v6062_v27  ;;  %v6040_v63 = vpop.f32.mrb[105].mxu1 }
 0x895   : > { %v6067_v15 = vmul.f32 %v6061_v28, %v6040_v63 }
 0x897   : > { %v6894_v34 = vpack.c.bf16 %v6068_v58, %v6067_v15 }
 0x899   : > { %6895 = vmatprep.subr.bf16.mxu0 %v6894_v34 }
 0x89a   : > { %6897 = vmatpush3.bf16.msra.mxu0 %v6894_v34 }
 0x89b   : > { %v6781_v4 = vpop.f32.mrb[106].mxu1 }
 0x89c   : > { %v6070_v46 = vmul.f32 %v6781_v4, %v6064_v47  ;;  %v6050_v22 = vpop.f32.mrb[107].mxu1 }
 0x89d   : > { %v6069_v31 = vmul.f32 %v6063_v53, %v6050_v22 }
 0x89f   : > { %v6898_v29 = vpack.c.bf16 %v6070_v46, %v6069_v31 }
 0x8a1   : > { %6899 = vmatprep.subr.bf16.mxu0 %v6898_v29 }
 0x8a2   : > { %6901 = vmatpush3.bf16.msra.mxu0 %v6898_v29 }
 0x8a3   : > { %6797 = vmatprep.subr.msk.mxu0 %vm6169_vm10, %v6154_v30 }
 0x8a5   : > { %6795 = vmatmul.mubr.msk.f32.vlgmr.msra.gmra.mrb[132].mxu0 %vm5442_vm1, %v6072_v55 }
 0x8a6   : > { %6798 = vmatpush3.msk.msra.mxu0 %vm6169_vm10, %v6154_v30 }
 0x978   : > { %v6796_v59 = vpop.f32.mrb[132].mxu0 }
 0x979   : > { %v6145_v10 = vpop.f32.mrb[133].mxu0 }
 0x97a   : > { %6799 = vmatprep.mubr.msk.f32.mxu0 %vm6162_vm11, %v6145_v10 }
 0x97b   : > { %6800 = vmatmul.mubr.msk.f32.vlgmr.msra.gmra.mrb[134].mxu0 %vm6162_vm11, %v6796_v59 }
 0xa4e   : > { %v6801_v14 = vpop.f32.mrb[134].mxu0 }
 0xa4f   : > { %v6239_v6 = vpop.f32.mrb[135].mxu0  ;;  %v6245_v23 = vadd.f32 %v6801_v14, %v6664_v25 }
 0xa50   : > { %v6240_v51 = vadd.f32 %v6664_v25, %v6239_v6 }
 0xa51   : > { %6250 = vst.msk [vmem:[%s807_s28 + $0x8] sm:$0xff] %vm6248_vm12, %v6245_v23 }
 0xa52   : > { %6249 = vst.msk [vmem:[%s807_s28] sm:$0xff] %vm6248_vm12, %v6240_v51 }
 0xa53 PF: > { %s11480_s8 = sld [smem:[#allocation5_spill]] }
 0xa59   : > { %s37_s27 = sadd.s32 1, %s11480_s8  }
 0xa5a   : > { %p34_p2 = scmp.ge.s32.totalorder %s37_s27, 4  }
 0xa5c   :  { %36 = sbr.rel (!%p34_p2) target bundleno = 17 (0x11), region = 159 }
 0xa63   :  { %6273 = vsyncpa [#allocation3], 1 }
 0xa64   :  { %6275 = vsyncpa [#allocation3 + $0x1], 1 }

</bundles_post_ra>
